<compile_context>
chip_gen: v5e
topology: v5e:2x2
jax: 0.10.0
libtpu: 0.0.40
codegen_flags: <defaults>
</compile_context>

<pallas_src>
import jax
import jax.numpy as jnp
from jax.experimental import pallas as pl
from jax.experimental.pallas import tpu as pltpu

# --- static config (small shapes consistent with the module) ---
DIM_MODEL = 32
NUM_HEADS = 4
DIM_K = DIM_MODEL // NUM_HEADS          # 8
DIM_FF = 64
SHORT_MEM = 5
LONG_MEM = 6
MEM_TOTAL = LONG_MEM + SHORT_MEM        # 11
BATCH = 2
SEQ = 8
LN_EPS = 1e-5
QKV = 3 * DIM_MODEL                     # 96 packed q|k|v lanes


def _batches_per_step():
    # v7x has 2 TensorCores/chip: give each core one batch element via a
    # parallel grid.  v5e/v6e have a single TC, where extra grid steps only add
    # per-step overhead, so keep everything in one fused step there.
    try:
        kind = jax.devices()[0].device_kind.lower()
    except Exception:
        return BATCH
    return 1 if ("v7" in kind or "7x" in kind) else BATCH


# ---------------- fused kernel ----------------

def _layernorm(x, gamma, beta):
    mean = jnp.mean(x, axis=-1, keepdims=True)
    var = jnp.mean(jnp.square(x - mean), axis=-1, keepdims=True)
    return (x - mean) * jax.lax.rsqrt(var + LN_EPS) * gamma + beta


def _softmax(x):
    # last-dim softmax; divide mapped onto the EUP via the approx reciprocal
    x = x - jnp.max(x, axis=-1, keepdims=True)
    e = jnp.exp(x)
    return e * pl.reciprocal(jnp.sum(e, axis=-1, keepdims=True), approx=True)


def decoder_layer_kernel(x_ref, mem_ref, attn_w_ref, ff_w1_ref, ff_w2_ref,
                         vec_ref, mem_w_ref, out_ref):
    nb = x_ref.shape[1] // SEQ            # batch elements handled this grid step
    scale = DIM_K ** -0.5
    bf16 = jnp.bfloat16

    tgt = x_ref[0]                        # (nb*S, D) f32, batch-major rows
    enc = x_ref[1]

    # ---- packed-parameter views (all static slices, no extra DMAs) ----
    def attn_params(i):
        w = attn_w_ref[i]                 # (32, 128) bf16: [Wqkv(96) | Wo(32)]
        v = vec_ref[i]                    # (2, 128)  f32 : [bqkv|bo] / [gamma|beta]
        return dict(wqkv=w[:, 0:QKV], wo=w[:, QKV:QKV + DIM_MODEL],
                    bqkv=v[0:1, 0:QKV], bo=v[0:1, QKV:QKV + DIM_MODEL],
                    gamma=v[1:2, 0:DIM_MODEL],
                    beta=v[1:2, DIM_MODEL:2 * DIM_MODEL])

    def ff_params(j):
        v = vec_ref[4 + j]                # (2, 128) f32: [b1|b2|-] / [gamma|beta|-]
        return dict(w1=ff_w1_ref[j], w2=ff_w2_ref[j],
                    b1=v[0:1, 0:DIM_FF], b2=v[0:1, DIM_FF:DIM_FF + DIM_MODEL],
                    gamma=v[1:2, 0:DIM_MODEL],
                    beta=v[1:2, DIM_MODEL:2 * DIM_MODEL])

    def mem_params(k, msize):
        w = mem_w_ref[k]                  # (65, 8) f32: w_enc / w_dec / bias rows
        return (w[0:DIM_MODEL, 0:msize],
                w[DIM_MODEL:2 * DIM_MODEL, 0:msize],
                w[64:65, 0:msize])

    # ---- helpers ----
    def cat_rows(rows):
        return rows[0] if len(rows) == 1 else jnp.concatenate(rows, axis=0)

    def per_batch_mean(x):                # (nb*S, D) -> (nb, D)
        return cat_rows([jnp.mean(x[b * SEQ:(b + 1) * SEQ], axis=0, keepdims=True)
                         for b in range(nb)])

    def mha_full(qk_in, v_in, p, shared):
        # Full multi-head attention, batch folded into rows.  The head
        # projections are one wide matmul (or two when q/k and v inputs differ);
        # only the tiny score/ctx dots are per (batch, head).
        if shared:
            proj = jnp.dot(qk_in.astype(bf16), p["wqkv"],
                           preferred_element_type=jnp.float32) + p["bqkv"]
            q = proj[:, 0:DIM_MODEL]
            k = proj[:, DIM_MODEL:2 * DIM_MODEL]
            v = proj[:, 2 * DIM_MODEL:QKV]
        else:
            qk = jnp.dot(qk_in.astype(bf16), p["wqkv"][:, 0:2 * DIM_MODEL],
                         preferred_element_type=jnp.float32) + p["bqkv"][:, 0:2 * DIM_MODEL]
            q = qk[:, 0:DIM_MODEL]
            k = qk[:, DIM_MODEL:2 * DIM_MODEL]
            v = jnp.dot(v_in.astype(bf16), p["wqkv"][:, 2 * DIM_MODEL:QKV],
                        preferred_element_type=jnp.float32) + p["bqkv"][:, 2 * DIM_MODEL:QKV]
        ctx_rows = []
        for b in range(nb):               # static
            r = slice(b * SEQ, (b + 1) * SEQ)
            heads = []
            for h in range(NUM_HEADS):    # static
                c = slice(h * DIM_K, (h + 1) * DIM_K)
                s = jnp.dot(q[r, c], k[r, c].T,
                            preferred_element_type=jnp.float32) * scale
                heads.append(jnp.dot(_softmax(s), v[r, c],
                                     preferred_element_type=jnp.float32))
            ctx_rows.append(jnp.concatenate(heads, axis=-1))   # (S, 32) head-contig
        ctx = cat_rows(ctx_rows)                               # (nb*S, 32)
        return jnp.dot(ctx.astype(bf16), p["wo"],
                       preferred_element_type=jnp.float32) + p["bo"]

    def mha_uniform(v_mean, p):
        # q/k rows are identical -> softmax over constant logits is exactly
        # uniform -> ctx = mean_j(v_j @ Wv + bv) = v_mean @ Wv + bv.
        vh = jnp.dot(v_mean.astype(bf16), p["wqkv"][:, 2 * DIM_MODEL:QKV],
                     preferred_element_type=jnp.float32) + p["bqkv"][:, 2 * DIM_MODEL:QKV]
        return jnp.dot(vh.astype(bf16), p["wo"],
                       preferred_element_type=jnp.float32) + p["bo"]       # (nb, D)

    def ff_res(x, p):
        h = jnp.maximum(jnp.dot(x.astype(bf16), p["w1"],
                                preferred_element_type=jnp.float32) + p["b1"], 0.0)
        y = jnp.dot(h.astype(bf16), p["w2"],
                    preferred_element_type=jnp.float32) + p["b2"]
        return _layernorm(x + y, p["gamma"], p["beta"])

    def mem_attn(enc_mean, dec_mean, row_lo, msize, k_idx):
        # torch: alpha = softmax_M(mean_S(Linear(cat([enc, dec], -1)))).
        # Linearity => take the per-batch means first; split weight avoids the
        # lane-axis concatenation.  Returns one summary row per batch.
        w_e, w_d, bias = mem_params(k_idx, msize)
        logits = (jnp.dot(enc_mean, w_e, preferred_element_type=jnp.float32)
                  + jnp.dot(dec_mean, w_d, preferred_element_type=jnp.float32)
                  + bias)                                       # (nb, M)
        alpha = _softmax(logits)
        return cat_rows([jnp.dot(alpha[b:b + 1],
                                 mem_ref[b, row_lo:row_lo + msize, :],
                                 preferred_element_type=jnp.float32)
                         for b in range(nb)])                   # (nb, D)

    p0, p1, p2, p3 = attn_params(0), attn_params(1), attn_params(2), attn_params(3)
    f0, f1 = ff_params(0), ff_params(1)

    # attention_1: MHA(tgt, tgt, tgt), residual tgt          [tgt_mask is None]
    dec = _layernorm(tgt + mha_full(tgt, tgt, p0, shared=True),
                     p0["gamma"], p0["beta"])                   # (nb*S, D)

    enc_mean = per_batch_mean(enc)        # reused by the memory attention(s)
    dec_mean = per_batch_mean(dec)

    # long_memory_attention(enc, dec, long_memory) -> one summary row / batch
    lmem = mem_attn(enc_mean, dec_mean, 0, LONG_MEM, 0)         # (nb, D)

    # attention_2: MHA(lmem, lmem, dec), residual lmem.  q/k rows identical per
    # batch -> exactly uniform attention -> result rows identical per batch,
    # so keep it as one row per batch from here on.
    dec_row = _layernorm(lmem + mha_uniform(dec_mean, p1),
                         p1["gamma"], p1["beta"])               # (nb, D)

    # feed_forward_1 (rows are constant per batch)
    dec_row = ff_res(dec_row, f0)                               # (nb, D)

    # short_memory_attention(enc, dec, short_memory): its output has identical
    # rows and is consumed only as K of attention_3, whose attention weights are
    # uniform for exactly that reason -> it cannot influence the layer output,
    # so it is not materialized (mathematically exact; validated in __main__).
    # attention_3: MHA(enc, smem, dec), residual enc -> uniform over keys.
    attn3 = mha_uniform(dec_row, p2)                            # (nb, D)
    dec = _layernorm(
        cat_rows([enc[b * SEQ:(b + 1) * SEQ] + attn3[b:b + 1] for b in range(nb)]),
        p2["gamma"], p2["beta"])                                # (nb*S, D)

    # attention_4: MHA(enc, enc, dec), residual enc           [src_mask is None]
    dec = _layernorm(enc + mha_full(enc, dec, p3, shared=False),
                     p3["gamma"], p3["beta"])

    # feed_forward_2
    out = ff_res(dec, f1)                                       # (nb*S, D)
    for b in range(nb):
        out_ref[b] = out[b * SEQ:(b + 1) * SEQ]


# ---------------- parameters (torch-like layout) + packing ----------------

def init_params(key):
    ks = jax.random.split(key, 8)

    def mha_p(k):
        k1, k2, k3, k4 = jax.random.split(k, 4)
        return dict(
            # packed [Wq | Wk | Wv], heads lane-contiguous inside each block
            wqkv=jax.random.normal(k1, (DIM_MODEL, QKV), jnp.float32) * 0.05,
            bqkv=jax.random.normal(k2, (QKV,), jnp.float32) * 0.05,
            wo=jax.random.normal(k3, (NUM_HEADS * DIM_K, DIM_MODEL), jnp.float32) * 0.05,
            bo=jax.random.normal(k4, (DIM_MODEL,), jnp.float32) * 0.05,
            gamma=jnp.ones((DIM_MODEL,), jnp.float32),
            beta=jnp.zeros((DIM_MODEL,), jnp.float32))

    def ff_p(k):
        k1, k2, k3, k4 = jax.random.split(k, 4)
        return dict(
            w1=jax.random.normal(k1, (DIM_MODEL, DIM_FF), jnp.float32) * 0.05,
            b1=jax.random.normal(k2, (DIM_FF,), jnp.float32) * 0.05,
            w2=jax.random.normal(k3, (DIM_FF, DIM_MODEL), jnp.float32) * 0.05,
            b2=jax.random.normal(k4, (DIM_MODEL,), jnp.float32) * 0.05,
            gamma=jnp.ones((DIM_MODEL,), jnp.float32),
            beta=jnp.zeros((DIM_MODEL,), jnp.float32))

    def mem_p(k, m):
        k1, k2 = jax.random.split(k, 2)
        # torch Linear(2*D, m).weight.T: rows 0:D act on enc, rows D:2D on dec
        return dict(w_cat=jax.random.normal(k1, (2 * DIM_MODEL, m), jnp.float32) * 0.05,
                    b=jax.random.normal(k2, (m,), jnp.float32) * 0.05)

    return dict(attn1=mha_p(ks[0]), attn2=mha_p(ks[1]),
                attn3=mha_p(ks[2]), attn4=mha_p(ks[3]),
                ff1=ff_p(ks[4]), ff2=ff_p(ks[5]),
                long_mem=mem_p(ks[6], LONG_MEM),
                short_mem=mem_p(ks[7], SHORT_MEM))


def pack_params(p):
    """Consolidate ~40 tiny per-module tensors into 5 lane-dense slabs
    (cuts kernel input DMAs ~6x and removes 16x lane padding; weights bf16)."""
    def attn_slab(a):       # (32, 128) bf16: [Wqkv(96) | Wo(32)]
        return jnp.concatenate([a["wqkv"], a["wo"]], axis=1).astype(jnp.bfloat16)

    def attn_vec(a):        # (2, 128) f32
        r0 = jnp.concatenate([a["bqkv"], a["bo"]])
        r1 = jnp.concatenate([a["gamma"], a["beta"], jnp.zeros((64,), jnp.float32)])
        return jnp.stack([r0, r1])

    def ff_vec(f):          # (2, 128) f32
        r0 = jnp.concatenate([f["b1"], f["b2"], jnp.zeros((32,), jnp.float32)])
        r1 = jnp.concatenate([f["gamma"], f["beta"], jnp.zeros((64,), jnp.float32)])
        return jnp.stack([r0, r1])

    def mem_slab(m, msize):  # (65, 8) f32: rows 0:32 w_enc, 32:64 w_dec, 64 bias
        w = jnp.zeros((65, 8), jnp.float32)
        w = w.at[0:64, 0:msize].set(m["w_cat"])
        w = w.at[64, 0:msize].set(m["b"])
        return w

    attns = [p["attn1"], p["attn2"], p["attn3"], p["attn4"]]
    ffs = [p["ff1"], p["ff2"]]
    return dict(
        attn_w=jnp.stack([attn_slab(a) for a in attns]),                         # (4,32,128) bf16
        ff_w1=jnp.stack([f["w1"] for f in ffs]).astype(jnp.bfloat16),            # (2,32,64) bf16
        ff_w2=jnp.stack([f["w2"] for f in ffs]).astype(jnp.bfloat16),            # (2,64,32) bf16
        vec=jnp.stack([attn_vec(a) for a in attns] + [ff_vec(f) for f in ffs]),  # (6,2,128) f32
        mem_w=jnp.stack([mem_slab(p["long_mem"], LONG_MEM),
                         mem_slab(p["short_mem"], SHORT_MEM)]),                  # (2,65,8) f32
    )


# ---------------- forward (single fused pallas_call) ----------------

def build_forward(nb):
    grid = (BATCH // nb,)

    def whole(a):
        n = a.ndim
        return pl.BlockSpec(a.shape, lambda i, _n=n: (0,) * _n)

    @jax.jit
    def forward(packed, tgt, encoder_output, short_memory, long_memory):
        B, S, D = tgt.shape
        # Fold batch into rows and pack the two activation streams / two memory
        # banks into single buffers (4 input DMAs -> 2).
        x_io = jnp.stack([tgt.reshape(B * S, D),
                          encoder_output.reshape(B * S, D)], axis=0)          # (2, B*S, D)
        mem = jnp.concatenate([long_memory.reshape(B, LONG_MEM, D),
                               short_memory.reshape(B, SHORT_MEM, D)], axis=1)  # (B, 11, D)
        return pl.pallas_call(
            decoder_layer_kernel,
            grid=grid,
            in_specs=[
                pl.BlockSpec((2, nb * S, D), lambda i: (0, i, 0)),
                pl.BlockSpec((nb, MEM_TOTAL, D), lambda i: (i, 0, 0)),
                whole(packed["attn_w"]), whole(packed["ff_w1"]),
                whole(packed["ff_w2"]), whole(packed["vec"]),
                whole(packed["mem_w"]),
            ],
            out_specs=pl.BlockSpec((nb, S, D), lambda i: (i, 0, 0)),
            out_shape=jax.ShapeDtypeStruct((B, S, D), jnp.float32),
            compiler_params=pltpu.CompilerParams(
                dimension_semantics=("parallel",)),
        )(x_io, mem, packed["attn_w"], packed["ff_w1"], packed["ff_w2"],
          packed["vec"], packed["mem_w"])

    return forward


# ---------------- literal f32 reference (validation of the restructuring) ----

def _reference_forward(params, tgt, enc, short_memory, long_memory):
    def layernorm(x, g, b):
        m = jnp.mean(x, axis=-1, keepdims=True)
        v = jnp.mean(jnp.square(x - m), axis=-1, keepdims=True)
        return (x - m) / jnp.sqrt(v + LN_EPS) * g + b

    def mha(q_in, k_in, v_in, a):
        q = q_in @ a["wqkv"][:, 0:DIM_MODEL] + a["bqkv"][0:DIM_MODEL]
        k = k_in @ a["wqkv"][:, DIM_MODEL:2 * DIM_MODEL] + a["bqkv"][DIM_MODEL:2 * DIM_MODEL]
        v = v_in @ a["wqkv"][:, 2 * DIM_MODEL:QKV] + a["bqkv"][2 * DIM_MODEL:QKV]
        heads = []
        for h in range(NUM_HEADS):
            c = slice(h * DIM_K, (h + 1) * DIM_K)
            s = jnp.einsum("bqd,bkd->bqk", q[..., c], k[..., c]) / (DIM_K ** 0.5)
            heads.append(jnp.einsum("bqk,bkd->bqd", jax.nn.softmax(s, axis=-1), v[..., c]))
        return jnp.concatenate(heads, axis=-1) @ a["wo"] + a["bo"]

    def ffwd(x, f):
        return jnp.maximum(x @ f["w1"] + f["b1"], 0.0) @ f["w2"] + f["b2"]

    def memory_attention(m, enc_out, dec_out, memory):
        combined = jnp.concatenate([enc_out, dec_out], axis=2) @ m["w_cat"] + m["b"]  # (B,S,M)
        alpha = jax.nn.softmax(jnp.mean(combined, axis=1), axis=1)                    # (B,M)
        summary = jnp.einsum("bm,bmd->bd", alpha, memory[:, :, 0, :])                 # (B,D)
        return jnp.broadcast_to(summary[:, None, :], enc_out.shape)

    a1, a2, a3, a4 = params["attn1"], params["attn2"], params["attn3"], params["attn4"]
    f1, f2 = params["ff1"], params["ff2"]
    dec = layernorm(tgt + mha(tgt, tgt, tgt, a1), a1["gamma"], a1["beta"])
    lmem = memory_attention(params["long_mem"], enc, dec, long_memory)
    dec = layernorm(lmem + mha(lmem, lmem, dec, a2), a2["gamma"], a2["beta"])
    dec = layernorm(dec + ffwd(dec, f1), f1["gamma"], f1["beta"])
    smem = memory_attention(params["short_mem"], enc, dec, short_memory)
    dec = layernorm(enc + mha(enc, smem, dec, a3), a3["gamma"], a3["beta"])
    dec = layernorm(enc + mha(enc, enc, dec, a4), a4["gamma"], a4["beta"])
    return layernorm(dec + ffwd(dec, f2), f2["gamma"], f2["beta"])


if __name__ == "__main__":
    root = jax.random.PRNGKey(0)
    kp, k0, k1, k2, k3 = jax.random.split(root, 5)
    params = init_params(kp)
    packed = pack_params(params)

    tgt = jax.random.normal(k0, (BATCH, SEQ, DIM_MODEL), jnp.float32)
    encoder_output = jax.random.normal(k1, (BATCH, SEQ, DIM_MODEL), jnp.float32)
    short_memory = jax.random.normal(k2, (BATCH, SHORT_MEM, 1, DIM_MODEL), jnp.float32)
    long_memory = jax.random.normal(k3, (BATCH, LONG_MEM, 1, DIM_MODEL), jnp.float32)

    forward = build_forward(_batches_per_step())
    out = forward(packed, tgt, encoder_output, short_memory, long_memory)
    jax.block_until_ready(out)
    assert out.shape == (BATCH, SEQ, DIM_MODEL)
    assert bool(jnp.all(jnp.isfinite(out)))

    # Validate the algebraic restructurings (uniform-attention collapse,
    # mean-before-linear in MemoryAttention) against a literal f32 port of the
    # torch forward; tolerance covers the intentional bf16 matmul operands.
    ref = jax.jit(_reference_forward)(params, tgt, encoder_output, short_memory, long_memory)
    assert float(jnp.max(jnp.abs(out - ref))) < 0.1

    print("KERNEL_OK")
</pallas_src>

<mosaic_0001>
module attributes {stable_mosaic.version = 11 : i64} {
  func.func @decoder_layer_kernel(%arg0: i32, %arg1: memref<2x16x32xf32, #tpu.memory_space<vmem>>, %arg2: memref<2x11x32xf32, #tpu.memory_space<vmem>>, %arg3: memref<4x32x128xbf16, #tpu.memory_space<vmem>>, %arg4: memref<2x32x64xbf16, #tpu.memory_space<vmem>>, %arg5: memref<2x64x32xbf16, #tpu.memory_space<vmem>>, %arg6: memref<6x2x128xf32, #tpu.memory_space<vmem>>, %arg7: memref<2x65x8xf32, #tpu.memory_space<vmem>>, %arg8: memref<2x8x32xf32, #tpu.memory_space<vmem>>) attributes {dimension_semantics = [#tpu.dimension_semantics<parallel>], iteration_bounds = array<i64: 1>, scalar_prefetch = 0 : i64, scratch_operands = 0 : i64, tpu.core_type = #tpu.core_type<tc>, window_params = [{transform_indices = @transform_0, window_bounds = array<i64: 2, 16, 32>}, {transform_indices = @transform_1, window_bounds = array<i64: 2, 11, 32>}, {pipeline_mode = #tpu.pipeline_mode<synchronous>, transform_indices = @transform_2, window_bounds = array<i64: 4, 32, 128>}, {pipeline_mode = #tpu.pipeline_mode<synchronous>, transform_indices = @transform_3, window_bounds = array<i64: 2, 32, 64>}, {pipeline_mode = #tpu.pipeline_mode<synchronous>, transform_indices = @transform_4, window_bounds = array<i64: 2, 64, 32>}, {pipeline_mode = #tpu.pipeline_mode<synchronous>, transform_indices = @transform_5, window_bounds = array<i64: 6, 2, 128>}, {pipeline_mode = #tpu.pipeline_mode<synchronous>, transform_indices = @transform_6, window_bounds = array<i64: 2, 65, 8>}, {transform_indices = @transform_7, window_bounds = array<i64: 2, 8, 32>}]} {
    %c0 = arith.constant 0 : index
    %c0_0 = arith.constant 0 : index
    %c0_1 = arith.constant 0 : index
    %0 = vector.load %arg1[%c0, %c0_0, %c0_1] : memref<2x16x32xf32, #tpu.memory_space<vmem>>, vector<1x16x32xf32>
    %1 = vector.shape_cast %0 : vector<1x16x32xf32> to vector<16x32xf32>
    %c1 = arith.constant 1 : index
    %c0_2 = arith.constant 0 : index
    %c0_3 = arith.constant 0 : index
    %2 = vector.load %arg1[%c1, %c0_2, %c0_3] : memref<2x16x32xf32, #tpu.memory_space<vmem>>, vector<1x16x32xf32>
    %3 = vector.shape_cast %2 : vector<1x16x32xf32> to vector<16x32xf32>
    %c0_4 = arith.constant 0 : index
    %c0_5 = arith.constant 0 : index
    %c0_6 = arith.constant 0 : index
    %4 = vector.load %arg3[%c0_4, %c0_5, %c0_6] : memref<4x32x128xbf16, #tpu.memory_space<vmem>>, vector<1x32x128xbf16>
    %5 = vector.shape_cast %4 : vector<1x32x128xbf16> to vector<32x128xbf16>
    %c0_7 = arith.constant 0 : index
    %c0_8 = arith.constant 0 : index
    %c0_9 = arith.constant 0 : index
    %6 = vector.load %arg6[%c0_7, %c0_8, %c0_9] : memref<6x2x128xf32, #tpu.memory_space<vmem>>, vector<1x2x128xf32>
    %7 = vector.shape_cast %6 : vector<1x2x128xf32> to vector<2x128xf32>
    %8 = vector.extract_strided_slice %5 {offsets = [0, 0], sizes = [32, 96], strides = [1, 1]} : vector<32x128xbf16> to vector<32x96xbf16>
    %9 = vector.extract_strided_slice %5 {offsets = [0, 96], sizes = [32, 32], strides = [1, 1]} : vector<32x128xbf16> to vector<32x32xbf16>
    %10 = vector.extract_strided_slice %7 {offsets = [0, 0], sizes = [1, 96], strides = [1, 1]} : vector<2x128xf32> to vector<1x96xf32>
    %11 = vector.extract_strided_slice %7 {offsets = [0, 96], sizes = [1, 32], strides = [1, 1]} : vector<2x128xf32> to vector<1x32xf32>
    %12 = vector.extract_strided_slice %7 {offsets = [1, 0], sizes = [1, 32], strides = [1, 1]} : vector<2x128xf32> to vector<1x32xf32>
    %13 = vector.extract_strided_slice %7 {offsets = [1, 32], sizes = [1, 32], strides = [1, 1]} : vector<2x128xf32> to vector<1x32xf32>
    %c1_10 = arith.constant 1 : index
    %c0_11 = arith.constant 0 : index
    %c0_12 = arith.constant 0 : index
    %14 = vector.load %arg3[%c1_10, %c0_11, %c0_12] : memref<4x32x128xbf16, #tpu.memory_space<vmem>>, vector<1x32x128xbf16>
    %15 = vector.shape_cast %14 : vector<1x32x128xbf16> to vector<32x128xbf16>
    %c1_13 = arith.constant 1 : index
    %c0_14 = arith.constant 0 : index
    %c0_15 = arith.constant 0 : index
    %16 = vector.load %arg6[%c1_13, %c0_14, %c0_15] : memref<6x2x128xf32, #tpu.memory_space<vmem>>, vector<1x2x128xf32>
    %17 = vector.shape_cast %16 : vector<1x2x128xf32> to vector<2x128xf32>
    %18 = vector.extract_strided_slice %15 {offsets = [0, 0], sizes = [32, 96], strides = [1, 1]} : vector<32x128xbf16> to vector<32x96xbf16>
    %19 = vector.extract_strided_slice %15 {offsets = [0, 96], sizes = [32, 32], strides = [1, 1]} : vector<32x128xbf16> to vector<32x32xbf16>
    %20 = vector.extract_strided_slice %17 {offsets = [0, 0], sizes = [1, 96], strides = [1, 1]} : vector<2x128xf32> to vector<1x96xf32>
    %21 = vector.extract_strided_slice %17 {offsets = [0, 96], sizes = [1, 32], strides = [1, 1]} : vector<2x128xf32> to vector<1x32xf32>
    %22 = vector.extract_strided_slice %17 {offsets = [1, 0], sizes = [1, 32], strides = [1, 1]} : vector<2x128xf32> to vector<1x32xf32>
    %23 = vector.extract_strided_slice %17 {offsets = [1, 32], sizes = [1, 32], strides = [1, 1]} : vector<2x128xf32> to vector<1x32xf32>
    %c2 = arith.constant 2 : index
    %c0_16 = arith.constant 0 : index
    %c0_17 = arith.constant 0 : index
    %24 = vector.load %arg3[%c2, %c0_16, %c0_17] : memref<4x32x128xbf16, #tpu.memory_space<vmem>>, vector<1x32x128xbf16>
    %25 = vector.shape_cast %24 : vector<1x32x128xbf16> to vector<32x128xbf16>
    %c2_18 = arith.constant 2 : index
    %c0_19 = arith.constant 0 : index
    %c0_20 = arith.constant 0 : index
    %26 = vector.load %arg6[%c2_18, %c0_19, %c0_20] : memref<6x2x128xf32, #tpu.memory_space<vmem>>, vector<1x2x128xf32>
    %27 = vector.shape_cast %26 : vector<1x2x128xf32> to vector<2x128xf32>
    %28 = vector.extract_strided_slice %25 {offsets = [0, 0], sizes = [32, 96], strides = [1, 1]} : vector<32x128xbf16> to vector<32x96xbf16>
    %29 = vector.extract_strided_slice %25 {offsets = [0, 96], sizes = [32, 32], strides = [1, 1]} : vector<32x128xbf16> to vector<32x32xbf16>
    %30 = vector.extract_strided_slice %27 {offsets = [0, 0], sizes = [1, 96], strides = [1, 1]} : vector<2x128xf32> to vector<1x96xf32>
    %31 = vector.extract_strided_slice %27 {offsets = [0, 96], sizes = [1, 32], strides = [1, 1]} : vector<2x128xf32> to vector<1x32xf32>
    %32 = vector.extract_strided_slice %27 {offsets = [1, 0], sizes = [1, 32], strides = [1, 1]} : vector<2x128xf32> to vector<1x32xf32>
    %33 = vector.extract_strided_slice %27 {offsets = [1, 32], sizes = [1, 32], strides = [1, 1]} : vector<2x128xf32> to vector<1x32xf32>
    %c3 = arith.constant 3 : index
    %c0_21 = arith.constant 0 : index
    %c0_22 = arith.constant 0 : index
    %34 = vector.load %arg3[%c3, %c0_21, %c0_22] : memref<4x32x128xbf16, #tpu.memory_space<vmem>>, vector<1x32x128xbf16>
    %35 = vector.shape_cast %34 : vector<1x32x128xbf16> to vector<32x128xbf16>
    %c3_23 = arith.constant 3 : index
    %c0_24 = arith.constant 0 : index
    %c0_25 = arith.constant 0 : index
    %36 = vector.load %arg6[%c3_23, %c0_24, %c0_25] : memref<6x2x128xf32, #tpu.memory_space<vmem>>, vector<1x2x128xf32>
    %37 = vector.shape_cast %36 : vector<1x2x128xf32> to vector<2x128xf32>
    %38 = vector.extract_strided_slice %35 {offsets = [0, 0], sizes = [32, 96], strides = [1, 1]} : vector<32x128xbf16> to vector<32x96xbf16>
    %39 = vector.extract_strided_slice %35 {offsets = [0, 96], sizes = [32, 32], strides = [1, 1]} : vector<32x128xbf16> to vector<32x32xbf16>
    %40 = vector.extract_strided_slice %37 {offsets = [0, 0], sizes = [1, 96], strides = [1, 1]} : vector<2x128xf32> to vector<1x96xf32>
    %41 = vector.extract_strided_slice %37 {offsets = [0, 96], sizes = [1, 32], strides = [1, 1]} : vector<2x128xf32> to vector<1x32xf32>
    %42 = vector.extract_strided_slice %37 {offsets = [1, 0], sizes = [1, 32], strides = [1, 1]} : vector<2x128xf32> to vector<1x32xf32>
    %43 = vector.extract_strided_slice %37 {offsets = [1, 32], sizes = [1, 32], strides = [1, 1]} : vector<2x128xf32> to vector<1x32xf32>
    %c4 = arith.constant 4 : index
    %c0_26 = arith.constant 0 : index
    %c0_27 = arith.constant 0 : index
    %44 = vector.load %arg6[%c4, %c0_26, %c0_27] : memref<6x2x128xf32, #tpu.memory_space<vmem>>, vector<1x2x128xf32>
    %45 = vector.shape_cast %44 : vector<1x2x128xf32> to vector<2x128xf32>
    %c0_28 = arith.constant 0 : index
    %c0_29 = arith.constant 0 : index
    %c0_30 = arith.constant 0 : index
    %46 = vector.load %arg4[%c0_28, %c0_29, %c0_30] : memref<2x32x64xbf16, #tpu.memory_space<vmem>>, vector<1x32x64xbf16>
    %47 = vector.shape_cast %46 : vector<1x32x64xbf16> to vector<32x64xbf16>
    %c0_31 = arith.constant 0 : index
    %c0_32 = arith.constant 0 : index
    %c0_33 = arith.constant 0 : index
    %48 = vector.load %arg5[%c0_31, %c0_32, %c0_33] : memref<2x64x32xbf16, #tpu.memory_space<vmem>>, vector<1x64x32xbf16>
    %49 = vector.shape_cast %48 : vector<1x64x32xbf16> to vector<64x32xbf16>
    %50 = vector.extract_strided_slice %45 {offsets = [0, 0], sizes = [1, 64], strides = [1, 1]} : vector<2x128xf32> to vector<1x64xf32>
    %51 = vector.extract_strided_slice %45 {offsets = [0, 64], sizes = [1, 32], strides = [1, 1]} : vector<2x128xf32> to vector<1x32xf32>
    %52 = vector.extract_strided_slice %45 {offsets = [1, 0], sizes = [1, 32], strides = [1, 1]} : vector<2x128xf32> to vector<1x32xf32>
    %53 = vector.extract_strided_slice %45 {offsets = [1, 32], sizes = [1, 32], strides = [1, 1]} : vector<2x128xf32> to vector<1x32xf32>
    %c5 = arith.constant 5 : index
    %c0_34 = arith.constant 0 : index
    %c0_35 = arith.constant 0 : index
    %54 = vector.load %arg6[%c5, %c0_34, %c0_35] : memref<6x2x128xf32, #tpu.memory_space<vmem>>, vector<1x2x128xf32>
    %55 = vector.shape_cast %54 : vector<1x2x128xf32> to vector<2x128xf32>
    %c1_36 = arith.constant 1 : index
    %c0_37 = arith.constant 0 : index
    %c0_38 = arith.constant 0 : index
    %56 = vector.load %arg4[%c1_36, %c0_37, %c0_38] : memref<2x32x64xbf16, #tpu.memory_space<vmem>>, vector<1x32x64xbf16>
    %57 = vector.shape_cast %56 : vector<1x32x64xbf16> to vector<32x64xbf16>
    %c1_39 = arith.constant 1 : index
    %c0_40 = arith.constant 0 : index
    %c0_41 = arith.constant 0 : index
    %58 = vector.load %arg5[%c1_39, %c0_40, %c0_41] : memref<2x64x32xbf16, #tpu.memory_space<vmem>>, vector<1x64x32xbf16>
    %59 = vector.shape_cast %58 : vector<1x64x32xbf16> to vector<64x32xbf16>
    %60 = vector.extract_strided_slice %55 {offsets = [0, 0], sizes = [1, 64], strides = [1, 1]} : vector<2x128xf32> to vector<1x64xf32>
    %61 = vector.extract_strided_slice %55 {offsets = [0, 64], sizes = [1, 32], strides = [1, 1]} : vector<2x128xf32> to vector<1x32xf32>
    %62 = vector.extract_strided_slice %55 {offsets = [1, 0], sizes = [1, 32], strides = [1, 1]} : vector<2x128xf32> to vector<1x32xf32>
    %63 = vector.extract_strided_slice %55 {offsets = [1, 32], sizes = [1, 32], strides = [1, 1]} : vector<2x128xf32> to vector<1x32xf32>
    %64 = arith.truncf %1 : vector<16x32xf32> to vector<16x32xbf16>
    %cst = arith.constant dense<0.000000e+00> : vector<16x96xf32>
    %65 = tpu.matmul %64, %8, %cst {dimension_numbers = #tpu.dot_dimension_numbers<[1], [0], [0], [1], [0, 0, 1, 1], [], []>} : vector<16x32xbf16>, vector<32x96xbf16>, vector<16x96xf32> -> vector<16x96xf32>
    %66 = vector.broadcast %10 : vector<1x96xf32> to vector<16x96xf32>
    %67 = arith.addf %65, %66 : vector<16x96xf32>
    %68 = vector.extract_strided_slice %67 {offsets = [0, 0], sizes = [16, 32], strides = [1, 1]} : vector<16x96xf32> to vector<16x32xf32>
    %69 = vector.extract_strided_slice %67 {offsets = [0, 32], sizes = [16, 32], strides = [1, 1]} : vector<16x96xf32> to vector<16x32xf32>
    %70 = vector.extract_strided_slice %67 {offsets = [0, 64], sizes = [16, 32], strides = [1, 1]} : vector<16x96xf32> to vector<16x32xf32>
    %71 = vector.extract_strided_slice %68 {offsets = [0, 0], sizes = [8, 8], strides = [1, 1]} : vector<16x32xf32> to vector<8x8xf32>
    %72 = vector.extract_strided_slice %69 {offsets = [0, 0], sizes = [8, 8], strides = [1, 1]} : vector<16x32xf32> to vector<8x8xf32>
    %73 = tpu.transpose %72, [1, 0] : vector<8x8xf32> -> vector<8x8xf32>
    %cst_42 = arith.constant dense<0.000000e+00> : vector<8x8xf32>
    %74 = tpu.matmul %71, %73, %cst_42 {dimension_numbers = #tpu.dot_dimension_numbers<[1], [0], [0], [1], [0, 0, 1, 1], [], []>} : vector<8x8xf32>, vector<8x8xf32>, vector<8x8xf32> -> vector<8x8xf32>
    %cst_43 = arith.constant 0.353553385 : f32
    %75 = vector.broadcast %cst_43 : f32 to vector<8x8xf32>
    %76 = arith.mulf %74, %75 : vector<8x8xf32>
    %cst_44 = arith.constant dense<0xFF800000> : vector<8xf32>
    %77 = vector.multi_reduction <maximumf>, %76, %cst_44 [1] : vector<8x8xf32> to vector<8xf32>
    %78 = vector.shape_cast %77 : vector<8xf32> to vector<8x1xf32>
    %79 = vector.broadcast %78 : vector<8x1xf32> to vector<8x8xf32>
    %80 = arith.subf %76, %79 : vector<8x8xf32>
    %81 = math.exp %80 : vector<8x8xf32>
    %cst_45 = arith.constant dense<0.000000e+00> : vector<8xf32>
    %82 = vector.multi_reduction <add>, %81, %cst_45 [1] : vector<8x8xf32> to vector<8xf32>
    %83 = vector.shape_cast %82 : vector<8xf32> to vector<8x1xf32>
    %84 = tpu.reciprocal %83 {approx = true} : vector<8x1xf32> -> vector<8x1xf32>
    %85 = vector.broadcast %84 : vector<8x1xf32> to vector<8x8xf32>
    %86 = arith.mulf %81, %85 : vector<8x8xf32>
    %87 = vector.extract_strided_slice %70 {offsets = [0, 0], sizes = [8, 8], strides = [1, 1]} : vector<16x32xf32> to vector<8x8xf32>
    %cst_46 = arith.constant dense<0.000000e+00> : vector<8x8xf32>
    %88 = tpu.matmul %86, %87, %cst_46 {dimension_numbers = #tpu.dot_dimension_numbers<[1], [0], [0], [1], [0, 0, 1, 1], [], []>} : vector<8x8xf32>, vector<8x8xf32>, vector<8x8xf32> -> vector<8x8xf32>
    %89 = vector.extract_strided_slice %68 {offsets = [0, 8], sizes = [8, 8], strides = [1, 1]} : vector<16x32xf32> to vector<8x8xf32>
    %90 = vector.extract_strided_slice %69 {offsets = [0, 8], sizes = [8, 8], strides = [1, 1]} : vector<16x32xf32> to vector<8x8xf32>
    %91 = tpu.transpose %90, [1, 0] : vector<8x8xf32> -> vector<8x8xf32>
    %cst_47 = arith.constant dense<0.000000e+00> : vector<8x8xf32>
    %92 = tpu.matmul %89, %91, %cst_47 {dimension_numbers = #tpu.dot_dimension_numbers<[1], [0], [0], [1], [0, 0, 1, 1], [], []>} : vector<8x8xf32>, vector<8x8xf32>, vector<8x8xf32> -> vector<8x8xf32>
    %cst_48 = arith.constant 0.353553385 : f32
    %93 = vector.broadcast %cst_48 : f32 to vector<8x8xf32>
    %94 = arith.mulf %92, %93 : vector<8x8xf32>
    %cst_49 = arith.constant dense<0xFF800000> : vector<8xf32>
    %95 = vector.multi_reduction <maximumf>, %94, %cst_49 [1] : vector<8x8xf32> to vector<8xf32>
    %96 = vector.shape_cast %95 : vector<8xf32> to vector<8x1xf32>
    %97 = vector.broadcast %96 : vector<8x1xf32> to vector<8x8xf32>
    %98 = arith.subf %94, %97 : vector<8x8xf32>
    %99 = math.exp %98 : vector<8x8xf32>
    %cst_50 = arith.constant dense<0.000000e+00> : vector<8xf32>
    %100 = vector.multi_reduction <add>, %99, %cst_50 [1] : vector<8x8xf32> to vector<8xf32>
    %101 = vector.shape_cast %100 : vector<8xf32> to vector<8x1xf32>
    %102 = tpu.reciprocal %101 {approx = true} : vector<8x1xf32> -> vector<8x1xf32>
    %103 = vector.broadcast %102 : vector<8x1xf32> to vector<8x8xf32>
    %104 = arith.mulf %99, %103 : vector<8x8xf32>
    %105 = vector.extract_strided_slice %70 {offsets = [0, 8], sizes = [8, 8], strides = [1, 1]} : vector<16x32xf32> to vector<8x8xf32>
    %cst_51 = arith.constant dense<0.000000e+00> : vector<8x8xf32>
    %106 = tpu.matmul %104, %105, %cst_51 {dimension_numbers = #tpu.dot_dimension_numbers<[1], [0], [0], [1], [0, 0, 1, 1], [], []>} : vector<8x8xf32>, vector<8x8xf32>, vector<8x8xf32> -> vector<8x8xf32>
    %107 = vector.extract_strided_slice %68 {offsets = [0, 16], sizes = [8, 8], strides = [1, 1]} : vector<16x32xf32> to vector<8x8xf32>
    %108 = vector.extract_strided_slice %69 {offsets = [0, 16], sizes = [8, 8], strides = [1, 1]} : vector<16x32xf32> to vector<8x8xf32>
    %109 = tpu.transpose %108, [1, 0] : vector<8x8xf32> -> vector<8x8xf32>
    %cst_52 = arith.constant dense<0.000000e+00> : vector<8x8xf32>
    %110 = tpu.matmul %107, %109, %cst_52 {dimension_numbers = #tpu.dot_dimension_numbers<[1], [0], [0], [1], [0, 0, 1, 1], [], []>} : vector<8x8xf32>, vector<8x8xf32>, vector<8x8xf32> -> vector<8x8xf32>
    %cst_53 = arith.constant 0.353553385 : f32
    %111 = vector.broadcast %cst_53 : f32 to vector<8x8xf32>
    %112 = arith.mulf %110, %111 : vector<8x8xf32>
    %cst_54 = arith.constant dense<0xFF800000> : vector<8xf32>
    %113 = vector.multi_reduction <maximumf>, %112, %cst_54 [1] : vector<8x8xf32> to vector<8xf32>
    %114 = vector.shape_cast %113 : vector<8xf32> to vector<8x1xf32>
    %115 = vector.broadcast %114 : vector<8x1xf32> to vector<8x8xf32>
    %116 = arith.subf %112, %115 : vector<8x8xf32>
    %117 = math.exp %116 : vector<8x8xf32>
    %cst_55 = arith.constant dense<0.000000e+00> : vector<8xf32>
    %118 = vector.multi_reduction <add>, %117, %cst_55 [1] : vector<8x8xf32> to vector<8xf32>
    %119 = vector.shape_cast %118 : vector<8xf32> to vector<8x1xf32>
    %120 = tpu.reciprocal %119 {approx = true} : vector<8x1xf32> -> vector<8x1xf32>
    %121 = vector.broadcast %120 : vector<8x1xf32> to vector<8x8xf32>
    %122 = arith.mulf %117, %121 : vector<8x8xf32>
    %123 = vector.extract_strided_slice %70 {offsets = [0, 16], sizes = [8, 8], strides = [1, 1]} : vector<16x32xf32> to vector<8x8xf32>
    %cst_56 = arith.constant dense<0.000000e+00> : vector<8x8xf32>
    %124 = tpu.matmul %122, %123, %cst_56 {dimension_numbers = #tpu.dot_dimension_numbers<[1], [0], [0], [1], [0, 0, 1, 1], [], []>} : vector<8x8xf32>, vector<8x8xf32>, vector<8x8xf32> -> vector<8x8xf32>
    %125 = vector.extract_strided_slice %68 {offsets = [0, 24], sizes = [8, 8], strides = [1, 1]} : vector<16x32xf32> to vector<8x8xf32>
    %126 = vector.extract_strided_slice %69 {offsets = [0, 24], sizes = [8, 8], strides = [1, 1]} : vector<16x32xf32> to vector<8x8xf32>
    %127 = tpu.transpose %126, [1, 0] : vector<8x8xf32> -> vector<8x8xf32>
    %cst_57 = arith.constant dense<0.000000e+00> : vector<8x8xf32>
    %128 = tpu.matmul %125, %127, %cst_57 {dimension_numbers = #tpu.dot_dimension_numbers<[1], [0], [0], [1], [0, 0, 1, 1], [], []>} : vector<8x8xf32>, vector<8x8xf32>, vector<8x8xf32> -> vector<8x8xf32>
    %cst_58 = arith.constant 0.353553385 : f32
    %129 = vector.broadcast %cst_58 : f32 to vector<8x8xf32>
    %130 = arith.mulf %128, %129 : vector<8x8xf32>
    %cst_59 = arith.constant dense<0xFF800000> : vector<8xf32>
    %131 = vector.multi_reduction <maximumf>, %130, %cst_59 [1] : vector<8x8xf32> to vector<8xf32>
    %132 = vector.shape_cast %131 : vector<8xf32> to vector<8x1xf32>
    %133 = vector.broadcast %132 : vector<8x1xf32> to vector<8x8xf32>
    %134 = arith.subf %130, %133 : vector<8x8xf32>
    %135 = math.exp %134 : vector<8x8xf32>
    %cst_60 = arith.constant dense<0.000000e+00> : vector<8xf32>
    %136 = vector.multi_reduction <add>, %135, %cst_60 [1] : vector<8x8xf32> to vector<8xf32>
    %137 = vector.shape_cast %136 : vector<8xf32> to vector<8x1xf32>
    %138 = tpu.reciprocal %137 {approx = true} : vector<8x1xf32> -> vector<8x1xf32>
    %139 = vector.broadcast %138 : vector<8x1xf32> to vector<8x8xf32>
    %140 = arith.mulf %135, %139 : vector<8x8xf32>
    %141 = vector.extract_strided_slice %70 {offsets = [0, 24], sizes = [8, 8], strides = [1, 1]} : vector<16x32xf32> to vector<8x8xf32>
    %cst_61 = arith.constant dense<0.000000e+00> : vector<8x8xf32>
    %142 = tpu.matmul %140, %141, %cst_61 {dimension_numbers = #tpu.dot_dimension_numbers<[1], [0], [0], [1], [0, 0, 1, 1], [], []>} : vector<8x8xf32>, vector<8x8xf32>, vector<8x8xf32> -> vector<8x8xf32>
    %143 = tpu.concatenate %88, %106, %124, %142 in 1 : vector<8x8xf32>, vector<8x8xf32>, vector<8x8xf32>, vector<8x8xf32> -> vector<8x32xf32>
    %144 = vector.extract_strided_slice %68 {offsets = [8, 0], sizes = [8, 8], strides = [1, 1]} : vector<16x32xf32> to vector<8x8xf32>
    %145 = vector.extract_strided_slice %69 {offsets = [8, 0], sizes = [8, 8], strides = [1, 1]} : vector<16x32xf32> to vector<8x8xf32>
    %146 = tpu.transpose %145, [1, 0] : vector<8x8xf32> -> vector<8x8xf32>
    %cst_62 = arith.constant dense<0.000000e+00> : vector<8x8xf32>
    %147 = tpu.matmul %144, %146, %cst_62 {dimension_numbers = #tpu.dot_dimension_numbers<[1], [0], [0], [1], [0, 0, 1, 1], [], []>} : vector<8x8xf32>, vector<8x8xf32>, vector<8x8xf32> -> vector<8x8xf32>
    %cst_63 = arith.constant 0.353553385 : f32
    %148 = vector.broadcast %cst_63 : f32 to vector<8x8xf32>
    %149 = arith.mulf %147, %148 : vector<8x8xf32>
    %cst_64 = arith.constant dense<0xFF800000> : vector<8xf32>
    %150 = vector.multi_reduction <maximumf>, %149, %cst_64 [1] : vector<8x8xf32> to vector<8xf32>
    %151 = vector.shape_cast %150 : vector<8xf32> to vector<8x1xf32>
    %152 = vector.broadcast %151 : vector<8x1xf32> to vector<8x8xf32>
    %153 = arith.subf %149, %152 : vector<8x8xf32>
    %154 = math.exp %153 : vector<8x8xf32>
    %cst_65 = arith.constant dense<0.000000e+00> : vector<8xf32>
    %155 = vector.multi_reduction <add>, %154, %cst_65 [1] : vector<8x8xf32> to vector<8xf32>
    %156 = vector.shape_cast %155 : vector<8xf32> to vector<8x1xf32>
    %157 = tpu.reciprocal %156 {approx = true} : vector<8x1xf32> -> vector<8x1xf32>
    %158 = vector.broadcast %157 : vector<8x1xf32> to vector<8x8xf32>
    %159 = arith.mulf %154, %158 : vector<8x8xf32>
    %160 = vector.extract_strided_slice %70 {offsets = [8, 0], sizes = [8, 8], strides = [1, 1]} : vector<16x32xf32> to vector<8x8xf32>
    %cst_66 = arith.constant dense<0.000000e+00> : vector<8x8xf32>
    %161 = tpu.matmul %159, %160, %cst_66 {dimension_numbers = #tpu.dot_dimension_numbers<[1], [0], [0], [1], [0, 0, 1, 1], [], []>} : vector<8x8xf32>, vector<8x8xf32>, vector<8x8xf32> -> vector<8x8xf32>
    %162 = vector.extract_strided_slice %68 {offsets = [8, 8], sizes = [8, 8], strides = [1, 1]} : vector<16x32xf32> to vector<8x8xf32>
    %163 = vector.extract_strided_slice %69 {offsets = [8, 8], sizes = [8, 8], strides = [1, 1]} : vector<16x32xf32> to vector<8x8xf32>
    %164 = tpu.transpose %163, [1, 0] : vector<8x8xf32> -> vector<8x8xf32>
    %cst_67 = arith.constant dense<0.000000e+00> : vector<8x8xf32>
    %165 = tpu.matmul %162, %164, %cst_67 {dimension_numbers = #tpu.dot_dimension_numbers<[1], [0], [0], [1], [0, 0, 1, 1], [], []>} : vector<8x8xf32>, vector<8x8xf32>, vector<8x8xf32> -> vector<8x8xf32>
    %cst_68 = arith.constant 0.353553385 : f32
    %166 = vector.broadcast %cst_68 : f32 to vector<8x8xf32>
    %167 = arith.mulf %165, %166 : vector<8x8xf32>
    %cst_69 = arith.constant dense<0xFF800000> : vector<8xf32>
    %168 = vector.multi_reduction <maximumf>, %167, %cst_69 [1] : vector<8x8xf32> to vector<8xf32>
    %169 = vector.shape_cast %168 : vector<8xf32> to vector<8x1xf32>
    %170 = vector.broadcast %169 : vector<8x1xf32> to vector<8x8xf32>
    %171 = arith.subf %167, %170 : vector<8x8xf32>
    %172 = math.exp %171 : vector<8x8xf32>
    %cst_70 = arith.constant dense<0.000000e+00> : vector<8xf32>
    %173 = vector.multi_reduction <add>, %172, %cst_70 [1] : vector<8x8xf32> to vector<8xf32>
    %174 = vector.shape_cast %173 : vector<8xf32> to vector<8x1xf32>
    %175 = tpu.reciprocal %174 {approx = true} : vector<8x1xf32> -> vector<8x1xf32>
    %176 = vector.broadcast %175 : vector<8x1xf32> to vector<8x8xf32>
    %177 = arith.mulf %172, %176 : vector<8x8xf32>
    %178 = vector.extract_strided_slice %70 {offsets = [8, 8], sizes = [8, 8], strides = [1, 1]} : vector<16x32xf32> to vector<8x8xf32>
    %cst_71 = arith.constant dense<0.000000e+00> : vector<8x8xf32>
    %179 = tpu.matmul %177, %178, %cst_71 {dimension_numbers = #tpu.dot_dimension_numbers<[1], [0], [0], [1], [0, 0, 1, 1], [], []>} : vector<8x8xf32>, vector<8x8xf32>, vector<8x8xf32> -> vector<8x8xf32>
    %180 = vector.extract_strided_slice %68 {offsets = [8, 16], sizes = [8, 8], strides = [1, 1]} : vector<16x32xf32> to vector<8x8xf32>
    %181 = vector.extract_strided_slice %69 {offsets = [8, 16], sizes = [8, 8], strides = [1, 1]} : vector<16x32xf32> to vector<8x8xf32>
    %182 = tpu.transpose %181, [1, 0] : vector<8x8xf32> -> vector<8x8xf32>
    %cst_72 = arith.constant dense<0.000000e+00> : vector<8x8xf32>
    %183 = tpu.matmul %180, %182, %cst_72 {dimension_numbers = #tpu.dot_dimension_numbers<[1], [0], [0], [1], [0, 0, 1, 1], [], []>} : vector<8x8xf32>, vector<8x8xf32>, vector<8x8xf32> -> vector<8x8xf32>
    %cst_73 = arith.constant 0.353553385 : f32
    %184 = vector.broadcast %cst_73 : f32 to vector<8x8xf32>
    %185 = arith.mulf %183, %184 : vector<8x8xf32>
    %cst_74 = arith.constant dense<0xFF800000> : vector<8xf32>
    %186 = vector.multi_reduction <maximumf>, %185, %cst_74 [1] : vector<8x8xf32> to vector<8xf32>
    %187 = vector.shape_cast %186 : vector<8xf32> to vector<8x1xf32>
    %188 = vector.broadcast %187 : vector<8x1xf32> to vector<8x8xf32>
    %189 = arith.subf %185, %188 : vector<8x8xf32>
    %190 = math.exp %189 : vector<8x8xf32>
    %cst_75 = arith.constant dense<0.000000e+00> : vector<8xf32>
    %191 = vector.multi_reduction <add>, %190, %cst_75 [1] : vector<8x8xf32> to vector<8xf32>
    %192 = vector.shape_cast %191 : vector<8xf32> to vector<8x1xf32>
    %193 = tpu.reciprocal %192 {approx = true} : vector<8x1xf32> -> vector<8x1xf32>
    %194 = vector.broadcast %193 : vector<8x1xf32> to vector<8x8xf32>
    %195 = arith.mulf %190, %194 : vector<8x8xf32>
    %196 = vector.extract_strided_slice %70 {offsets = [8, 16], sizes = [8, 8], strides = [1, 1]} : vector<16x32xf32> to vector<8x8xf32>
    %cst_76 = arith.constant dense<0.000000e+00> : vector<8x8xf32>
    %197 = tpu.matmul %195, %196, %cst_76 {dimension_numbers = #tpu.dot_dimension_numbers<[1], [0], [0], [1], [0, 0, 1, 1], [], []>} : vector<8x8xf32>, vector<8x8xf32>, vector<8x8xf32> -> vector<8x8xf32>
    %198 = vector.extract_strided_slice %68 {offsets = [8, 24], sizes = [8, 8], strides = [1, 1]} : vector<16x32xf32> to vector<8x8xf32>
    %199 = vector.extract_strided_slice %69 {offsets = [8, 24], sizes = [8, 8], strides = [1, 1]} : vector<16x32xf32> to vector<8x8xf32>
    %200 = tpu.transpose %199, [1, 0] : vector<8x8xf32> -> vector<8x8xf32>
    %cst_77 = arith.constant dense<0.000000e+00> : vector<8x8xf32>
    %201 = tpu.matmul %198, %200, %cst_77 {dimension_numbers = #tpu.dot_dimension_numbers<[1], [0], [0], [1], [0, 0, 1, 1], [], []>} : vector<8x8xf32>, vector<8x8xf32>, vector<8x8xf32> -> vector<8x8xf32>
    %cst_78 = arith.constant 0.353553385 : f32
    %202 = vector.broadcast %cst_78 : f32 to vector<8x8xf32>
    %203 = arith.mulf %201, %202 : vector<8x8xf32>
    %cst_79 = arith.constant dense<0xFF800000> : vector<8xf32>
    %204 = vector.multi_reduction <maximumf>, %203, %cst_79 [1] : vector<8x8xf32> to vector<8xf32>
    %205 = vector.shape_cast %204 : vector<8xf32> to vector<8x1xf32>
    %206 = vector.broadcast %205 : vector<8x1xf32> to vector<8x8xf32>
    %207 = arith.subf %203, %206 : vector<8x8xf32>
    %208 = math.exp %207 : vector<8x8xf32>
    %cst_80 = arith.constant dense<0.000000e+00> : vector<8xf32>
    %209 = vector.multi_reduction <add>, %208, %cst_80 [1] : vector<8x8xf32> to vector<8xf32>
    %210 = vector.shape_cast %209 : vector<8xf32> to vector<8x1xf32>
    %211 = tpu.reciprocal %210 {approx = true} : vector<8x1xf32> -> vector<8x1xf32>
    %212 = vector.broadcast %211 : vector<8x1xf32> to vector<8x8xf32>
    %213 = arith.mulf %208, %212 : vector<8x8xf32>
    %214 = vector.extract_strided_slice %70 {offsets = [8, 24], sizes = [8, 8], strides = [1, 1]} : vector<16x32xf32> to vector<8x8xf32>
    %cst_81 = arith.constant dense<0.000000e+00> : vector<8x8xf32>
    %215 = tpu.matmul %213, %214, %cst_81 {dimension_numbers = #tpu.dot_dimension_numbers<[1], [0], [0], [1], [0, 0, 1, 1], [], []>} : vector<8x8xf32>, vector<8x8xf32>, vector<8x8xf32> -> vector<8x8xf32>
    %216 = tpu.concatenate %161, %179, %197, %215 in 1 : vector<8x8xf32>, vector<8x8xf32>, vector<8x8xf32>, vector<8x8xf32> -> vector<8x32xf32>
    %217 = tpu.concatenate %143, %216 in 0 : vector<8x32xf32>, vector<8x32xf32> -> vector<16x32xf32>
    %218 = arith.truncf %217 : vector<16x32xf32> to vector<16x32xbf16>
    %cst_82 = arith.constant dense<0.000000e+00> : vector<16x32xf32>
    %219 = tpu.matmul %218, %9, %cst_82 {dimension_numbers = #tpu.dot_dimension_numbers<[1], [0], [0], [1], [0, 0, 1, 1], [], []>} : vector<16x32xbf16>, vector<32x32xbf16>, vector<16x32xf32> -> vector<16x32xf32>
    %220 = vector.broadcast %11 : vector<1x32xf32> to vector<16x32xf32>
    %221 = arith.addf %219, %220 : vector<16x32xf32>
    %222 = arith.addf %1, %221 : vector<16x32xf32>
    %cst_83 = arith.constant dense<0.000000e+00> : vector<16xf32>
    %223 = vector.multi_reduction <add>, %222, %cst_83 [1] : vector<16x32xf32> to vector<16xf32>
    %224 = vector.shape_cast %223 : vector<16xf32> to vector<16x1xf32>
    %cst_84 = arith.constant 3.200000e+01 : f32
    %225 = vector.broadcast %cst_84 : f32 to vector<16x1xf32>
    %226 = arith.divf %224, %225 : vector<16x1xf32>
    %227 = vector.broadcast %226 : vector<16x1xf32> to vector<16x32xf32>
    %228 = arith.subf %222, %227 : vector<16x32xf32>
    %229 = arith.mulf %228, %228 : vector<16x32xf32>
    %cst_85 = arith.constant dense<0.000000e+00> : vector<16xf32>
    %230 = vector.multi_reduction <add>, %229, %cst_85 [1] : vector<16x32xf32> to vector<16xf32>
    %231 = vector.shape_cast %230 : vector<16xf32> to vector<16x1xf32>
    %cst_86 = arith.constant 3.200000e+01 : f32
    %232 = vector.broadcast %cst_86 : f32 to vector<16x1xf32>
    %233 = arith.divf %231, %232 : vector<16x1xf32>
    %234 = vector.broadcast %226 : vector<16x1xf32> to vector<16x32xf32>
    %235 = arith.subf %222, %234 : vector<16x32xf32>
    %cst_87 = arith.constant 9.99999974E-6 : f32
    %236 = vector.broadcast %cst_87 : f32 to vector<16x1xf32>
    %237 = arith.addf %233, %236 : vector<16x1xf32>
    %238 = math.rsqrt %237 : vector<16x1xf32>
    %239 = vector.broadcast %238 : vector<16x1xf32> to vector<16x32xf32>
    %240 = arith.mulf %235, %239 : vector<16x32xf32>
    %241 = vector.broadcast %12 : vector<1x32xf32> to vector<16x32xf32>
    %242 = arith.mulf %240, %241 : vector<16x32xf32>
    %243 = vector.broadcast %13 : vector<1x32xf32> to vector<16x32xf32>
    %244 = arith.addf %242, %243 : vector<16x32xf32>
    %245 = vector.extract_strided_slice %3 {offsets = [0, 0], sizes = [8, 32], strides = [1, 1]} : vector<16x32xf32> to vector<8x32xf32>
    %cst_88 = arith.constant dense<0.000000e+00> : vector<32xf32>
    %246 = vector.multi_reduction <add>, %245, %cst_88 [0] : vector<8x32xf32> to vector<32xf32>
    %247 = vector.shape_cast %246 : vector<32xf32> to vector<1x32xf32>
    %cst_89 = arith.constant 8.000000e+00 : f32
    %248 = vector.broadcast %cst_89 : f32 to vector<1x32xf32>
    %249 = arith.divf %247, %248 : vector<1x32xf32>
    %250 = vector.extract_strided_slice %3 {offsets = [8, 0], sizes = [8, 32], strides = [1, 1]} : vector<16x32xf32> to vector<8x32xf32>
    %cst_90 = arith.constant dense<0.000000e+00> : vector<32xf32>
    %251 = vector.multi_reduction <add>, %250, %cst_90 [0] : vector<8x32xf32> to vector<32xf32>
    %252 = vector.shape_cast %251 : vector<32xf32> to vector<1x32xf32>
    %cst_91 = arith.constant 8.000000e+00 : f32
    %253 = vector.broadcast %cst_91 : f32 to vector<1x32xf32>
    %254 = arith.divf %252, %253 : vector<1x32xf32>
    %255 = tpu.concatenate %249, %254 in 0 : vector<1x32xf32>, vector<1x32xf32> -> vector<2x32xf32>
    %256 = vector.extract_strided_slice %244 {offsets = [0, 0], sizes = [8, 32], strides = [1, 1]} : vector<16x32xf32> to vector<8x32xf32>
    %cst_92 = arith.constant dense<0.000000e+00> : vector<32xf32>
    %257 = vector.multi_reduction <add>, %256, %cst_92 [0] : vector<8x32xf32> to vector<32xf32>
    %258 = vector.shape_cast %257 : vector<32xf32> to vector<1x32xf32>
    %cst_93 = arith.constant 8.000000e+00 : f32
    %259 = vector.broadcast %cst_93 : f32 to vector<1x32xf32>
    %260 = arith.divf %258, %259 : vector<1x32xf32>
    %261 = vector.extract_strided_slice %244 {offsets = [8, 0], sizes = [8, 32], strides = [1, 1]} : vector<16x32xf32> to vector<8x32xf32>
    %cst_94 = arith.constant dense<0.000000e+00> : vector<32xf32>
    %262 = vector.multi_reduction <add>, %261, %cst_94 [0] : vector<8x32xf32> to vector<32xf32>
    %263 = vector.shape_cast %262 : vector<32xf32> to vector<1x32xf32>
    %cst_95 = arith.constant 8.000000e+00 : f32
    %264 = vector.broadcast %cst_95 : f32 to vector<1x32xf32>
    %265 = arith.divf %263, %264 : vector<1x32xf32>
    %266 = tpu.concatenate %260, %265 in 0 : vector<1x32xf32>, vector<1x32xf32> -> vector<2x32xf32>
    %c0_96 = arith.constant 0 : index
    %c0_97 = arith.constant 0 : index
    %c0_98 = arith.constant 0 : index
    %267 = vector.load %arg7[%c0_96, %c0_97, %c0_98] : memref<2x65x8xf32, #tpu.memory_space<vmem>>, vector<1x65x8xf32>
    %268 = vector.shape_cast %267 : vector<1x65x8xf32> to vector<65x8xf32>
    %269 = vector.extract_strided_slice %268 {offsets = [0, 0], sizes = [32, 6], strides = [1, 1]} : vector<65x8xf32> to vector<32x6xf32>
    %270 = vector.extract_strided_slice %268 {offsets = [32, 0], sizes = [32, 6], strides = [1, 1]} : vector<65x8xf32> to vector<32x6xf32>
    %271 = vector.extract_strided_slice %268 {offsets = [64, 0], sizes = [1, 6], strides = [1, 1]} : vector<65x8xf32> to vector<1x6xf32>
    %cst_99 = arith.constant dense<0.000000e+00> : vector<2x6xf32>
    %272 = tpu.matmul %255, %269, %cst_99 {dimension_numbers = #tpu.dot_dimension_numbers<[1], [0], [0], [1], [0, 0, 1, 1], [], []>} : vector<2x32xf32>, vector<32x6xf32>, vector<2x6xf32> -> vector<2x6xf32>
    %cst_100 = arith.constant dense<0.000000e+00> : vector<2x6xf32>
    %273 = tpu.matmul %266, %270, %cst_100 {dimension_numbers = #tpu.dot_dimension_numbers<[1], [0], [0], [1], [0, 0, 1, 1], [], []>} : vector<2x32xf32>, vector<32x6xf32>, vector<2x6xf32> -> vector<2x6xf32>
    %274 = arith.addf %272, %273 : vector<2x6xf32>
    %275 = vector.broadcast %271 : vector<1x6xf32> to vector<2x6xf32>
    %276 = arith.addf %274, %275 : vector<2x6xf32>
    %cst_101 = arith.constant dense<0xFF800000> : vector<2xf32>
    %277 = vector.multi_reduction <maximumf>, %276, %cst_101 [1] : vector<2x6xf32> to vector<2xf32>
    %278 = vector.shape_cast %277 : vector<2xf32> to vector<2x1xf32>
    %279 = vector.broadcast %278 : vector<2x1xf32> to vector<2x6xf32>
    %280 = arith.subf %276, %279 : vector<2x6xf32>
    %281 = math.exp %280 : vector<2x6xf32>
    %cst_102 = arith.constant dense<0.000000e+00> : vector<2xf32>
    %282 = vector.multi_reduction <add>, %281, %cst_102 [1] : vector<2x6xf32> to vector<2xf32>
    %283 = vector.shape_cast %282 : vector<2xf32> to vector<2x1xf32>
    %284 = tpu.reciprocal %283 {approx = true} : vector<2x1xf32> -> vector<2x1xf32>
    %285 = vector.broadcast %284 : vector<2x1xf32> to vector<2x6xf32>
    %286 = arith.mulf %281, %285 : vector<2x6xf32>
    %287 = vector.extract_strided_slice %286 {offsets = [0, 0], sizes = [1, 6], strides = [1, 1]} : vector<2x6xf32> to vector<1x6xf32>
    %c0_103 = arith.constant 0 : index
    %c0_104 = arith.constant 0 : index
    %c0_105 = arith.constant 0 : index
    %288 = vector.load %arg2[%c0_103, %c0_104, %c0_105] : memref<2x11x32xf32, #tpu.memory_space<vmem>>, vector<1x6x32xf32>
    %289 = vector.shape_cast %288 : vector<1x6x32xf32> to vector<6x32xf32>
    %cst_106 = arith.constant dense<0.000000e+00> : vector<1x32xf32>
    %290 = tpu.matmul %287, %289, %cst_106 {dimension_numbers = #tpu.dot_dimension_numbers<[1], [0], [0], [1], [0, 0, 1, 1], [], []>} : vector<1x6xf32>, vector<6x32xf32>, vector<1x32xf32> -> vector<1x32xf32>
    %291 = vector.extract_strided_slice %286 {offsets = [1, 0], sizes = [1, 6], strides = [1, 1]} : vector<2x6xf32> to vector<1x6xf32>
    %c1_107 = arith.constant 1 : index
    %c0_108 = arith.constant 0 : index
    %c0_109 = arith.constant 0 : index
    %292 = vector.load %arg2[%c1_107, %c0_108, %c0_109] : memref<2x11x32xf32, #tpu.memory_space<vmem>>, vector<1x6x32xf32>
    %293 = vector.shape_cast %292 : vector<1x6x32xf32> to vector<6x32xf32>
    %cst_110 = arith.constant dense<0.000000e+00> : vector<1x32xf32>
    %294 = tpu.matmul %291, %293, %cst_110 {dimension_numbers = #tpu.dot_dimension_numbers<[1], [0], [0], [1], [0, 0, 1, 1], [], []>} : vector<1x6xf32>, vector<6x32xf32>, vector<1x32xf32> -> vector<1x32xf32>
    %295 = tpu.concatenate %290, %294 in 0 : vector<1x32xf32>, vector<1x32xf32> -> vector<2x32xf32>
    %296 = arith.truncf %266 : vector<2x32xf32> to vector<2x32xbf16>
    %297 = vector.extract_strided_slice %18 {offsets = [0, 64], sizes = [32, 32], strides = [1, 1]} : vector<32x96xbf16> to vector<32x32xbf16>
    %cst_111 = arith.constant dense<0.000000e+00> : vector<2x32xf32>
    %298 = tpu.matmul %296, %297, %cst_111 {dimension_numbers = #tpu.dot_dimension_numbers<[1], [0], [0], [1], [0, 0, 1, 1], [], []>} : vector<2x32xbf16>, vector<32x32xbf16>, vector<2x32xf32> -> vector<2x32xf32>
    %299 = vector.extract_strided_slice %20 {offsets = [0, 64], sizes = [1, 32], strides = [1, 1]} : vector<1x96xf32> to vector<1x32xf32>
    %300 = vector.broadcast %299 : vector<1x32xf32> to vector<2x32xf32>
    %301 = arith.addf %298, %300 : vector<2x32xf32>
    %302 = arith.truncf %301 : vector<2x32xf32> to vector<2x32xbf16>
    %cst_112 = arith.constant dense<0.000000e+00> : vector<2x32xf32>
    %303 = tpu.matmul %302, %19, %cst_112 {dimension_numbers = #tpu.dot_dimension_numbers<[1], [0], [0], [1], [0, 0, 1, 1], [], []>} : vector<2x32xbf16>, vector<32x32xbf16>, vector<2x32xf32> -> vector<2x32xf32>
    %304 = vector.broadcast %21 : vector<1x32xf32> to vector<2x32xf32>
    %305 = arith.addf %303, %304 : vector<2x32xf32>
    %306 = arith.addf %295, %305 : vector<2x32xf32>
    %cst_113 = arith.constant dense<0.000000e+00> : vector<2xf32>
    %307 = vector.multi_reduction <add>, %306, %cst_113 [1] : vector<2x32xf32> to vector<2xf32>
    %308 = vector.shape_cast %307 : vector<2xf32> to vector<2x1xf32>
    %cst_114 = arith.constant 3.200000e+01 : f32
    %309 = vector.broadcast %cst_114 : f32 to vector<2x1xf32>
    %310 = arith.divf %308, %309 : vector<2x1xf32>
    %311 = vector.broadcast %310 : vector<2x1xf32> to vector<2x32xf32>
    %312 = arith.subf %306, %311 : vector<2x32xf32>
    %313 = arith.mulf %312, %312 : vector<2x32xf32>
    %cst_115 = arith.constant dense<0.000000e+00> : vector<2xf32>
    %314 = vector.multi_reduction <add>, %313, %cst_115 [1] : vector<2x32xf32> to vector<2xf32>
    %315 = vector.shape_cast %314 : vector<2xf32> to vector<2x1xf32>
    %cst_116 = arith.constant 3.200000e+01 : f32
    %316 = vector.broadcast %cst_116 : f32 to vector<2x1xf32>
    %317 = arith.divf %315, %316 : vector<2x1xf32>
    %318 = vector.broadcast %310 : vector<2x1xf32> to vector<2x32xf32>
    %319 = arith.subf %306, %318 : vector<2x32xf32>
    %cst_117 = arith.constant 9.99999974E-6 : f32
    %320 = vector.broadcast %cst_117 : f32 to vector<2x1xf32>
    %321 = arith.addf %317, %320 : vector<2x1xf32>
    %322 = math.rsqrt %321 : vector<2x1xf32>
    %323 = vector.broadcast %322 : vector<2x1xf32> to vector<2x32xf32>
    %324 = arith.mulf %319, %323 : vector<2x32xf32>
    %325 = vector.broadcast %22 : vector<1x32xf32> to vector<2x32xf32>
    %326 = arith.mulf %324, %325 : vector<2x32xf32>
    %327 = vector.broadcast %23 : vector<1x32xf32> to vector<2x32xf32>
    %328 = arith.addf %326, %327 : vector<2x32xf32>
    %329 = arith.truncf %328 : vector<2x32xf32> to vector<2x32xbf16>
    %cst_118 = arith.constant dense<0.000000e+00> : vector<2x64xf32>
    %330 = tpu.matmul %329, %47, %cst_118 {dimension_numbers = #tpu.dot_dimension_numbers<[1], [0], [0], [1], [0, 0, 1, 1], [], []>} : vector<2x32xbf16>, vector<32x64xbf16>, vector<2x64xf32> -> vector<2x64xf32>
    %331 = vector.broadcast %50 : vector<1x64xf32> to vector<2x64xf32>
    %332 = arith.addf %330, %331 : vector<2x64xf32>
    %cst_119 = arith.constant 0.000000e+00 : f32
    %333 = vector.broadcast %cst_119 : f32 to vector<2x64xf32>
    %334 = arith.maximumf %332, %333 : vector<2x64xf32>
    %335 = arith.truncf %334 : vector<2x64xf32> to vector<2x64xbf16>
    %cst_120 = arith.constant dense<0.000000e+00> : vector<2x32xf32>
    %336 = tpu.matmul %335, %49, %cst_120 {dimension_numbers = #tpu.dot_dimension_numbers<[1], [0], [0], [1], [0, 0, 1, 1], [], []>} : vector<2x64xbf16>, vector<64x32xbf16>, vector<2x32xf32> -> vector<2x32xf32>
    %337 = vector.broadcast %51 : vector<1x32xf32> to vector<2x32xf32>
    %338 = arith.addf %336, %337 : vector<2x32xf32>
    %339 = arith.addf %328, %338 : vector<2x32xf32>
    %cst_121 = arith.constant dense<0.000000e+00> : vector<2xf32>
    %340 = vector.multi_reduction <add>, %339, %cst_121 [1] : vector<2x32xf32> to vector<2xf32>
    %341 = vector.shape_cast %340 : vector<2xf32> to vector<2x1xf32>
    %cst_122 = arith.constant 3.200000e+01 : f32
    %342 = vector.broadcast %cst_122 : f32 to vector<2x1xf32>
    %343 = arith.divf %341, %342 : vector<2x1xf32>
    %344 = vector.broadcast %343 : vector<2x1xf32> to vector<2x32xf32>
    %345 = arith.subf %339, %344 : vector<2x32xf32>
    %346 = arith.mulf %345, %345 : vector<2x32xf32>
    %cst_123 = arith.constant dense<0.000000e+00> : vector<2xf32>
    %347 = vector.multi_reduction <add>, %346, %cst_123 [1] : vector<2x32xf32> to vector<2xf32>
    %348 = vector.shape_cast %347 : vector<2xf32> to vector<2x1xf32>
    %cst_124 = arith.constant 3.200000e+01 : f32
    %349 = vector.broadcast %cst_124 : f32 to vector<2x1xf32>
    %350 = arith.divf %348, %349 : vector<2x1xf32>
    %351 = vector.broadcast %343 : vector<2x1xf32> to vector<2x32xf32>
    %352 = arith.subf %339, %351 : vector<2x32xf32>
    %cst_125 = arith.constant 9.99999974E-6 : f32
    %353 = vector.broadcast %cst_125 : f32 to vector<2x1xf32>
    %354 = arith.addf %350, %353 : vector<2x1xf32>
    %355 = math.rsqrt %354 : vector<2x1xf32>
    %356 = vector.broadcast %355 : vector<2x1xf32> to vector<2x32xf32>
    %357 = arith.mulf %352, %356 : vector<2x32xf32>
    %358 = vector.broadcast %52 : vector<1x32xf32> to vector<2x32xf32>
    %359 = arith.mulf %357, %358 : vector<2x32xf32>
    %360 = vector.broadcast %53 : vector<1x32xf32> to vector<2x32xf32>
    %361 = arith.addf %359, %360 : vector<2x32xf32>
    %362 = arith.truncf %361 : vector<2x32xf32> to vector<2x32xbf16>
    %363 = vector.extract_strided_slice %28 {offsets = [0, 64], sizes = [32, 32], strides = [1, 1]} : vector<32x96xbf16> to vector<32x32xbf16>
    %cst_126 = arith.constant dense<0.000000e+00> : vector<2x32xf32>
    %364 = tpu.matmul %362, %363, %cst_126 {dimension_numbers = #tpu.dot_dimension_numbers<[1], [0], [0], [1], [0, 0, 1, 1], [], []>} : vector<2x32xbf16>, vector<32x32xbf16>, vector<2x32xf32> -> vector<2x32xf32>
    %365 = vector.extract_strided_slice %30 {offsets = [0, 64], sizes = [1, 32], strides = [1, 1]} : vector<1x96xf32> to vector<1x32xf32>
    %366 = vector.broadcast %365 : vector<1x32xf32> to vector<2x32xf32>
    %367 = arith.addf %364, %366 : vector<2x32xf32>
    %368 = arith.truncf %367 : vector<2x32xf32> to vector<2x32xbf16>
    %cst_127 = arith.constant dense<0.000000e+00> : vector<2x32xf32>
    %369 = tpu.matmul %368, %29, %cst_127 {dimension_numbers = #tpu.dot_dimension_numbers<[1], [0], [0], [1], [0, 0, 1, 1], [], []>} : vector<2x32xbf16>, vector<32x32xbf16>, vector<2x32xf32> -> vector<2x32xf32>
    %370 = vector.broadcast %31 : vector<1x32xf32> to vector<2x32xf32>
    %371 = arith.addf %369, %370 : vector<2x32xf32>
    %372 = vector.extract_strided_slice %3 {offsets = [0, 0], sizes = [8, 32], strides = [1, 1]} : vector<16x32xf32> to vector<8x32xf32>
    %373 = vector.extract_strided_slice %371 {offsets = [0, 0], sizes = [1, 32], strides = [1, 1]} : vector<2x32xf32> to vector<1x32xf32>
    %374 = vector.broadcast %373 : vector<1x32xf32> to vector<8x32xf32>
    %375 = arith.addf %372, %374 : vector<8x32xf32>
    %376 = vector.extract_strided_slice %3 {offsets = [8, 0], sizes = [8, 32], strides = [1, 1]} : vector<16x32xf32> to vector<8x32xf32>
    %377 = vector.extract_strided_slice %371 {offsets = [1, 0], sizes = [1, 32], strides = [1, 1]} : vector<2x32xf32> to vector<1x32xf32>
    %378 = vector.broadcast %377 : vector<1x32xf32> to vector<8x32xf32>
    %379 = arith.addf %376, %378 : vector<8x32xf32>
    %380 = tpu.concatenate %375, %379 in 0 : vector<8x32xf32>, vector<8x32xf32> -> vector<16x32xf32>
    %cst_128 = arith.constant dense<0.000000e+00> : vector<16xf32>
    %381 = vector.multi_reduction <add>, %380, %cst_128 [1] : vector<16x32xf32> to vector<16xf32>
    %382 = vector.shape_cast %381 : vector<16xf32> to vector<16x1xf32>
    %cst_129 = arith.constant 3.200000e+01 : f32
    %383 = vector.broadcast %cst_129 : f32 to vector<16x1xf32>
    %384 = arith.divf %382, %383 : vector<16x1xf32>
    %385 = vector.broadcast %384 : vector<16x1xf32> to vector<16x32xf32>
    %386 = arith.subf %380, %385 : vector<16x32xf32>
    %387 = arith.mulf %386, %386 : vector<16x32xf32>
    %cst_130 = arith.constant dense<0.000000e+00> : vector<16xf32>
    %388 = vector.multi_reduction <add>, %387, %cst_130 [1] : vector<16x32xf32> to vector<16xf32>
    %389 = vector.shape_cast %388 : vector<16xf32> to vector<16x1xf32>
    %cst_131 = arith.constant 3.200000e+01 : f32
    %390 = vector.broadcast %cst_131 : f32 to vector<16x1xf32>
    %391 = arith.divf %389, %390 : vector<16x1xf32>
    %392 = vector.broadcast %384 : vector<16x1xf32> to vector<16x32xf32>
    %393 = arith.subf %380, %392 : vector<16x32xf32>
    %cst_132 = arith.constant 9.99999974E-6 : f32
    %394 = vector.broadcast %cst_132 : f32 to vector<16x1xf32>
    %395 = arith.addf %391, %394 : vector<16x1xf32>
    %396 = math.rsqrt %395 : vector<16x1xf32>
    %397 = vector.broadcast %396 : vector<16x1xf32> to vector<16x32xf32>
    %398 = arith.mulf %393, %397 : vector<16x32xf32>
    %399 = vector.broadcast %32 : vector<1x32xf32> to vector<16x32xf32>
    %400 = arith.mulf %398, %399 : vector<16x32xf32>
    %401 = vector.broadcast %33 : vector<1x32xf32> to vector<16x32xf32>
    %402 = arith.addf %400, %401 : vector<16x32xf32>
    %403 = arith.truncf %3 : vector<16x32xf32> to vector<16x32xbf16>
    %404 = vector.extract_strided_slice %38 {offsets = [0, 0], sizes = [32, 64], strides = [1, 1]} : vector<32x96xbf16> to vector<32x64xbf16>
    %cst_133 = arith.constant dense<0.000000e+00> : vector<16x64xf32>
    %405 = tpu.matmul %403, %404, %cst_133 {dimension_numbers = #tpu.dot_dimension_numbers<[1], [0], [0], [1], [0, 0, 1, 1], [], []>} : vector<16x32xbf16>, vector<32x64xbf16>, vector<16x64xf32> -> vector<16x64xf32>
    %406 = vector.extract_strided_slice %40 {offsets = [0, 0], sizes = [1, 64], strides = [1, 1]} : vector<1x96xf32> to vector<1x64xf32>
    %407 = vector.broadcast %406 : vector<1x64xf32> to vector<16x64xf32>
    %408 = arith.addf %405, %407 : vector<16x64xf32>
    %409 = vector.extract_strided_slice %408 {offsets = [0, 0], sizes = [16, 32], strides = [1, 1]} : vector<16x64xf32> to vector<16x32xf32>
    %410 = vector.extract_strided_slice %408 {offsets = [0, 32], sizes = [16, 32], strides = [1, 1]} : vector<16x64xf32> to vector<16x32xf32>
    %411 = arith.truncf %402 : vector<16x32xf32> to vector<16x32xbf16>
    %412 = vector.extract_strided_slice %38 {offsets = [0, 64], sizes = [32, 32], strides = [1, 1]} : vector<32x96xbf16> to vector<32x32xbf16>
    %cst_134 = arith.constant dense<0.000000e+00> : vector<16x32xf32>
    %413 = tpu.matmul %411, %412, %cst_134 {dimension_numbers = #tpu.dot_dimension_numbers<[1], [0], [0], [1], [0, 0, 1, 1], [], []>} : vector<16x32xbf16>, vector<32x32xbf16>, vector<16x32xf32> -> vector<16x32xf32>
    %414 = vector.extract_strided_slice %40 {offsets = [0, 64], sizes = [1, 32], strides = [1, 1]} : vector<1x96xf32> to vector<1x32xf32>
    %415 = vector.broadcast %414 : vector<1x32xf32> to vector<16x32xf32>
    %416 = arith.addf %413, %415 : vector<16x32xf32>
    %417 = vector.extract_strided_slice %409 {offsets = [0, 0], sizes = [8, 8], strides = [1, 1]} : vector<16x32xf32> to vector<8x8xf32>
    %418 = vector.extract_strided_slice %410 {offsets = [0, 0], sizes = [8, 8], strides = [1, 1]} : vector<16x32xf32> to vector<8x8xf32>
    %419 = tpu.transpose %418, [1, 0] : vector<8x8xf32> -> vector<8x8xf32>
    %cst_135 = arith.constant dense<0.000000e+00> : vector<8x8xf32>
    %420 = tpu.matmul %417, %419, %cst_135 {dimension_numbers = #tpu.dot_dimension_numbers<[1], [0], [0], [1], [0, 0, 1, 1], [], []>} : vector<8x8xf32>, vector<8x8xf32>, vector<8x8xf32> -> vector<8x8xf32>
    %cst_136 = arith.constant 0.353553385 : f32
    %421 = vector.broadcast %cst_136 : f32 to vector<8x8xf32>
    %422 = arith.mulf %420, %421 : vector<8x8xf32>
    %cst_137 = arith.constant dense<0xFF800000> : vector<8xf32>
    %423 = vector.multi_reduction <maximumf>, %422, %cst_137 [1] : vector<8x8xf32> to vector<8xf32>
    %424 = vector.shape_cast %423 : vector<8xf32> to vector<8x1xf32>
    %425 = vector.broadcast %424 : vector<8x1xf32> to vector<8x8xf32>
    %426 = arith.subf %422, %425 : vector<8x8xf32>
    %427 = math.exp %426 : vector<8x8xf32>
    %cst_138 = arith.constant dense<0.000000e+00> : vector<8xf32>
    %428 = vector.multi_reduction <add>, %427, %cst_138 [1] : vector<8x8xf32> to vector<8xf32>
    %429 = vector.shape_cast %428 : vector<8xf32> to vector<8x1xf32>
    %430 = tpu.reciprocal %429 {approx = true} : vector<8x1xf32> -> vector<8x1xf32>
    %431 = vector.broadcast %430 : vector<8x1xf32> to vector<8x8xf32>
    %432 = arith.mulf %427, %431 : vector<8x8xf32>
    %433 = vector.extract_strided_slice %416 {offsets = [0, 0], sizes = [8, 8], strides = [1, 1]} : vector<16x32xf32> to vector<8x8xf32>
    %cst_139 = arith.constant dense<0.000000e+00> : vector<8x8xf32>
    %434 = tpu.matmul %432, %433, %cst_139 {dimension_numbers = #tpu.dot_dimension_numbers<[1], [0], [0], [1], [0, 0, 1, 1], [], []>} : vector<8x8xf32>, vector<8x8xf32>, vector<8x8xf32> -> vector<8x8xf32>
    %435 = vector.extract_strided_slice %409 {offsets = [0, 8], sizes = [8, 8], strides = [1, 1]} : vector<16x32xf32> to vector<8x8xf32>
    %436 = vector.extract_strided_slice %410 {offsets = [0, 8], sizes = [8, 8], strides = [1, 1]} : vector<16x32xf32> to vector<8x8xf32>
    %437 = tpu.transpose %436, [1, 0] : vector<8x8xf32> -> vector<8x8xf32>
    %cst_140 = arith.constant dense<0.000000e+00> : vector<8x8xf32>
    %438 = tpu.matmul %435, %437, %cst_140 {dimension_numbers = #tpu.dot_dimension_numbers<[1], [0], [0], [1], [0, 0, 1, 1], [], []>} : vector<8x8xf32>, vector<8x8xf32>, vector<8x8xf32> -> vector<8x8xf32>
    %cst_141 = arith.constant 0.353553385 : f32
    %439 = vector.broadcast %cst_141 : f32 to vector<8x8xf32>
    %440 = arith.mulf %438, %439 : vector<8x8xf32>
    %cst_142 = arith.constant dense<0xFF800000> : vector<8xf32>
    %441 = vector.multi_reduction <maximumf>, %440, %cst_142 [1] : vector<8x8xf32> to vector<8xf32>
    %442 = vector.shape_cast %441 : vector<8xf32> to vector<8x1xf32>
    %443 = vector.broadcast %442 : vector<8x1xf32> to vector<8x8xf32>
    %444 = arith.subf %440, %443 : vector<8x8xf32>
    %445 = math.exp %444 : vector<8x8xf32>
    %cst_143 = arith.constant dense<0.000000e+00> : vector<8xf32>
    %446 = vector.multi_reduction <add>, %445, %cst_143 [1] : vector<8x8xf32> to vector<8xf32>
    %447 = vector.shape_cast %446 : vector<8xf32> to vector<8x1xf32>
    %448 = tpu.reciprocal %447 {approx = true} : vector<8x1xf32> -> vector<8x1xf32>
    %449 = vector.broadcast %448 : vector<8x1xf32> to vector<8x8xf32>
    %450 = arith.mulf %445, %449 : vector<8x8xf32>
    %451 = vector.extract_strided_slice %416 {offsets = [0, 8], sizes = [8, 8], strides = [1, 1]} : vector<16x32xf32> to vector<8x8xf32>
    %cst_144 = arith.constant dense<0.000000e+00> : vector<8x8xf32>
    %452 = tpu.matmul %450, %451, %cst_144 {dimension_numbers = #tpu.dot_dimension_numbers<[1], [0], [0], [1], [0, 0, 1, 1], [], []>} : vector<8x8xf32>, vector<8x8xf32>, vector<8x8xf32> -> vector<8x8xf32>
    %453 = vector.extract_strided_slice %409 {offsets = [0, 16], sizes = [8, 8], strides = [1, 1]} : vector<16x32xf32> to vector<8x8xf32>
    %454 = vector.extract_strided_slice %410 {offsets = [0, 16], sizes = [8, 8], strides = [1, 1]} : vector<16x32xf32> to vector<8x8xf32>
    %455 = tpu.transpose %454, [1, 0] : vector<8x8xf32> -> vector<8x8xf32>
    %cst_145 = arith.constant dense<0.000000e+00> : vector<8x8xf32>
    %456 = tpu.matmul %453, %455, %cst_145 {dimension_numbers = #tpu.dot_dimension_numbers<[1], [0], [0], [1], [0, 0, 1, 1], [], []>} : vector<8x8xf32>, vector<8x8xf32>, vector<8x8xf32> -> vector<8x8xf32>
    %cst_146 = arith.constant 0.353553385 : f32
    %457 = vector.broadcast %cst_146 : f32 to vector<8x8xf32>
    %458 = arith.mulf %456, %457 : vector<8x8xf32>
    %cst_147 = arith.constant dense<0xFF800000> : vector<8xf32>
    %459 = vector.multi_reduction <maximumf>, %458, %cst_147 [1] : vector<8x8xf32> to vector<8xf32>
    %460 = vector.shape_cast %459 : vector<8xf32> to vector<8x1xf32>
    %461 = vector.broadcast %460 : vector<8x1xf32> to vector<8x8xf32>
    %462 = arith.subf %458, %461 : vector<8x8xf32>
    %463 = math.exp %462 : vector<8x8xf32>
    %cst_148 = arith.constant dense<0.000000e+00> : vector<8xf32>
    %464 = vector.multi_reduction <add>, %463, %cst_148 [1] : vector<8x8xf32> to vector<8xf32>
    %465 = vector.shape_cast %464 : vector<8xf32> to vector<8x1xf32>
    %466 = tpu.reciprocal %465 {approx = true} : vector<8x1xf32> -> vector<8x1xf32>
    %467 = vector.broadcast %466 : vector<8x1xf32> to vector<8x8xf32>
    %468 = arith.mulf %463, %467 : vector<8x8xf32>
    %469 = vector.extract_strided_slice %416 {offsets = [0, 16], sizes = [8, 8], strides = [1, 1]} : vector<16x32xf32> to vector<8x8xf32>
    %cst_149 = arith.constant dense<0.000000e+00> : vector<8x8xf32>
    %470 = tpu.matmul %468, %469, %cst_149 {dimension_numbers = #tpu.dot_dimension_numbers<[1], [0], [0], [1], [0, 0, 1, 1], [], []>} : vector<8x8xf32>, vector<8x8xf32>, vector<8x8xf32> -> vector<8x8xf32>
    %471 = vector.extract_strided_slice %409 {offsets = [0, 24], sizes = [8, 8], strides = [1, 1]} : vector<16x32xf32> to vector<8x8xf32>
    %472 = vector.extract_strided_slice %410 {offsets = [0, 24], sizes = [8, 8], strides = [1, 1]} : vector<16x32xf32> to vector<8x8xf32>
    %473 = tpu.transpose %472, [1, 0] : vector<8x8xf32> -> vector<8x8xf32>
    %cst_150 = arith.constant dense<0.000000e+00> : vector<8x8xf32>
    %474 = tpu.matmul %471, %473, %cst_150 {dimension_numbers = #tpu.dot_dimension_numbers<[1], [0], [0], [1], [0, 0, 1, 1], [], []>} : vector<8x8xf32>, vector<8x8xf32>, vector<8x8xf32> -> vector<8x8xf32>
    %cst_151 = arith.constant 0.353553385 : f32
    %475 = vector.broadcast %cst_151 : f32 to vector<8x8xf32>
    %476 = arith.mulf %474, %475 : vector<8x8xf32>
    %cst_152 = arith.constant dense<0xFF800000> : vector<8xf32>
    %477 = vector.multi_reduction <maximumf>, %476, %cst_152 [1] : vector<8x8xf32> to vector<8xf32>
    %478 = vector.shape_cast %477 : vector<8xf32> to vector<8x1xf32>
    %479 = vector.broadcast %478 : vector<8x1xf32> to vector<8x8xf32>
    %480 = arith.subf %476, %479 : vector<8x8xf32>
    %481 = math.exp %480 : vector<8x8xf32>
    %cst_153 = arith.constant dense<0.000000e+00> : vector<8xf32>
    %482 = vector.multi_reduction <add>, %481, %cst_153 [1] : vector<8x8xf32> to vector<8xf32>
    %483 = vector.shape_cast %482 : vector<8xf32> to vector<8x1xf32>
    %484 = tpu.reciprocal %483 {approx = true} : vector<8x1xf32> -> vector<8x1xf32>
    %485 = vector.broadcast %484 : vector<8x1xf32> to vector<8x8xf32>
    %486 = arith.mulf %481, %485 : vector<8x8xf32>
    %487 = vector.extract_strided_slice %416 {offsets = [0, 24], sizes = [8, 8], strides = [1, 1]} : vector<16x32xf32> to vector<8x8xf32>
    %cst_154 = arith.constant dense<0.000000e+00> : vector<8x8xf32>
    %488 = tpu.matmul %486, %487, %cst_154 {dimension_numbers = #tpu.dot_dimension_numbers<[1], [0], [0], [1], [0, 0, 1, 1], [], []>} : vector<8x8xf32>, vector<8x8xf32>, vector<8x8xf32> -> vector<8x8xf32>
    %489 = tpu.concatenate %434, %452, %470, %488 in 1 : vector<8x8xf32>, vector<8x8xf32>, vector<8x8xf32>, vector<8x8xf32> -> vector<8x32xf32>
    %490 = vector.extract_strided_slice %409 {offsets = [8, 0], sizes = [8, 8], strides = [1, 1]} : vector<16x32xf32> to vector<8x8xf32>
    %491 = vector.extract_strided_slice %410 {offsets = [8, 0], sizes = [8, 8], strides = [1, 1]} : vector<16x32xf32> to vector<8x8xf32>
    %492 = tpu.transpose %491, [1, 0] : vector<8x8xf32> -> vector<8x8xf32>
    %cst_155 = arith.constant dense<0.000000e+00> : vector<8x8xf32>
    %493 = tpu.matmul %490, %492, %cst_155 {dimension_numbers = #tpu.dot_dimension_numbers<[1], [0], [0], [1], [0, 0, 1, 1], [], []>} : vector<8x8xf32>, vector<8x8xf32>, vector<8x8xf32> -> vector<8x8xf32>
    %cst_156 = arith.constant 0.353553385 : f32
    %494 = vector.broadcast %cst_156 : f32 to vector<8x8xf32>
    %495 = arith.mulf %493, %494 : vector<8x8xf32>
    %cst_157 = arith.constant dense<0xFF800000> : vector<8xf32>
    %496 = vector.multi_reduction <maximumf>, %495, %cst_157 [1] : vector<8x8xf32> to vector<8xf32>
    %497 = vector.shape_cast %496 : vector<8xf32> to vector<8x1xf32>
    %498 = vector.broadcast %497 : vector<8x1xf32> to vector<8x8xf32>
    %499 = arith.subf %495, %498 : vector<8x8xf32>
    %500 = math.exp %499 : vector<8x8xf32>
    %cst_158 = arith.constant dense<0.000000e+00> : vector<8xf32>
    %501 = vector.multi_reduction <add>, %500, %cst_158 [1] : vector<8x8xf32> to vector<8xf32>
    %502 = vector.shape_cast %501 : vector<8xf32> to vector<8x1xf32>
    %503 = tpu.reciprocal %502 {approx = true} : vector<8x1xf32> -> vector<8x1xf32>
    %504 = vector.broadcast %503 : vector<8x1xf32> to vector<8x8xf32>
    %505 = arith.mulf %500, %504 : vector<8x8xf32>
    %506 = vector.extract_strided_slice %416 {offsets = [8, 0], sizes = [8, 8], strides = [1, 1]} : vector<16x32xf32> to vector<8x8xf32>
    %cst_159 = arith.constant dense<0.000000e+00> : vector<8x8xf32>
    %507 = tpu.matmul %505, %506, %cst_159 {dimension_numbers = #tpu.dot_dimension_numbers<[1], [0], [0], [1], [0, 0, 1, 1], [], []>} : vector<8x8xf32>, vector<8x8xf32>, vector<8x8xf32> -> vector<8x8xf32>
    %508 = vector.extract_strided_slice %409 {offsets = [8, 8], sizes = [8, 8], strides = [1, 1]} : vector<16x32xf32> to vector<8x8xf32>
    %509 = vector.extract_strided_slice %410 {offsets = [8, 8], sizes = [8, 8], strides = [1, 1]} : vector<16x32xf32> to vector<8x8xf32>
    %510 = tpu.transpose %509, [1, 0] : vector<8x8xf32> -> vector<8x8xf32>
    %cst_160 = arith.constant dense<0.000000e+00> : vector<8x8xf32>
    %511 = tpu.matmul %508, %510, %cst_160 {dimension_numbers = #tpu.dot_dimension_numbers<[1], [0], [0], [1], [0, 0, 1, 1], [], []>} : vector<8x8xf32>, vector<8x8xf32>, vector<8x8xf32> -> vector<8x8xf32>
    %cst_161 = arith.constant 0.353553385 : f32
    %512 = vector.broadcast %cst_161 : f32 to vector<8x8xf32>
    %513 = arith.mulf %511, %512 : vector<8x8xf32>
    %cst_162 = arith.constant dense<0xFF800000> : vector<8xf32>
    %514 = vector.multi_reduction <maximumf>, %513, %cst_162 [1] : vector<8x8xf32> to vector<8xf32>
    %515 = vector.shape_cast %514 : vector<8xf32> to vector<8x1xf32>
    %516 = vector.broadcast %515 : vector<8x1xf32> to vector<8x8xf32>
    %517 = arith.subf %513, %516 : vector<8x8xf32>
    %518 = math.exp %517 : vector<8x8xf32>
    %cst_163 = arith.constant dense<0.000000e+00> : vector<8xf32>
    %519 = vector.multi_reduction <add>, %518, %cst_163 [1] : vector<8x8xf32> to vector<8xf32>
    %520 = vector.shape_cast %519 : vector<8xf32> to vector<8x1xf32>
    %521 = tpu.reciprocal %520 {approx = true} : vector<8x1xf32> -> vector<8x1xf32>
    %522 = vector.broadcast %521 : vector<8x1xf32> to vector<8x8xf32>
    %523 = arith.mulf %518, %522 : vector<8x8xf32>
    %524 = vector.extract_strided_slice %416 {offsets = [8, 8], sizes = [8, 8], strides = [1, 1]} : vector<16x32xf32> to vector<8x8xf32>
    %cst_164 = arith.constant dense<0.000000e+00> : vector<8x8xf32>
    %525 = tpu.matmul %523, %524, %cst_164 {dimension_numbers = #tpu.dot_dimension_numbers<[1], [0], [0], [1], [0, 0, 1, 1], [], []>} : vector<8x8xf32>, vector<8x8xf32>, vector<8x8xf32> -> vector<8x8xf32>
    %526 = vector.extract_strided_slice %409 {offsets = [8, 16], sizes = [8, 8], strides = [1, 1]} : vector<16x32xf32> to vector<8x8xf32>
    %527 = vector.extract_strided_slice %410 {offsets = [8, 16], sizes = [8, 8], strides = [1, 1]} : vector<16x32xf32> to vector<8x8xf32>
    %528 = tpu.transpose %527, [1, 0] : vector<8x8xf32> -> vector<8x8xf32>
    %cst_165 = arith.constant dense<0.000000e+00> : vector<8x8xf32>
    %529 = tpu.matmul %526, %528, %cst_165 {dimension_numbers = #tpu.dot_dimension_numbers<[1], [0], [0], [1], [0, 0, 1, 1], [], []>} : vector<8x8xf32>, vector<8x8xf32>, vector<8x8xf32> -> vector<8x8xf32>
    %cst_166 = arith.constant 0.353553385 : f32
    %530 = vector.broadcast %cst_166 : f32 to vector<8x8xf32>
    %531 = arith.mulf %529, %530 : vector<8x8xf32>
    %cst_167 = arith.constant dense<0xFF800000> : vector<8xf32>
    %532 = vector.multi_reduction <maximumf>, %531, %cst_167 [1] : vector<8x8xf32> to vector<8xf32>
    %533 = vector.shape_cast %532 : vector<8xf32> to vector<8x1xf32>
    %534 = vector.broadcast %533 : vector<8x1xf32> to vector<8x8xf32>
    %535 = arith.subf %531, %534 : vector<8x8xf32>
    %536 = math.exp %535 : vector<8x8xf32>
    %cst_168 = arith.constant dense<0.000000e+00> : vector<8xf32>
    %537 = vector.multi_reduction <add>, %536, %cst_168 [1] : vector<8x8xf32> to vector<8xf32>
    %538 = vector.shape_cast %537 : vector<8xf32> to vector<8x1xf32>
    %539 = tpu.reciprocal %538 {approx = true} : vector<8x1xf32> -> vector<8x1xf32>
    %540 = vector.broadcast %539 : vector<8x1xf32> to vector<8x8xf32>
    %541 = arith.mulf %536, %540 : vector<8x8xf32>
    %542 = vector.extract_strided_slice %416 {offsets = [8, 16], sizes = [8, 8], strides = [1, 1]} : vector<16x32xf32> to vector<8x8xf32>
    %cst_169 = arith.constant dense<0.000000e+00> : vector<8x8xf32>
    %543 = tpu.matmul %541, %542, %cst_169 {dimension_numbers = #tpu.dot_dimension_numbers<[1], [0], [0], [1], [0, 0, 1, 1], [], []>} : vector<8x8xf32>, vector<8x8xf32>, vector<8x8xf32> -> vector<8x8xf32>
    %544 = vector.extract_strided_slice %409 {offsets = [8, 24], sizes = [8, 8], strides = [1, 1]} : vector<16x32xf32> to vector<8x8xf32>
    %545 = vector.extract_strided_slice %410 {offsets = [8, 24], sizes = [8, 8], strides = [1, 1]} : vector<16x32xf32> to vector<8x8xf32>
    %546 = tpu.transpose %545, [1, 0] : vector<8x8xf32> -> vector<8x8xf32>
    %cst_170 = arith.constant dense<0.000000e+00> : vector<8x8xf32>
    %547 = tpu.matmul %544, %546, %cst_170 {dimension_numbers = #tpu.dot_dimension_numbers<[1], [0], [0], [1], [0, 0, 1, 1], [], []>} : vector<8x8xf32>, vector<8x8xf32>, vector<8x8xf32> -> vector<8x8xf32>
    %cst_171 = arith.constant 0.353553385 : f32
    %548 = vector.broadcast %cst_171 : f32 to vector<8x8xf32>
    %549 = arith.mulf %547, %548 : vector<8x8xf32>
    %cst_172 = arith.constant dense<0xFF800000> : vector<8xf32>
    %550 = vector.multi_reduction <maximumf>, %549, %cst_172 [1] : vector<8x8xf32> to vector<8xf32>
    %551 = vector.shape_cast %550 : vector<8xf32> to vector<8x1xf32>
    %552 = vector.broadcast %551 : vector<8x1xf32> to vector<8x8xf32>
    %553 = arith.subf %549, %552 : vector<8x8xf32>
    %554 = math.exp %553 : vector<8x8xf32>
    %cst_173 = arith.constant dense<0.000000e+00> : vector<8xf32>
    %555 = vector.multi_reduction <add>, %554, %cst_173 [1] : vector<8x8xf32> to vector<8xf32>
    %556 = vector.shape_cast %555 : vector<8xf32> to vector<8x1xf32>
    %557 = tpu.reciprocal %556 {approx = true} : vector<8x1xf32> -> vector<8x1xf32>
    %558 = vector.broadcast %557 : vector<8x1xf32> to vector<8x8xf32>
    %559 = arith.mulf %554, %558 : vector<8x8xf32>
    %560 = vector.extract_strided_slice %416 {offsets = [8, 24], sizes = [8, 8], strides = [1, 1]} : vector<16x32xf32> to vector<8x8xf32>
    %cst_174 = arith.constant dense<0.000000e+00> : vector<8x8xf32>
    %561 = tpu.matmul %559, %560, %cst_174 {dimension_numbers = #tpu.dot_dimension_numbers<[1], [0], [0], [1], [0, 0, 1, 1], [], []>} : vector<8x8xf32>, vector<8x8xf32>, vector<8x8xf32> -> vector<8x8xf32>
    %562 = tpu.concatenate %507, %525, %543, %561 in 1 : vector<8x8xf32>, vector<8x8xf32>, vector<8x8xf32>, vector<8x8xf32> -> vector<8x32xf32>
    %563 = tpu.concatenate %489, %562 in 0 : vector<8x32xf32>, vector<8x32xf32> -> vector<16x32xf32>
    %564 = arith.truncf %563 : vector<16x32xf32> to vector<16x32xbf16>
    %cst_175 = arith.constant dense<0.000000e+00> : vector<16x32xf32>
    %565 = tpu.matmul %564, %39, %cst_175 {dimension_numbers = #tpu.dot_dimension_numbers<[1], [0], [0], [1], [0, 0, 1, 1], [], []>} : vector<16x32xbf16>, vector<32x32xbf16>, vector<16x32xf32> -> vector<16x32xf32>
    %566 = vector.broadcast %41 : vector<1x32xf32> to vector<16x32xf32>
    %567 = arith.addf %565, %566 : vector<16x32xf32>
    %568 = arith.addf %3, %567 : vector<16x32xf32>
    %cst_176 = arith.constant dense<0.000000e+00> : vector<16xf32>
    %569 = vector.multi_reduction <add>, %568, %cst_176 [1] : vector<16x32xf32> to vector<16xf32>
    %570 = vector.shape_cast %569 : vector<16xf32> to vector<16x1xf32>
    %cst_177 = arith.constant 3.200000e+01 : f32
    %571 = vector.broadcast %cst_177 : f32 to vector<16x1xf32>
    %572 = arith.divf %570, %571 : vector<16x1xf32>
    %573 = vector.broadcast %572 : vector<16x1xf32> to vector<16x32xf32>
    %574 = arith.subf %568, %573 : vector<16x32xf32>
    %575 = arith.mulf %574, %574 : vector<16x32xf32>
    %cst_178 = arith.constant dense<0.000000e+00> : vector<16xf32>
    %576 = vector.multi_reduction <add>, %575, %cst_178 [1] : vector<16x32xf32> to vector<16xf32>
    %577 = vector.shape_cast %576 : vector<16xf32> to vector<16x1xf32>
    %cst_179 = arith.constant 3.200000e+01 : f32
    %578 = vector.broadcast %cst_179 : f32 to vector<16x1xf32>
    %579 = arith.divf %577, %578 : vector<16x1xf32>
    %580 = vector.broadcast %572 : vector<16x1xf32> to vector<16x32xf32>
    %581 = arith.subf %568, %580 : vector<16x32xf32>
    %cst_180 = arith.constant 9.99999974E-6 : f32
    %582 = vector.broadcast %cst_180 : f32 to vector<16x1xf32>
    %583 = arith.addf %579, %582 : vector<16x1xf32>
    %584 = math.rsqrt %583 : vector<16x1xf32>
    %585 = vector.broadcast %584 : vector<16x1xf32> to vector<16x32xf32>
    %586 = arith.mulf %581, %585 : vector<16x32xf32>
    %587 = vector.broadcast %42 : vector<1x32xf32> to vector<16x32xf32>
    %588 = arith.mulf %586, %587 : vector<16x32xf32>
    %589 = vector.broadcast %43 : vector<1x32xf32> to vector<16x32xf32>
    %590 = arith.addf %588, %589 : vector<16x32xf32>
    %591 = arith.truncf %590 : vector<16x32xf32> to vector<16x32xbf16>
    %cst_181 = arith.constant dense<0.000000e+00> : vector<16x64xf32>
    %592 = tpu.matmul %591, %57, %cst_181 {dimension_numbers = #tpu.dot_dimension_numbers<[1], [0], [0], [1], [0, 0, 1, 1], [], []>} : vector<16x32xbf16>, vector<32x64xbf16>, vector<16x64xf32> -> vector<16x64xf32>
    %593 = vector.broadcast %60 : vector<1x64xf32> to vector<16x64xf32>
    %594 = arith.addf %592, %593 : vector<16x64xf32>
    %cst_182 = arith.constant 0.000000e+00 : f32
    %595 = vector.broadcast %cst_182 : f32 to vector<16x64xf32>
    %596 = arith.maximumf %594, %595 : vector<16x64xf32>
    %597 = arith.truncf %596 : vector<16x64xf32> to vector<16x64xbf16>
    %cst_183 = arith.constant dense<0.000000e+00> : vector<16x32xf32>
    %598 = tpu.matmul %597, %59, %cst_183 {dimension_numbers = #tpu.dot_dimension_numbers<[1], [0], [0], [1], [0, 0, 1, 1], [], []>} : vector<16x64xbf16>, vector<64x32xbf16>, vector<16x32xf32> -> vector<16x32xf32>
    %599 = vector.broadcast %61 : vector<1x32xf32> to vector<16x32xf32>
    %600 = arith.addf %598, %599 : vector<16x32xf32>
    %601 = arith.addf %590, %600 : vector<16x32xf32>
    %cst_184 = arith.constant dense<0.000000e+00> : vector<16xf32>
    %602 = vector.multi_reduction <add>, %601, %cst_184 [1] : vector<16x32xf32> to vector<16xf32>
    %603 = vector.shape_cast %602 : vector<16xf32> to vector<16x1xf32>
    %cst_185 = arith.constant 3.200000e+01 : f32
    %604 = vector.broadcast %cst_185 : f32 to vector<16x1xf32>
    %605 = arith.divf %603, %604 : vector<16x1xf32>
    %606 = vector.broadcast %605 : vector<16x1xf32> to vector<16x32xf32>
    %607 = arith.subf %601, %606 : vector<16x32xf32>
    %608 = arith.mulf %607, %607 : vector<16x32xf32>
    %cst_186 = arith.constant dense<0.000000e+00> : vector<16xf32>
    %609 = vector.multi_reduction <add>, %608, %cst_186 [1] : vector<16x32xf32> to vector<16xf32>
    %610 = vector.shape_cast %609 : vector<16xf32> to vector<16x1xf32>
    %cst_187 = arith.constant 3.200000e+01 : f32
    %611 = vector.broadcast %cst_187 : f32 to vector<16x1xf32>
    %612 = arith.divf %610, %611 : vector<16x1xf32>
    %613 = vector.broadcast %605 : vector<16x1xf32> to vector<16x32xf32>
    %614 = arith.subf %601, %613 : vector<16x32xf32>
    %cst_188 = arith.constant 9.99999974E-6 : f32
    %615 = vector.broadcast %cst_188 : f32 to vector<16x1xf32>
    %616 = arith.addf %612, %615 : vector<16x1xf32>
    %617 = math.rsqrt %616 : vector<16x1xf32>
    %618 = vector.broadcast %617 : vector<16x1xf32> to vector<16x32xf32>
    %619 = arith.mulf %614, %618 : vector<16x32xf32>
    %620 = vector.broadcast %62 : vector<1x32xf32> to vector<16x32xf32>
    %621 = arith.mulf %619, %620 : vector<16x32xf32>
    %622 = vector.broadcast %63 : vector<1x32xf32> to vector<16x32xf32>
    %623 = arith.addf %621, %622 : vector<16x32xf32>
    %624 = vector.extract_strided_slice %623 {offsets = [0, 0], sizes = [8, 32], strides = [1, 1]} : vector<16x32xf32> to vector<8x32xf32>
    %c0_189 = arith.constant 0 : index
    %c0_190 = arith.constant 0 : index
    %c0_191 = arith.constant 0 : index
    %625 = vector.load %arg8[%c0_189, %c0_190, %c0_191] : memref<2x8x32xf32, #tpu.memory_space<vmem>>, vector<1x8x32xf32>
    %626 = vector.shape_cast %625 : vector<1x8x32xf32> to vector<8x32xf32>
    %627 = vector.shape_cast %624 : vector<8x32xf32> to vector<1x8x32xf32>
    tpu.vector_store %arg8[%c0_189, %c0_190, %c0_191], %627 {strides = array<i32>} : memref<2x8x32xf32, #tpu.memory_space<vmem>>, vector<1x8x32xf32>,
    %628 = vector.extract_strided_slice %623 {offsets = [8, 0], sizes = [8, 32], strides = [1, 1]} : vector<16x32xf32> to vector<8x32xf32>
    %c1_192 = arith.constant 1 : index
    %c0_193 = arith.constant 0 : index
    %c0_194 = arith.constant 0 : index
    %629 = vector.load %arg8[%c1_192, %c0_193, %c0_194] : memref<2x8x32xf32, #tpu.memory_space<vmem>>, vector<1x8x32xf32>
    %630 = vector.shape_cast %629 : vector<1x8x32xf32> to vector<8x32xf32>
    %631 = vector.shape_cast %628 : vector<8x32xf32> to vector<1x8x32xf32>
    tpu.vector_store %arg8[%c1_192, %c0_193, %c0_194], %631 {strides = array<i32>} : memref<2x8x32xf32, #tpu.memory_space<vmem>>, vector<1x8x32xf32>,
    return
  }
  func.func @transform_0(%arg0: i32) -> (i32, i32, i32) {
    %c0_i32 = arith.constant 0 : i32
    %c0_i32_0 = arith.constant 0 : i32
    %c0_i32_1 = arith.constant 0 : i32
    return %c0_i32, %arg0, %c0_i32_0 : i32, i32, i32
  }
  func.func @transform_1(%arg0: i32) -> (i32, i32, i32) {
    %c0_i32 = arith.constant 0 : i32
    %c0_i32_0 = arith.constant 0 : i32
    %c0_i32_1 = arith.constant 0 : i32
    return %arg0, %c0_i32, %c0_i32_0 : i32, i32, i32
  }
  func.func @transform_2(%arg0: i32) -> (i32, i32, i32) {
    %c0_i32 = arith.constant 0 : i32
    %c0_i32_0 = arith.constant 0 : i32
    %c0_i32_1 = arith.constant 0 : i32
    %c0_i32_2 = arith.constant 0 : i32
    return %c0_i32, %c0_i32_0, %c0_i32_1 : i32, i32, i32
  }
  func.func @transform_3(%arg0: i32) -> (i32, i32, i32) {
    %c0_i32 = arith.constant 0 : i32
    %c0_i32_0 = arith.constant 0 : i32
    %c0_i32_1 = arith.constant 0 : i32
    %c0_i32_2 = arith.constant 0 : i32
    return %c0_i32, %c0_i32_0, %c0_i32_1 : i32, i32, i32
  }
  func.func @transform_4(%arg0: i32) -> (i32, i32, i32) {
    %c0_i32 = arith.constant 0 : i32
    %c0_i32_0 = arith.constant 0 : i32
    %c0_i32_1 = arith.constant 0 : i32
    %c0_i32_2 = arith.constant 0 : i32
    return %c0_i32, %c0_i32_0, %c0_i32_1 : i32, i32, i32
  }
  func.func @transform_5(%arg0: i32) -> (i32, i32, i32) {
    %c0_i32 = arith.constant 0 : i32
    %c0_i32_0 = arith.constant 0 : i32
    %c0_i32_1 = arith.constant 0 : i32
    %c0_i32_2 = arith.constant 0 : i32
    return %c0_i32, %c0_i32_0, %c0_i32_1 : i32, i32, i32
  }
  func.func @transform_6(%arg0: i32) -> (i32, i32, i32) {
    %c0_i32 = arith.constant 0 : i32
    %c0_i32_0 = arith.constant 0 : i32
    %c0_i32_1 = arith.constant 0 : i32
    %c0_i32_2 = arith.constant 0 : i32
    return %c0_i32, %c0_i32_0, %c0_i32_1 : i32, i32, i32
  }
  func.func @transform_7(%arg0: i32) -> (i32, i32, i32) {
    %c0_i32 = arith.constant 0 : i32
    %c0_i32_0 = arith.constant 0 : i32
    %c0_i32_1 = arith.constant 0 : i32
    return %arg0, %c0_i32, %c0_i32_0 : i32, i32, i32
  }
}

</mosaic_0001>

<bundles_post_ra>
// kernel: forward.1
= control target key start
LH: loop header
LB: loop body
LE: loop exit
PB: predicated region body
PF: predicated region fallthrough
CT: control target
= control target key end

     0   :  { %s3093_s0 = inlined_call_operand.vmem [shape: f32[2,16,32], index: 0, kind: input, shape index: {}]   ;;  %s3094_s1 = inlined_call_operand.vmem [shape: f32[2,11,32], index: 1, kind: input, shape index: {}]   ;;  %s3095_s2 = inlined_call_operand.vmem [shape: bf16[4,32,128], index: 2, kind: input, shape index: {}]   ;;  %s3096_s3 = inlined_call_operand.vmem [shape: bf16[2,32,64], index: 3, kind: input, shape index: {}]   ;;  %s3097_s4 = inlined_call_operand.vmem [shape: bf16[2,64,32], index: 4, kind: input, shape index: {}]   ;;  %s3098_s5 = inlined_call_operand.vmem [shape: f32[6,2,128], index: 5, kind: input, shape index: {}]   ;;  %s3099_s6 = inlined_call_operand.vmem [shape: f32[2,65,8], index: 6, kind: input, shape index: {}]   ;;  %s3100_s7 = inlined_call_operand.hbm [shape: f32[2,8,32], index: 7, kind: output, shape index: {}]  }
   0x1   :  { %v2544_v0 = vld [vmem:[%s3095_s2 + $0x8] sm:$0xff]  ;;  %v2549_v1 = vld [vmem:[%s3095_s2] sm:$0xff] }
   0x2   :  { %113 = vmatpush.bf16.msra.mxu0 %v2544_v0  ;;  %v2555_v2 = vld [vmem:[%s3093_s0] sm:$0xff]  ;;  %v2560_v3 = vld [vmem:[%s3093_s0 + $0x8] sm:$0xff] }
   0x3   :  { %12 = vsyncpa [#allocation3], 0  ;;  %v89_v4 = vpack.c.bf16 %v2560_v3, %v2555_v2  ;;  %vm103_vm0 = vcmask 261120   ;;  %v2569_v5 = vld [vmem:[%s3098_s5] sm:$0x3]  ;;  %s2482_s11 = smov 88  }
   0x4   :  { %v2572_v6 = vperm.slane %v2569_v5, 0  ;;  %s2483_s12 = smov 112   ;;  %s2484_s13 = smov 96   ;;  %vm124_vm1 = vcmask 64512   ;;  %vm398_vm2 = vcmask 130048   ;;  %vm400_vm3 = vcmask 195584  }
   0x5   :  { %s2485_s14 = smov 80   ;;  %s2486_s15 = smov 120   ;;  %vm793_vm6 = vcmask 1040384   ;;  %vm869_vm13 = vcmask 41984   ;;  %vm886_vm14 = vcmask 1045504   ;;  %vm882_vm15 = vcmask 48128  }
   0x6   :  { %114 = vmatpush.bf16.msra.mxu0 %v2549_v1  ;;  %s2487_s16 = smov 48   ;;  %s2488_s17 = smov 72  }
   0x7   :  { %s2489_s18 = smov 64   ;;  %s2490_s19 = smov 56  }
   0x8   :  { %s2491_s20 = smov 104   ;;  %s2492_s21 = smov 40  }
   0x9   :  { %2152 = vmatmul.msk.bf16.vlgmr.msra.gmra.mxu0 %vm103_vm0, %v89_v4  ;;  %s2493_s22 = smov 32   ;;  %s2494_s23 = smov 8  }
   0xa   :  { %s2495_s24 = smov 24   ;;  %s2496_s25 = smov 16  }
   0xb   :  { %s2101_s27 = sshll.u32 %s3100_s7, 4  ;;  %s2499_s28 = smov [#allocation2]   ;;  %s2102_s27 = int_to_ptr.hbm [resolvable:$true] %s2101_s27 }
   0xc   :  { %s2099_s29 = sshll.u32 %s2499_s28, 4  ;;  %s2500_s30 = smov 128   ;;  %s2100_s29 = int_to_ptr.vmem [resolvable:$true] %s2099_s29 }
  0x86   :  { %v116_v7 = vpop.f32.mrf.mxu0 }
  0x87   :  { %v2575_v8 = vadd.f32 %v116_v7, %v2572_v6 }
  0x89   :  { %189 = vrot.lane.b32.xlu2 %v2575_v8, %s2482_s11  ;;  %253 = vrot.lane.b32.xlu1 %v2575_v8, %s2483_s12 }
  0x8a   :  { %122 = vrot.lane.b32.xlu0 %v2575_v8, %s2484_s13 }
  0x8e   :  { %v118_v9 = vpop.f32.mrf.mxu0 }
  0x8f   :  { %v2590_v10 = vadd.f32 %v118_v9, %v2572_v6 }
  0x92   :  { %255 = vrot.lane.b32.xlu0 %v2575_v8, %s2485_s14 }
  0x9a   :  { %187 = vrot.lane.b32.xlu0 %v2575_v8, %s2486_s15 }
  0xa2   :  { %293 = vrot.lane.b32.xlu0 %v2575_v8, %s2487_s16 }
  0xaa   :  { %403 = vrot.lane.b32.xlu0 %v2590_v10, %s2484_s13 }
  0xe3   :  { %v190_v11 = vpop.permute.xlu2 %189 }
  0xe4   :  { %2156 = vmatpush.xpose.msk.msra.mxu3 %vm124_vm1, %v190_v11 }
  0xfb   :  { %v254_v14 = vpop.permute.xlu1 %253 }
  0xfc   :  { %v123_v12 = vpop.permute.xlu0 %122 }
  0xfd   :  { %2153 = vmatpush.xpose.msk.msra.mxu1 %vm124_vm1, %v123_v12 }
 0x100   :  { %2154 = vmatmul.msk.f32.vlgmr.msra.gmra.mxu1 %vm124_vm1, %v2575_v8 }
 0x104   :  { %v256_v13 = vpop.permute.xlu0 %255 }
 0x105   :  { %2159 = vmatpush.xpose.msk.msrb.mxu1 %vm124_vm1, %v256_v13 }
 0x108   :  { %2160 = vmatmul.msk.f32.vlgmr.msrb.gmra.mxu1 %vm124_vm1, %v254_v14 }
 0x10c   :  { %v188_v15 = vpop.permute.xlu0 %187 }
 0x10d   :  { %2157 = vmatmul.msk.f32.vlgmr.msra.gmra.mxu3 %vm124_vm1, %v188_v15 }
 0x114   :  { %v294_v16 = vpop.permute.xlu0 %293 }
 0x115   :  { %314 = vmatpush.msrb.mxu3 %v294_v16 }
 0x11c   :  { %v404_v17 = vpop.permute.xlu0 %403 }
 0x11d   :  { %2165 = vmatpush.xpose.msk.msra.mxu3 %vm124_vm1, %v404_v17 }
 0x17d   :  { %v146_v18 = vpop.f32.mrf.mxu1 }
 0x17e   :  { %v149_v19 = vmul.f32 0.35355338, %v146_v18 }
 0x180   :  { %v150_v20 = vsel %vm124_vm1, %v149_v19, -inf }
 0x181   :  { %151 = vmax.xlane.f32.xlu0 %v150_v20 }
 0x185   :  { %v278_v21 = vpop.f32.mrf.mxu1 }
 0x186   :  { %v281_v22 = vmul.f32 0.35355338, %v278_v21 }
 0x188   :  { %v282_v23 = vsel %vm124_vm1, %v281_v22, -inf }
 0x189   :  { %283 = vmax.xlane.f32.xlu1 %v282_v23 }
 0x190   :  { %v212_v31 = vpop.f32.mrf.mxu3 }
 0x191   :  { %v215_v33 = vmul.f32 0.35355338, %v212_v31 }
 0x193   :  { %v216_v34 = vsel %vm124_vm1, %v215_v33, -inf }
 0x195   :  { %321 = vrot.lane.b32.xlu0 %v2575_v8, %s2488_s17 }
 0x19d   :  { %469 = vrot.lane.b32.xlu0 %v2590_v10, %s2482_s11 }
 0x1a5   :  { %535 = vrot.lane.b32.xlu0 %v2590_v10, %s2485_s14 }
 0x1ad   :  { %533 = vrot.lane.b32.xlu0 %v2590_v10, %s2483_s12 }
 0x1f4   :  { %v152_v27 = vpop.xlane.xlu0 %151 }
 0x1f5   :  { %v153_v29 = vsub.f32 %v149_v19, %v152_v27 }
 0x1f7   :  { %v154_v32 = vmul.f32 1.442695, %v153_v29 }
 0x1fc   :  { %v284_v24 = vpop.xlane.xlu1 %283 }
 0x1fd   :  { %v285_v25 = vsub.f32 %v281_v22, %v284_v24 }
 0x1ff   :  { %v286_v26 = vmul.f32 1.442695, %v285_v25 }
 0x201   :  { %2362 = vpow2.f32 %v286_v26 }
 0x202   :  { %2364 = vpow2.f32 %v154_v32 }
 0x207   :  { %v2363_v28 = vpop.eup %2362  ;;  %v322_v37 = vpop.permute.xlu0 %321 }
 0x208   :  { %v288_v30 = vsel %vm124_vm1, %v2363_v28, 0.0  ;;  %v2365_v35 = vpop.eup %2364 }
 0x209   :  { %289 = vadd.xlane.f32.xlu2 %v288_v30  ;;  %v156_v36 = vsel %vm124_vm1, %v2365_v35, 0.0 }
 0x20f   :  { %v470_v38 = vpop.permute.xlu0 %469 }
 0x211   :  { %217 = vmax.xlane.f32.xlu2 %v216_v34 }
 0x217   :  { %v536_v44 = vpop.permute.xlu0 %535 }
 0x219   :  { %157 = vadd.xlane.f32.xlu2 %v156_v36 }
 0x21f   :  { %v534_v52 = vpop.permute.xlu0 %533 }
 0x231   :  { %161 = vrot.lane.b32.xlu2 %v2575_v8, %s2489_s18 }
 0x27c   :  { %v290_v39 = vpop.xlane.xlu2 %289 }
 0x27d   :  { %2366 = vrcp.f32 %v290_v39 }
 0x283   :  { %v2367_v40 = vpop.eup %2366 }
 0x284   :  { %v218_v41 = vpop.xlane.xlu2 %217  ;;  %v292_v42 = vmul.f32 %v2367_v40, %v2363_v28 }
 0x285   :  { %v219_v43 = vsub.f32 %v215_v33, %v218_v41 }
 0x286   :  { %2161 = vmatmul.msk.f32.vlgmr.msrb.gmra.mxu3 %vm124_vm1, %v292_v42 }
 0x287   :  { %v220_v45 = vmul.f32 1.442695, %v219_v43  ;;  %2171 = vmatpush.xpose.msk.msrb.mxu3 %vm124_vm1, %v536_v44 }
 0x289   :  { %2368 = vpow2.f32 %v220_v45 }
 0x28c   :  { %v158_v46 = vpop.xlane.xlu2 %157 }
 0x28d   :  { %2370 = vrcp.f32 %v158_v46 }
 0x28e   :  { %2166 = vmatmul.msk.f32.vlgmr.msra.gmra.mxu3 %vm124_vm1, %v2590_v10 }
 0x28f   :  { %v2369_v47 = vpop.eup %2368 }
 0x290   :  { %v222_v48 = vsel %vm124_vm1, %v2369_v47, 0.0 }
 0x291   :  { %223 = vadd.xlane.f32.xlu1 %v222_v48 }
 0x293   :  { %v2371_v49 = vpop.eup %2370 }
 0x294   :  { %v162_v50 = vpop.permute.xlu2 %161  ;;  %v160_v51 = vmul.f32 %v2371_v49, %v2365_v35 }
 0x295   :  { %182 = vmatpush.msra.mxu2 %v162_v50 }
 0x296   :  { %2155 = vmatmul.msk.f32.vlgmr.msra.gmra.mxu2 %vm124_vm1, %v160_v51  ;;  %2172 = vmatmul.msk.f32.vlgmr.msrb.gmra.mxu3 %vm124_vm1, %v534_v52 }
 0x304   :  { %v224_v60 = vpop.xlane.xlu1 %223 }
 0x309   :  { %v2624_v53 = vpop.f32.mrf.mxu3 }
 0x311   :  { %v426_v54 = vpop.f32.mrf.mxu3 }
 0x312   :  { %v429_v55 = vmul.f32 0.35355338, %v426_v54 }
 0x314   :  { %v430_v56 = vsel %vm124_vm1, %v429_v55, -inf }
 0x315   :  { %431 = vmax.xlane.f32.xlu1 %v430_v56 }
 0x319   :  { %v558_v57 = vpop.f32.mrf.mxu3  ;;  %v2648_v21 = vpop.f32.mrf.mxu2 }
 0x31a   :  { %v561_v58 = vmul.f32 0.35355338, %v558_v57 }
 0x31c   :  { %v562_v59 = vsel %vm124_vm1, %v561_v58, -inf }
 0x32e   :  { %227 = vrot.lane.b32.xlu1 %v2575_v8, %s2490_s19 }
 0x336   :  { %319 = vrot.lane.b32.xlu1 %v2575_v8, %s2491_s20 }
 0x33e   :  { %441 = vrot.lane.b32.xlu1 %v2590_v10, %s2489_s18 }
 0x346   :  { %467 = vrot.lane.b32.xlu1 %v2590_v10, %s2486_s15 }
 0x34e   :  { %601 = vrot.lane.b32.xlu1 %v2590_v10, %s2488_s17 }
 0x356   :  { %599 = vrot.lane.b32.xlu1 %v2590_v10, %s2491_s20 }
 0x380   :  { %563 = vmax.xlane.f32.xlu1 %v562_v59 }
 0x388   :  { %v432_v61 = vpop.xlane.xlu1 %431 }
 0x389   :  { %v433_v62 = vsub.f32 %v429_v55, %v432_v61 }
 0x38b   :  { %v434_v63 = vmul.f32 1.442695, %v433_v62 }
 0x38d   :  { %2372 = vpow2.f32 %v434_v63 }
 0x38e   :  { %2374 = vrcp.f32 %v224_v60 }
 0x393   :  { %v2373_v4 = vpop.eup %2372 }
 0x394   :  { %v436_v7 = vsel %vm124_vm1, %v2373_v4, 0.0  ;;  %v2375_v9 = vpop.eup %2374 }
 0x395   :  { %437 = vadd.xlane.f32.xlu2 %v436_v7  ;;  %v226_v12 = vmul.f32 %v2375_v9, %v2369_v47 }
 0x3a0   :  { %v228_v11 = vpop.permute.xlu1 %227 }
 0x3a1   :  { %248 = vmatpush.msrb.mxu2 %v228_v11 }
 0x3a2   :  { %2158 = vmatmul.msk.f32.vlgmr.msrb.gmra.mxu2 %vm124_vm1, %v226_v12 }
 0x3a3   :  { %2162 = vmatpush.xpose.msk.msra.mxu2 %vm124_vm1, %v322_v37 }
 0x3a8   :  { %v320_v13 = vpop.permute.xlu1 %319 }
 0x3aa   :  { %2163 = vmatmul.msk.f32.vlgmr.msra.gmra.mxu2 %vm124_vm1, %v320_v13 }
 0x3b0   :  { %v442_v14 = vpop.permute.xlu1 %441 }
 0x3b1   :  { %462 = vmatpush.msrb.mxu2 %v442_v14 }
 0x3b3   :  { %2168 = vmatpush.xpose.msk.msra.mxu2 %vm124_vm1, %v470_v38 }
 0x3b8   :  { %v468_v15 = vpop.permute.xlu1 %467 }
 0x3c0   :  { %v602_v19 = vpop.permute.xlu1 %601 }
 0x3c8   :  { %v600_v20 = vpop.permute.xlu1 %599 }
 0x3f3   :  { %v564_v22 = vpop.xlane.xlu1 %563 }
 0x3f4   :  { %v565_v24 = vsub.f32 %v561_v58, %v564_v22 }
 0x3f6   :  { %v566_v25 = vmul.f32 1.442695, %v565_v24 }
 0x408   :  { %v438_v16 = vpop.xlane.xlu2 %437 }
 0x409   :  { %2376 = vrcp.f32 %v438_v16 }
 0x40a   :  { %2378 = vpow2.f32 %v566_v25 }
 0x40f   :  { %v2377_v17 = vpop.eup %2376 }
 0x410   :  { %v440_v18 = vmul.f32 %v2377_v17, %v2373_v4  ;;  %v2654_v29 = vpop.eup %2378 }
 0x411   :  { %v568_v30 = vsel %vm124_vm1, %v2654_v29, 0.0 }
 0x412   :  { %2167 = vmatmul.msk.f32.vlgmr.msrb.gmra.mxu2 %vm124_vm1, %v440_v18 }
 0x413   :  { %2174 = vmatpush.xpose.msk.msrb.mxu2 %vm124_vm1, %v602_v19 }
 0x41a   :  { %2169 = vmatmul.msk.f32.vlgmr.msra.gmra.mxu2 %vm124_vm1, %v468_v15 }
 0x422   :  { %2175 = vmatmul.msk.f32.vlgmr.msrb.gmra.mxu2 %vm124_vm1, %v600_v20 }
 0x425   :  { %v2651_v23 = vpop.f32.mrf.mxu2 }
 0x42d   :  { %v344_v26 = vpop.f32.mrf.mxu2 }
 0x42e   :  { %v347_v27 = vmul.f32 0.35355338, %v344_v26 }
 0x430   :  { %v348_v28 = vsel %vm124_vm1, %v347_v27, -inf }
 0x431   :  { %349 = vmax.xlane.f32.xlu0 %v348_v28 }
 0x439   :  { %569 = vadd.xlane.f32.xlu0 %v568_v30 }
 0x44d   :  { %507 = vrot.lane.b32.xlu0 %v2590_v10, %s2490_s19 }
 0x495   :  { %v2660_v32 = vpop.f32.mrf.mxu2 }
 0x49d   :  { %v492_v36 = vpop.f32.mrf.mxu2 }
 0x49e   :  { %v495_v38 = vmul.f32 0.35355338, %v492_v36 }
 0x4a0   :  { %v496_v39 = vsel %vm124_vm1, %v495_v38, -inf }
 0x4a4   :  { %v350_v31 = vpop.xlane.xlu0 %349 }
 0x4a5   :  { %v351_v33 = vsub.f32 %v347_v27, %v350_v31  ;;  %v624_v40 = vpop.f32.mrf.mxu2 }
 0x4a6   :  { %v627_v41 = vmul.f32 0.35355338, %v624_v40 }
 0x4a7   :  { %v352_v34 = vmul.f32 1.442695, %v351_v33 }
 0x4a8   :  { %v628_v42 = vsel %vm124_vm1, %v627_v41, -inf }
 0x4a9   :  { %2380 = vpow2.f32 %v352_v34 }
 0x4ac   :  { %v570_v49 = vpop.xlane.xlu0 %569 }
 0x4af   :  { %v2381_v35 = vpop.eup %2380 }
 0x4b0   :  { %v354_v37 = vsel %vm124_vm1, %v2381_v35, 0.0 }
 0x4b1   :  { %355 = vadd.xlane.f32.xlu2 %v354_v37 }
 0x4b9   :  { %497 = vmax.xlane.f32.xlu2 %v496_v39 }
 0x4c1   :  { %629 = vmax.xlane.f32.xlu2 %v628_v42  ;;  %v2497_v42 = vmov 32.0  }
 0x4d9   :  { %359 = vrot.lane.b32.xlu2 %v2575_v8, %s2492_s21  ;;  %v508_v8 = vpop.permute.xlu0 %507 }
 0x524   :  { %v356_v43 = vpop.xlane.xlu2 %355 }
 0x52c   :  { %v498_v44 = vpop.xlane.xlu2 %497 }
 0x52d   :  { %v499_v45 = vsub.f32 %v495_v38, %v498_v44 }
 0x52f   :  { %v500_v46 = vmul.f32 1.442695, %v499_v45  ;;  %v2701_v45 = vperm.slane %v2569_v5, 1 }
 0x531   :  { %2382 = vpow2.f32 %v500_v46 }
 0x532   :  { %2384 = vrcp.f32 %v356_v43 }
 0x534   :  { %v630_v47 = vpop.xlane.xlu2 %629 }
 0x535   :  { %v631_v48 = vsub.f32 %v627_v41, %v630_v47 }
 0x537   :  { %v2383_v50 = vpop.eup %2382  ;;  %v632_v51 = vmul.f32 1.442695, %v631_v48 }
 0x538   :  { %v502_v52 = vsel %vm124_vm1, %v2383_v50, 0.0  ;;  %v2385_v54 = vpop.eup %2384 }
 0x539   :  { %2386 = vpow2.f32 %v632_v51  ;;  %503 = vadd.xlane.f32.xlu2 %v502_v52  ;;  %v358_v55 = vmul.f32 %v2385_v54, %v2381_v35 }
 0x53c   :  { %v360_v56 = vpop.permute.xlu2 %359 }
 0x53d   :  { %380 = vmatpush.msra.mxu1 %v360_v56 }
 0x53e   :  { %2164 = vmatmul.msk.f32.vlgmr.msra.gmra.mxu1 %vm124_vm1, %v358_v55 }
 0x53f   :  { %v2387_v57 = vpop.eup %2386  ;;  %528 = vmatpush.msrb.mxu1 %v508_v8 }
 0x540   :  { %v634_v58 = vsel %vm124_vm1, %v2387_v57, 0.0 }
 0x541   :  { %635 = vadd.xlane.f32.xlu1 %v634_v58  ;;  %v2725_v58 = vld [vmem:[%s3095_s2 + $0x10] sm:$0xff] }
 0x551   :  { %639 = vrot.lane.b32.xlu2 %v2590_v10, %s2492_s21 }
 0x559   :  { %683 = vrot.lane.b32.xlu2 %v2544_v0, %s2493_s22 }
 0x55a   :  { %573 = vrot.lane.b32.xlu1 %v2590_v10, %s2487_s16 }
 0x562   :  { %681 = vrot.lane.b32.xlu1 %v2549_v1, %s2493_s22 }
 0x5ac   :  { %v504_v59 = vpop.xlane.xlu2 %503 }
 0x5ad   :  { %2388 = vrcp.f32 %v504_v59  ;;  %v2498_v59 = vmov 8.0  }
 0x5b3   :  { %v2389_v60 = vpop.eup %2388 }
 0x5b4   :  { %v506_v61 = vmul.f32 %v2389_v60, %v2383_v50  ;;  %v636_v62 = vpop.xlane.xlu1 %635  ;;  %v640_v63 = vpop.permute.xlu2 %639  ;;  %v2734_v60 = vld [vmem:[%s3093_s0 + $0x10] sm:$0xff] }
 0x5b5   :  { %2390 = vrcp.f32 %v636_v62  ;;  %660 = vmatpush.msra.mxu1 %v640_v63  ;;  %v770_v63 = vsel %vm103_vm0, %v2734_v60, 0.0 }
 0x5b6   :  { %2170 = vmatmul.msk.f32.vlgmr.msrb.gmra.mxu1 %vm124_vm1, %v506_v61  ;;  %2392 = vrcp.f32 %v570_v49  ;;  %v2739_v61 = vld [vmem:[%s3093_s0 + $0x18] sm:$0xff] }
 0x5b7   :  { %2394 = vrcp.f32 %v2497_v42 }
 0x5b8   :  { %2396 = vrcp.f32 %v2498_v59 }
 0x5bb   :  { %v2391_v4 = vpop.eup %2390  ;;  %v382_v12 = vpop.f32.mrf.mxu1 }
 0x5bc   :  { %v638_v7 = vmul.f32 %v2391_v4, %v2387_v57  ;;  %v2393_v10 = vpop.eup %2392  ;;  %v684_v13 = vpop.permute.xlu2 %683  ;;  %v2295_v57 = vld [vmem:[%s3095_s2 + $0x18] sm:$0xff]  ;;  %v785_v4 = vsel %vm103_vm0, %v2739_v61, 0.0 }
 0x5bd   :  { %v572_v11 = vmul.f32 %v2393_v10, %v2654_v29  ;;  %700 = vmatpush.bf16.msra.mxu3 %v684_v13  ;;  %v2395_v43 = vpop.eup %2394 }
 0x5be   :  { %2176 = vmatmul.msk.f32.vlgmr.msra.gmra.mxu1 %vm124_vm1, %v638_v7  ;;  %v717_v44 = vmul.f32 32.0, %v2395_v43  ;;  %vm721_vm4 = vweird.f32 %v2395_v43  ;;  %v2397_v7 = vpop.eup %2396 }
 0x5bf   :  { %vm782_vm5 = vweird.f32 %v2397_v7 }
 0x5c0   :  { %v718_v46 = vsub.f32 1.0, %v717_v44 }
 0x5cc   :  { %v574_v9 = vpop.permute.xlu1 %573 }
 0x5cd   :  { %594 = vmatpush.msrb.mxu0 %v574_v9  ;;  %v771_v9 = vrot.slane %v770_v63, 4 }
 0x5ce   :  { %2173 = vmatmul.msk.f32.vlgmr.msrb.gmra.mxu0 %vm124_vm1, %v572_v11  ;;  %v786_v11 = vrot.slane %v785_v4, 4 }
 0x5d4   :  { %v682_v18 = vpop.permute.xlu1 %681 }
 0x5d5   :  { %701 = vmatpush.bf16.msra.mxu3 %v682_v18 }
 0x633   :  { %v530_v14 = vpop.f32.mrf.mxu1 }
 0x634   :  { %v2336_v15 = vpack.i.bf16 %v530_v14, %v2651_v23  ;;  %v772_v14 = vadd.f32 %v771_v9, %v770_v63 }
 0x636   :  { %2337 = vrot.lane.b32.xlu0 %v2336_v15, %s2494_s23  ;;  %v787_v15 = vadd.f32 %v786_v11, %v785_v4 }
 0x63b   :  { %v662_v1 = vpop.f32.mrf.mxu1 }
 0x63c   :  { %v2341_v16 = vpack.i.bf16 %v662_v1, %v382_v12  ;;  %v778_v12 = vmul.f32 8.0, %v2397_v7 }
 0x63e   :  { %2342 = vrot.lane.b32.xlu0 %v2341_v16, %s2495_s24  ;;  %v779_v1 = vsub.f32 1.0, %v778_v12  ;;  %v773_v16 = vrot.slane %v772_v14, 2 }
 0x640   :  { %v774_v18 = vadd.f32 %v773_v16, %v772_v14 }
 0x64b   :  { %v596_v0 = vpop.f32.mrf.mxu0 }
 0x64c   :  { %v2331_v17 = vpack.i.bf16 %v596_v0, %v2624_v53  ;;  %v788_v0 = vrot.slane %v787_v15, 2 }
 0x64e   :  { %2332 = vrot.lane.b32.xlu2 %v2331_v17, %s2496_s25  ;;  %v780_v17 = vmul.f32 %v2397_v7, %v779_v1 }
 0x656   :  { %688 = vrot.lane.b32.xlu2 %v2572_v6, %s2493_s22 }
 0x6a8   :  { %v2338_v19 = vpop.permute.xlu0 %2337  ;;  %v2333_v20 = vpop.permute.xlu2 %2332 }
 0x6a9   :  { %v2340_v22 = vunpack.i.h.bf16 %v2338_v19  ;;  %v2339_v23 = vunpack.i.l.bf16 %v2338_v19  ;;  %v2335_v24 = vunpack.i.h.bf16 %v2333_v20  ;;  %v2334_v25 = vunpack.i.l.bf16 %v2333_v20 }
 0x6aa   :  { %v789_v19 = vadd.f32 %v788_v0, %v787_v15 }
 0x6ab   :  { %v677_v26 = vsel %vm124_vm1, %v2660_v32, %v2340_v22  ;;  %v397_v53 = vsel %vm124_vm1, %v2648_v21, %v2339_v23  ;;  %v815_v22 = vld [vmem:[%s3099_s6 + $0x18] sm:$0xff]  ;;  %v781_v23 = vadd.f32 %v2397_v7, %v780_v17 }
 0x6ac   :  { %v399_v6 = vsel %vm398_vm2, %v397_v53, %v2334_v25  ;;  %v678_v30 = vsel %vm398_vm2, %v677_v26, %v2335_v24  ;;  %859 = vmatpush.msra.mxu2 %v815_v22  ;;  %v775_v25 = vrot.slane %v774_v18, 1  ;;  %v790_v26 = vrot.slane %v789_v19, 1  ;;  %v814_v53 = vld [vmem:[%s3099_s6 + $0x10] sm:$0xff] }
 0x6ae   :  { %860 = vmatpush.msra.mxu2 %v814_v53 }
 0x6b0   :  { %v2343_v27 = vpop.permute.xlu0 %2342  ;;  %v689_v32 = vpop.permute.xlu2 %688 }
 0x6b1   :  { %v2345_v28 = vunpack.i.h.bf16 %v2343_v27  ;;  %v2344_v29 = vunpack.i.l.bf16 %v2343_v27 }
 0x6b3   :  { %v679_v31 = vsel %vm400_vm3, %v678_v30, %v2345_v28  ;;  %v401_v33 = vsel %vm400_vm3, %v399_v6, %v2344_v29  ;;  %v776_v29 = vadd.f32 %v775_v25, %v774_v18  ;;  %v791_v6 = vadd.f32 %v790_v26, %v789_v19 }
 0x6b4   :  { %v680_v34 = vpack.c.bf16 %v679_v31, %v401_v33  ;;  %v813_v31 = vld [vmem:[%s3099_s6 + $0x8] sm:$0xff]  ;;  %v2756_v33 = vsel %vm782_vm5, %v2397_v7, %v781_v23 }
 0x6b5   :  { %861 = vmatpush.msra.mxu2 %v813_v31 }
 0x6b6   :  { %2177 = vmatmul.msk.bf16.vlgmr.msra.gmra.mxu3 %vm103_vm0, %v680_v34  ;;  %v784_v34 = vmul.f32 %v2756_v33, %v776_v29 }
 0x739   :  { %v703_v35 = vpop.f32.mrf.mxu3 }
 0x73a   :  { %v704_v36 = vadd.f32 %v703_v35, %v689_v32 }
 0x73c   :  { %v708_v21 = vadd.f32 %v704_v36, %v2555_v2  ;;  %v719_v2 = vmul.f32 %v2395_v43, %v718_v46  ;;  %v819_v36 = vld [vmem:[%s3099_s6 + $0x38] sm:$0xff] }
 0x73d   :  { %836 = vmatpush.msra.mxu0 %v819_v36 }
 0x73e   :  { %v710_v37 = vsel %vm103_vm0, %v708_v21, 0.0  ;;  %v720_v47 = vadd.f32 %v2395_v43, %v719_v2 }
 0x73f   :  { %711 = vadd.xlane.f32.xlu0 %v710_v37 }
 0x740   :  { %v2705_v48 = vsel %vm721_vm4, %v2395_v43, %v720_v47  ;;  %v816_v43 = vld [vmem:[%s3099_s6 + $0x20] sm:$0xff]  ;;  %vm1007_vm4 = vcmask 254976  }
 0x741   :  { %v705_v38 = vpop.f32.mrf.mxu3 }
 0x742   :  { %v706_v39 = vadd.f32 %v705_v38, %v689_v32  ;;  %v792_v32 = vmul.f32 %v791_v6, %v2756_v33  ;;  %v881_v6 = vld [vmem:[%s3094_s1] sm:$0x3f] }
 0x743   :  { %2180 = vmatpush.msk.msrb.mxu1 %vm886_vm14, %v881_v6  ;;  %v2853_v6 = vld [vmem:[%s3095_s2 + $0x30] sm:$0xff] }
 0x744   :  { %v709_v40 = vadd.f32 %v706_v39, %v2560_v3  ;;  %v794_v37 = vsel %vm793_vm6, %v784_v34, %v792_v32 }
 0x746   :  { %v713_v41 = vsel %vm103_vm0, %v709_v40, 0.0 }
 0x747   :  { %714 = vadd.xlane.f32.xlu1 %v713_v41  ;;  %v817_v41 = vld [vmem:[%s3099_s6 + $0x28] sm:$0xff] }
 0x760   :  { %765 = vrot.lane.b32.xlu1 %v2701_v45, %s2484_s13 }
 0x7b2   :  { %v712_v3 = vpop.xlane.xlu0 %711 }
 0x7b3   :  { %v723_v49 = vmul.f32 %v2705_v48, %v712_v3 }
 0x7b5   :  { %v2708_v50 = vsub.f32 %v708_v21, %v723_v49  ;;  %v812_v21 = vld [vmem:[%s3099_s6] sm:$0xff] }
 0x7b6   :  { %862 = vmatpush.msra.mxu2 %v812_v21  ;;  %v2182_v21 = vld [vmem:[%s3094_s1 + $0x10] sm:$0x3f] }
 0x7b7   :  { %v727_v51 = vmul.f32 %v2708_v50, %v2708_v50  ;;  %2179 = vmatmul.msk.f32.vlgmr.msra.gmra.mxu2 %vm103_vm0, %v794_v37 }
 0x7b9   :  { %v729_v5 = vsel %vm103_vm0, %v727_v51, 0.0  ;;  %v2781_v51 = vld [vmem:[%s3098_s5 + $0x2] sm:$0x3] }
 0x7ba   :  { %v715_v52 = vpop.xlane.xlu1 %714  ;;  %730 = vadd.xlane.f32.xlu2 %v729_v5 }
 0x7bb   :  { %v724_v54 = vmul.f32 %v2705_v48, %v715_v52 }
 0x7bd   :  { %v2714_v55 = vsub.f32 %v709_v40, %v724_v54  ;;  %v818_v40 = vld [vmem:[%s3099_s6 + $0x30] sm:$0xff]  ;;  %v943_v54 = vperm.slane %v2781_v51, 0 }
 0x7be   :  { %837 = vmatpush.msra.mxu0 %v818_v40 }
 0x7bf   :  { %v728_v56 = vmul.f32 %v2714_v55, %v2714_v55 }
 0x7c0   :  { %838 = vmatpush.msra.mxu0 %v817_v41 }
 0x7c1   :  { %v732_v8 = vsel %vm103_vm0, %v728_v56, 0.0 }
 0x7c2   :  { %733 = vadd.xlane.f32.xlu0 %v732_v8  ;;  %839 = vmatpush.msra.mxu0 %v816_v43 }
 0x7c4   :  { %2183 = vmatpush.msk.msrb.mxu0 %vm886_vm14, %v2182_v21  ;;  %v2296_v21 = vld [vmem:[%s3095_s2 + $0x20] sm:$0xff] }
 0x7d2   :  { %956 = vrot.lane.b32.xlu2 %v2295_v57, %s2489_s18  ;;  %v766_v52 = vpop.permute.xlu1 %765 }
 0x7d6   :  { %954 = vrot.lane.b32.xlu0 %v2725_v58, %s2489_s18 }
 0x7da   :  { %983 = vrot.lane.b32.xlu2 %v2295_v57, %s2493_s22 }
 0x7e2   :  { %961 = vrot.lane.b32.xlu2 %v943_v54, %s2489_s18 }
 0x7ea   :  { %981 = vrot.lane.b32.xlu2 %v2725_v58, %s2493_s22 }
 0x7f2   :  { %987 = vrot.lane.b32.xlu2 %v943_v54, %s2493_s22 }
 0x82d   :  { %v731_v62 = vpop.xlane.xlu2 %730 }
 0x82e   :  { %v735_v10 = vmul.f32 %v731_v62, %v2705_v48 }
 0x830   :  { %v737_v13 = vadd.f32 1e-05, %v735_v10 }
 0x832   :  { %2398 = vrsqrt.f32 %v737_v13  ;;  %vm745_vm8 = vweird.f32 %v737_v13 }
 0x835   :  { %v734_v20 = vpop.xlane.xlu0 %733  ;;  %v957_v39 = vpop.permute.xlu2 %956 }
 0x836   :  { %v736_v24 = vmul.f32 %v734_v20, %v2705_v48  ;;  %973 = vmatpush.bf16.msrb.mxu2 %v957_v39 }
 0x838   :  { %v2399_v27 = vpop.eup %2398  ;;  %v738_v28 = vadd.f32 1e-05, %v736_v24  ;;  %v2361_v24 = vld [vmem:[%s3099_s6 + $0x40] ss:$0 sm:$0xff] }
 0x839   :  { %v740_v30 = vmul.f32 %v2399_v27, %v737_v13  ;;  %vm746_vm7 = vweird.f32 %v2399_v27 }
 0x83a   :  { %2400 = vrsqrt.f32 %v738_v28  ;;  %vm747_vm9 = vmor %vm745_vm8, %vm746_vm7  ;;  %vm755_vm11 = vweird.f32 %v738_v28  ;;  %v864_v23 = vpop.f32.mrf.mxu2  ;;  %vm1097_vm8 = vcmask 523264  }
 0x83b   :  { %v741_v35 = vmul.f32 %v2399_v27, %v740_v30 }
 0x83d   :  { %v742_v38 = vmul.f32 0.5, %v741_v35  ;;  %v984_v30 = vpop.permute.xlu2 %983 }
 0x83e   :  { %999 = vmatpush.bf16.msra.mxu1 %v984_v30  ;;  %v1265_v30 = vpack.c.bf16 %v2739_v61, %v2734_v60 }
 0x83f   :  { %v743_v42 = vsub.f32 1.5, %v742_v38 }
 0x840   :  { %v2401_v44 = vpop.eup %2400 }
 0x841   :  { %v744_v46 = vmul.f32 %v2399_v27, %v743_v42  ;;  %v750_v2 = vmul.f32 %v2401_v44, %v738_v28  ;;  %vm756_vm10 = vweird.f32 %v2401_v44 }
 0x842   :  { %vm757_vm12 = vmor %vm755_vm11, %vm756_vm10 }
 0x843   :  { %v751_v47 = vmul.f32 %v2401_v44, %v750_v2  ;;  %v748_v3 = vsel %vm747_vm9, %v2399_v27, %v744_v46 }
 0x844   :  { %v759_v49 = vmul.f32 %v748_v3, %v2708_v50 }
 0x845   :  { %v752_v5 = vmul.f32 0.5, %v751_v47  ;;  %v962_v36 = vpop.permute.xlu2 %961 }
 0x846   :  { %v762_v56 = vmul.f32 %v2701_v45, %v759_v49 }
 0x847   :  { %v753_v8 = vsub.f32 1.5, %v752_v5 }
 0x848   :  { %v768_v57 = vadd.f32 %v766_v52, %v762_v56  ;;  %v955_v59 = vpop.permute.xlu0 %954 }
 0x849   :  { %v754_v62 = vmul.f32 %v2401_v44, %v753_v8  ;;  %974 = vmatpush.bf16.msrb.mxu2 %v955_v59  ;;  %v1030_v8 = vperm.slane %v2781_v51, 1  ;;  %v2305_v51 = vld [vmem:[%s3097_s4 + $0x18] sm:$0xff] }
 0x84a   :  { %v795_v50 = vsel %vm103_vm0, %v768_v57, 0.0 }
 0x84b   :  { %v758_v63 = vsel %vm757_vm12, %v2401_v44, %v754_v62  ;;  %v796_v4 = vrot.slane %v795_v50, 4 }
 0x84c   :  { %v760_v7 = vmul.f32 %v758_v63, %v2714_v55 }
 0x84d   :  { %v797_v10 = vadd.f32 %v796_v4, %v795_v50  ;;  %v982_v37 = vpop.permute.xlu2 %981  ;;  %v2301_v4 = vld [vmem:[%s3096_s3 + $0x8] sm:$0xff] }
 0x84e   :  { %v763_v9 = vmul.f32 %v2701_v45, %v760_v7  ;;  %1000 = vmatpush.bf16.msra.mxu1 %v982_v37  ;;  %1060 = vmatpush.bf16.msrb.mxu3 %v2301_v4  ;;  %v2300_v7 = vld [vmem:[%s3096_s3] sm:$0xff]  ;;  %v2297_v37 = vld [vmem:[%s3095_s2 + $0x28] sm:$0xff] }
 0x84f   :  { %v798_v11 = vrot.slane %v797_v10, 2 }
 0x850   :  { %v769_v12 = vadd.f32 %v766_v52, %v763_v9 }
 0x851   :  { %v799_v14 = vadd.f32 %v798_v11, %v797_v10  ;;  %v2828_v10 = vld [vmem:[%s3098_s5 + $0x8] sm:$0x3] }
 0x852   :  { %v803_v13 = vsel %vm103_vm0, %v769_v12, 0.0  ;;  %1061 = vmatpush.bf16.msrb.mxu3 %v2300_v7  ;;  %v1038_v11 = vperm.slane %v2828_v10, 0 }
 0x853   :  { %v804_v15 = vrot.slane %v803_v13, 4  ;;  %v800_v16 = vrot.slane %v799_v14, 1 }
 0x855   :  { %v805_v1 = vadd.f32 %v804_v15, %v803_v13  ;;  %v801_v18 = vadd.f32 %v800_v16, %v799_v14  ;;  %v988_v47 = vpop.permute.xlu2 %987  ;;  %v2304_v13 = vld [vmem:[%s3097_s4 + $0x10] sm:$0xff] }
 0x857   :  { %v806_v0 = vrot.slane %v805_v1, 2  ;;  %v802_v45 = vmul.f32 %v801_v18, %v2756_v33 }
 0x859   :  { %v807_v17 = vadd.f32 %v806_v0, %v805_v1 }
 0x85b   :  { %v808_v55 = vrot.slane %v807_v17, 1 }
 0x85d   :  { %v809_v19 = vadd.f32 %v808_v55, %v807_v17 }
 0x85f   :  { %v810_v20 = vmul.f32 %v809_v19, %v2756_v33 }
 0x861   :  { %v811_v58 = vsel %vm793_vm6, %v802_v45, %v810_v20 }
 0x862   :  { %2178 = vmatmul.msk.f32.vlgmr.msra.gmra.mxu0 %vm103_vm0, %v811_v58  ;;  %v942_v22 = vpack.c.bf16 %v811_v58, %v811_v58 }
 0x863   :  { %1105 = vmatpush.bf16.msra.mxu0 %v2305_v51 }
 0x864   :  { %2193 = vmatmul.msk.bf16.vlgmr.msrb.gmra.mxu2 %vm103_vm0, %v942_v22 }
 0x867   :  { %1106 = vmatpush.bf16.msra.mxu0 %v2304_v13 }
 0x8df   :  { %v841_v25 = vpop.f32.mrf.mxu0 }
 0x8e0   :  { %v865_v26 = vadd.f32 %v864_v23, %v841_v25  ;;  %v2303_v23 = vld [vmem:[%s3097_s4 + $0x8] sm:$0xff] }
 0x8e1   :  { %1107 = vmatpush.bf16.msra.mxu0 %v2303_v23 }
 0x8e2   :  { %v868_v53 = vadd.f32 %v2361_v24, %v865_v26  ;;  %v2302_v24 = vld [vmem:[%s3097_s4] sm:$0xff] }
 0x8e4   :  { %v870_v27 = vsel %vm869_vm13, %v868_v53, -inf }
 0x8e5   :  { %871 = vmax.xlane.f32.xlu1 %v870_v27  ;;  %1108 = vmatpush.bf16.msra.mxu0 %v2302_v24 }
 0x8e7   :  { %v976_v28 = vpop.f32.mrf.mxu2 }
 0x8e8   :  { %v977_v42 = vadd.f32 %v976_v28, %v962_v36 }
 0x8ea   :  { %v980_v43 = vpack.c.bf16 %v977_v42, %v977_v42 }
 0x8ef   :  { %v978_v29 = vpop.f32.mrf.mxu2 }
 0x8f0   :  { %v2847_v29 = vld [vmem:[%s3095_s2 + $0x38] sm:$0xff] }
 0x8f1   :  { %1288 = vmatpush.bf16.msra.mxu3 %v2847_v29 }
 0x8f5   :  { %1289 = vmatpush.bf16.msra.mxu3 %v2853_v6 }
 0x958   :  { %v872_v31 = vpop.xlane.xlu1 %871 }
 0x959   :  { %v873_v33 = vsub.f32 %v868_v53, %v872_v31 }
 0x95b   :  { %v874_v34 = vmul.f32 1.442695, %v873_v33 }
 0x95d   :  { %2402 = vpow2.f32 %v874_v34 }
 0x963   :  { %v2403_v32 = vpop.eup %2402 }
 0x964   :  { %v876_v35 = vsel %vm869_vm13, %v2403_v32, 0.0 }
 0x965   :  { %877 = vadd.xlane.f32.xlu0 %v876_v35 }
 0x979   :  { %1033 = vrot.lane.b32.xlu0 %v1030_v8, %s2484_s13 }
 0x9d8   :  { %v878_v38 = vpop.xlane.xlu0 %877 }
 0x9d9   :  { %2404 = vrcp.f32 %v878_v38  ;;  %v1137_v38 = vperm.slane %v2828_v10, 1 }
 0x9df   :  { %v2405_v39 = vpop.eup %2404 }
 0x9e0   :  { %v880_v40 = vmul.f32 %v2405_v39, %v2403_v32  ;;  %v2873_v39 = vld [vmem:[%s3098_s5 + $0x6] sm:$0x3] }
 0x9e2   :  { %v912_v41 = vrot.slane %v880_v40, 1  ;;  %2181 = vmatmul.msk.f32.vlgmr.msrb.gmra.mxu1 %vm882_vm15, %v880_v40  ;;  %v2876_v40 = vperm.slane %v2873_v39, 0 }
 0x9e4   :  { %2184 = vmatmul.msk.f32.vlgmr.msrb.gmra.mxu0 %vm882_vm15, %v912_v41 }
 0x9ea   :  { %2194 = vmatmul.msk.bf16.vlgmr.msra.gmra.mxu1 %vm103_vm0, %v980_v43 }
 0x9eb   :  { %v1034_v45 = vpop.permute.xlu0 %1033 }
 0xa5f   :  { %v907_v44 = vpop.f32.mrf.mxu1 }
 0xa61   :  { %v935_v46 = vpop.f32.mrf.mxu0 }
 0xa62   :  { %v939_v2 = vrot.slane %v935_v46, 7 }
 0xa64   :  { %v941_v5 = vsel %vm793_vm6, %v907_v44, %v939_v2 }
 0xa67   :  { %v1002_v3 = vpop.f32.mrf.mxu1 }
 0xa68   :  { %v1003_v49 = vadd.f32 %v1002_v3, %v988_v47 }
 0xa6a   :  { %v1006_v52 = vadd.f32 %v1003_v49, %v941_v5  ;;  %v2890_v5 = vld [vmem:[%s3098_s5 + $0x4] sm:$0x3] }
 0xa6c   :  { %v1008_v54 = vsel %vm1007_vm4, %v1006_v52, 0.0 }
 0xa6d   :  { %1009 = vadd.xlane.f32.xlu2 %v1008_v54  ;;  %v1145_v54 = vperm.slane %v2890_v5, 0 }
 0xa6f   :  { %v1004_v56 = vpop.f32.mrf.mxu1 }
 0xa85   :  { %1158 = vrot.lane.b32.xlu2 %v2297_v37, %s2489_s18 }
 0xa8d   :  { %1140 = vrot.lane.b32.xlu2 %v1137_v38, %s2484_s13 }
 0xa95   :  { %1185 = vrot.lane.b32.xlu2 %v2297_v37, %s2493_s22 }
 0xa9d   :  { %1163 = vrot.lane.b32.xlu2 %v1145_v54, %s2489_s18 }
 0xaa5   :  { %1189 = vrot.lane.b32.xlu2 %v1145_v54, %s2493_s22 }
 0xae0   :  { %v1010_v57 = vpop.xlane.xlu2 %1009 }
 0xae1   :  { %v1011_v59 = vmul.f32 %v1010_v57, %v2705_v48 }
 0xae3   :  { %v1012_v62 = vsub.f32 %v1006_v52, %v1011_v59 }
 0xae5   :  { %v1013_v50 = vmul.f32 %v1012_v62, %v1012_v62 }
 0xae7   :  { %v1014_v63 = vsel %vm1007_vm4, %v1013_v50, 0.0 }
 0xae8   :  { %1015 = vadd.xlane.f32.xlu1 %v1014_v63  ;;  %v1159_v3 = vpop.permute.xlu2 %1158 }
 0xae9   :  { %1175 = vmatpush.bf16.msra.mxu2 %v1159_v3 }
 0xaf0   :  { %v1141_v59 = vpop.permute.xlu2 %1140 }
 0xaf8   :  { %v1186_v4 = vpop.permute.xlu2 %1185 }
 0xaf9   :  { %1201 = vmatpush.bf16.msrb.mxu1 %v1186_v4 }
 0xb01   :  { %1094 = vrot.lane.b32.xlu1 %v1038_v11, %s2489_s18 }
 0xb5b   :  { %v1016_v9 = vpop.xlane.xlu1 %1015 }
 0xb5c   :  { %v1017_v12 = vmul.f32 %v1016_v9, %v2705_v48 }
 0xb5e   :  { %v1018_v14 = vadd.f32 1e-05, %v1017_v12 }
 0xb60   :  { %2406 = vrsqrt.f32 %v1018_v14  ;;  %vm1025_vm6 = vweird.f32 %v1018_v14 }
 0xb66   :  { %v2407_v15 = vpop.eup %2406 }
 0xb67   :  { %v1020_v1 = vmul.f32 %v2407_v15, %v1018_v14  ;;  %vm1026_vm5 = vweird.f32 %v2407_v15 }
 0xb68   :  { %vm1027_vm7 = vmor %vm1025_vm6, %vm1026_vm5 }
 0xb69   :  { %v1021_v16 = vmul.f32 %v2407_v15, %v1020_v1  ;;  %v1164_v1 = vpop.permute.xlu2 %1163 }
 0xb6b   :  { %v1022_v0 = vmul.f32 0.5, %v1021_v16 }
 0xb6d   :  { %v1023_v17 = vsub.f32 1.5, %v1022_v0 }
 0xb6f   :  { %v1024_v18 = vmul.f32 %v2407_v15, %v1023_v17 }
 0xb71   :  { %v1028_v55 = vsel %vm1027_vm7, %v2407_v15, %v1024_v18 }
 0xb72   :  { %v1029_v19 = vmul.f32 %v1028_v55, %v1012_v62  ;;  %v1190_v55 = vpop.permute.xlu2 %1189 }
 0xb73   :  { %v1095_v31 = vpop.permute.xlu1 %1094 }
 0xb74   :  { %v1031_v20 = vmul.f32 %v1030_v8, %v1029_v19 }
 0xb76   :  { %v1036_v58 = vadd.f32 %v1034_v45, %v1031_v20 }
 0xb78   :  { %v1037_v22 = vpack.c.bf16 %v1036_v58, %v1036_v58 }
 0xb7a   :  { %2203 = vmatmul.msk.bf16.vlgmr.msrb.gmra.mxu3 %vm103_vm0, %v1037_v22 }
 0xb8a   :  { %2239 = vmatmul.msk.bf16.vlgmr.msra.gmra.mxu3 %vm103_vm0, %v1265_v30 }
 0xbfd   :  { %v1063_v25 = vpop.f32.mrf.mxu3 }
 0xbfe   :  { %v1064_v26 = vadd.f32 %v1063_v25, %v1038_v11 }
 0xc00   :  { %v1067_v53 = vmax.f32 %v1064_v26, 0.0 }
 0xc02   :  { %v1068_v27 = vpack.c.bf16 %v1067_v53, %v1067_v53 }
 0xc04   :  { %2220 = vmatmul.msk.bf16.vlgmr.msra.gmra.mxu0 %vm1097_vm8, %v1068_v27 }
 0xc05   :  { %v1065_v28 = vpop.f32.mrf.mxu3 }
 0xc0d   :  { %v1291_v41 = vpop.f32.mrf.mxu3 }
 0xc0e   :  { %v2880_v42 = vadd.f32 %v1291_v41, %v2876_v40 }
 0xc81   :  { %v1110_v33 = vpop.f32.mrf.mxu0 }
 0xc82   :  { %v1111_v34 = vadd.f32 %v1110_v33, %v1095_v31 }
 0xc84   :  { %v1114_v32 = vadd.f32 %v1111_v34, %v1036_v58 }
 0xc86   :  { %v1115_v35 = vsel %vm1007_vm4, %v1114_v32, 0.0 }
 0xc87   :  { %1116 = vadd.xlane.f32.xlu0 %v1115_v35 }
 0xc89   :  { %v1112_v36 = vpop.f32.mrf.mxu0 }
 0xc9b   :  { %1156 = vrot.lane.b32.xlu0 %v2296_v21, %s2489_s18 }
 0xca3   :  { %1325 = vrot.lane.b32.xlu0 %v2880_v42, %s2484_s13 }
 0xcfa   :  { %v1117_v43 = vpop.xlane.xlu0 %1116 }
 0xcfb   :  { %v1118_v44 = vmul.f32 %v1117_v43, %v2705_v48  ;;  %v1256_v43 = vperm.slane %v2890_v5, 1 }
 0xcfd   :  { %v1119_v46 = vsub.f32 %v1114_v32, %v1118_v44 }
 0xcff   :  { %v1120_v2 = vmul.f32 %v1119_v46, %v1119_v46 }
 0xd01   :  { %v1121_v47 = vsel %vm1007_vm4, %v1120_v2, 0.0 }
 0xd02   :  { %1122 = vadd.xlane.f32.xlu1 %v1121_v47 }
 0xd0d   :  { %v1157_v49 = vpop.permute.xlu0 %1156 }
 0xd0e   :  { %1176 = vmatpush.bf16.msra.mxu2 %v1157_v49 }
 0xd15   :  { %v1326_v57 = vpop.permute.xlu0 %1325 }
 0xd16   :  { %2241 = vmatpush.xpose.msk.msrb.mxu2 %vm124_vm1, %v1326_v57 }
 0xd1b   :  { %1183 = vrot.lane.b32.xlu1 %v2296_v21, %s2493_s22 }
 0xd75   :  { %v1123_v52 = vpop.xlane.xlu1 %1122 }
 0xd76   :  { %v1124_v56 = vmul.f32 %v1123_v52, %v2705_v48 }
 0xd78   :  { %v1125_v8 = vadd.f32 1e-05, %v1124_v56 }
 0xd7a   :  { %2408 = vrsqrt.f32 %v1125_v8  ;;  %vm1132_vm10 = vweird.f32 %v1125_v8 }
 0xd80   :  { %v2409_v62 = vpop.eup %2408 }
 0xd81   :  { %v1127_v50 = vmul.f32 %v2409_v62, %v1125_v8  ;;  %vm1133_vm9 = vweird.f32 %v2409_v62 }
 0xd82   :  { %vm1134_vm11 = vmor %vm1132_vm10, %vm1133_vm9 }
 0xd83   :  { %v1128_v63 = vmul.f32 %v2409_v62, %v1127_v50 }
 0xd85   :  { %v1129_v7 = vmul.f32 0.5, %v1128_v63 }
 0xd87   :  { %v1130_v51 = vsub.f32 1.5, %v1129_v7 }
 0xd89   :  { %v1131_v10 = vmul.f32 %v2409_v62, %v1130_v51 }
 0xd8b   :  { %v1135_v9 = vsel %vm1134_vm11, %v2409_v62, %v1131_v10 }
 0xd8c   :  { %v1136_v11 = vmul.f32 %v1135_v9, %v1119_v46 }
 0xd8d   :  { %v1184_v15 = vpop.permute.xlu1 %1183 }
 0xd8e   :  { %v1138_v12 = vmul.f32 %v1137_v38, %v1136_v11  ;;  %1202 = vmatpush.bf16.msrb.mxu1 %v1184_v15 }
 0xd90   :  { %v1143_v13 = vadd.f32 %v1141_v59, %v1138_v12 }
 0xd92   :  { %v1144_v14 = vpack.c.bf16 %v1143_v13, %v1143_v13 }
 0xd94   :  { %2229 = vmatmul.msk.bf16.vlgmr.msra.gmra.mxu2 %vm103_vm0, %v1144_v14 }
 0xda4   :  { %2242 = vmatmul.msk.f32.vlgmr.msrb.gmra.mxu2 %vm124_vm1, %v2880_v42 }
 0xe17   :  { %v1178_v16 = vpop.f32.mrf.mxu2 }
 0xe18   :  { %v1179_v0 = vadd.f32 %v1178_v16, %v1164_v1 }
 0xe1a   :  { %v1182_v17 = vpack.c.bf16 %v1179_v0, %v1179_v0 }
 0xe1c   :  { %2230 = vmatmul.msk.bf16.vlgmr.msrb.gmra.mxu1 %vm103_vm0, %v1182_v17 }
 0xe1f   :  { %v1180_v18 = vpop.f32.mrf.mxu2 }
 0xe27   :  { %v1348_v53 = vpop.f32.mrf.mxu2 }
 0xe28   :  { %v1351_v27 = vmul.f32 0.35355338, %v1348_v53 }
 0xe2a   :  { %v1352_v28 = vsel %vm124_vm1, %v1351_v27, -inf }
 0xe99   :  { %v1204_v19 = vpop.f32.mrf.mxu1 }
 0xe9a   :  { %v1205_v45 = vadd.f32 %v1204_v19, %v1190_v55 }
 0xe9c   :  { %v1208_v20 = vperm.slane %v1205_v45, 0  ;;  %v1210_v58 = vperm.slane %v1205_v45, 1 }
 0xe9e   :  { %v1211_v22 = vadd.f32 %v2739_v61, %v1210_v58  ;;  %v1209_v23 = vadd.f32 %v2734_v60, %v1208_v20  ;;  %v1293_v61 = vpop.f32.mrf.mxu3 }
 0xe9f   :  { %v2911_v60 = vadd.f32 %v1293_v61, %v2876_v40 }
 0xea0   :  { %v1215_v24 = vsel %vm103_vm0, %v1211_v22, 0.0  ;;  %v1212_v25 = vsel %vm103_vm0, %v1209_v23, 0.0 }
 0xea1   :  { %v1206_v26 = vpop.f32.mrf.mxu1  ;;  %1216 = vadd.xlane.f32.xlu0 %v1215_v24  ;;  %1213 = vadd.xlane.f32.xlu2 %v1212_v25 }
 0xeb5   :  { %1299 = vrot.lane.b32.xlu0 %v2847_v29, %s2489_s18 }
 0xedf   :  { %1353 = vmax.xlane.f32.xlu0 %v1352_v28 }
 0xef3   :  { %1521 = vrot.lane.b32.xlu0 %v2880_v42, %s2488_s17 }
 0xefb   :  { %1664 = vrot.lane.b32.xlu0 %v2911_v60, %s2482_s11 }
 0xf03   :  { %1731 = vrot.lane.b32.xlu0 %v2911_v60, %s2485_s14 }
 0xf0b   :  { %1795 = vrot.lane.b32.xlu0 %v2911_v60, %s2491_s20 }
 0xf14   :  { %v1214_v30 = vpop.xlane.xlu2 %1213  ;;  %v1217_v31 = vpop.xlane.xlu0 %1216 }
 0xf15   :  { %v1218_v33 = vmul.f32 %v1214_v30, %v2705_v48  ;;  %v1219_v34 = vmul.f32 %v1217_v31, %v2705_v48 }
 0xf17   :  { %v1220_v32 = vsub.f32 %v1209_v23, %v1218_v33  ;;  %v1221_v35 = vsub.f32 %v1211_v22, %v1219_v34 }
 0xf19   :  { %v1222_v36 = vmul.f32 %v1220_v32, %v1220_v32  ;;  %v1223_v21 = vmul.f32 %v1221_v35, %v1221_v35 }
 0xf1b   :  { %v1224_v37 = vsel %vm103_vm0, %v1222_v36, 0.0  ;;  %v1227_v38 = vsel %vm103_vm0, %v1223_v21, 0.0 }
 0xf1c   :  { %1225 = vadd.xlane.f32.xlu1 %v1224_v37  ;;  %1228 = vadd.xlane.f32.xlu2 %v1227_v38 }
 0xf27   :  { %v1300_v41 = vpop.permute.xlu0 %1299 }
 0xf28   :  { %1316 = vmatpush.bf16.msrb.mxu0 %v1300_v41 }
 0xf34   :  { %1260 = vrot.lane.b32.xlu2 %v1256_v43, %s2484_s13 }
 0xf35   :  { %1297 = vrot.lane.b32.xlu1 %v2853_v6, %s2489_s18 }
 0xf3d   :  { %1388 = vrot.lane.b32.xlu1 %v2880_v42, %s2482_s11 }
 0xf45   :  { %1386 = vrot.lane.b32.xlu1 %v2880_v42, %s2486_s15 }
 0xf4d   :  { %1304 = vrot.lane.b32.xlu1 %v2876_v40, %s2489_s18 }
 0xf52   :  { %v1354_v44 = vpop.xlane.xlu0 %1353 }
 0xf53   :  { %v1355_v46 = vsub.f32 %v1351_v27, %v1354_v44 }
 0xf55   :  { %v1356_v2 = vmul.f32 1.442695, %v1355_v46  ;;  %1455 = vrot.lane.b32.xlu1 %v2880_v42, %s2485_s14 }
 0xf57   :  { %2410 = vpow2.f32 %v1356_v2 }
 0xf5d   :  { %v2935_v47 = vpop.eup %2410  ;;  %1453 = vrot.lane.b32.xlu1 %v2880_v42, %s2483_s12 }
 0xf5e   :  { %v1358_v3 = vsel %vm124_vm1, %v2935_v47, 0.0 }
 0xf5f   :  { %1359 = vadd.xlane.f32.xlu2 %v1358_v3 }
 0xf65   :  { %1601 = vrot.lane.b32.xlu1 %v2911_v60, %s2484_s13  ;;  %v1522_v12 = vpop.permute.xlu0 %1521 }
 0xf6d   :  { %1662 = vrot.lane.b32.xlu1 %v2911_v60, %s2486_s15  ;;  %v1665_v20 = vpop.permute.xlu0 %1664 }
 0xf75   :  { %1797 = vrot.lane.b32.xlu1 %v2911_v60, %s2488_s17  ;;  %v1732_v61 = vpop.permute.xlu0 %1731 }
 0xf77   :  { %1519 = vrot.lane.b32.xlu2 %v2880_v42, %s2491_s20 }
 0xf7d   :  { %v1796_v31 = vpop.permute.xlu0 %1795 }
 0xf7f   :  { %1729 = vrot.lane.b32.xlu2 %v2911_v60, %s2483_s12 }
 0xf8f   :  { %v1226_v49 = vpop.xlane.xlu1 %1225  ;;  %v1229_v5 = vpop.xlane.xlu2 %1228 }
 0xf90   :  { %v1230_v52 = vmul.f32 %v1226_v49, %v2705_v48  ;;  %v1231_v54 = vmul.f32 %v1229_v5, %v2705_v48 }
 0xf92   :  { %v1232_v56 = vadd.f32 1e-05, %v1230_v52  ;;  %v1233_v8 = vadd.f32 1e-05, %v1231_v54 }
 0xf94   :  { %2412 = vrsqrt.f32 %v1232_v56  ;;  %vm1240_vm14 = vweird.f32 %v1232_v56  ;;  %vm1250_vm4 = vweird.f32 %v1233_v8 }
 0xf95   :  { %2414 = vrsqrt.f32 %v1233_v8 }
 0xf97   :  { %v1261_v18 = vpop.permute.xlu2 %1260 }
 0xf9a   :  { %v2413_v57 = vpop.eup %2412 }
 0xf9b   :  { %v2415_v59 = vpop.eup %2414  ;;  %v1235_v62 = vmul.f32 %v2413_v57, %v1232_v56  ;;  %vm1241_vm12 = vweird.f32 %v2413_v57 }
 0xf9c   :  { %v1245_v50 = vmul.f32 %v2415_v59, %v1233_v8  ;;  %vm1251_vm13 = vweird.f32 %v2415_v59  ;;  %vm1242_vm15 = vmor %vm1240_vm14, %vm1241_vm12 }
 0xf9d   :  { %v1236_v63 = vmul.f32 %v2413_v57, %v1235_v62  ;;  %vm1252_vm5 = vmor %vm1250_vm4, %vm1251_vm13 }
 0xf9e   :  { %v1246_v4 = vmul.f32 %v2415_v59, %v1245_v50 }
 0xf9f   :  { %v1237_v42 = vmul.f32 0.5, %v1236_v63 }
 0xfa0   :  { %v1247_v7 = vmul.f32 0.5, %v1246_v4 }
 0xfa1   :  { %v1238_v51 = vsub.f32 1.5, %v1237_v42 }
 0xfa2   :  { %v1248_v10 = vsub.f32 1.5, %v1247_v7 }
 0xfa3   :  { %v1239_v9 = vmul.f32 %v2413_v57, %v1238_v51 }
 0xfa4   :  { %v1249_v11 = vmul.f32 %v2415_v59, %v1248_v10 }
 0xfa5   :  { %v1243_v13 = vsel %vm1242_vm15, %v2413_v57, %v1239_v9 }
 0xfa6   :  { %v1253_v14 = vsel %vm1252_vm5, %v2415_v59, %v1249_v11  ;;  %v1254_v15 = vmul.f32 %v1243_v13, %v1220_v32 }
 0xfa7   :  { %v1255_v1 = vmul.f32 %v1253_v14, %v1221_v35  ;;  %v1298_v16 = vpop.permute.xlu1 %1297 }
 0xfa8   :  { %v1257_v0 = vmul.f32 %v1256_v43, %v1254_v15  ;;  %1317 = vmatpush.bf16.msrb.mxu0 %v1298_v16 }
 0xfa9   :  { %v1258_v17 = vmul.f32 %v1256_v43, %v1255_v1 }
 0xfaa   :  { %v1263_v55 = vadd.f32 %v1261_v18, %v1257_v0 }
 0xfab   :  { %v1264_v19 = vadd.f32 %v1261_v18, %v1258_v17 }
 0xfac   :  { %2250 = vmatpush.xpose.msk.msra.mxu0 %vm124_vm1, %v1522_v12 }
 0xfad   :  { %v1296_v45 = vpack.c.bf16 %v1264_v19, %v1263_v55 }
 0xfaf   :  { %2240 = vmatmul.msk.bf16.vlgmr.msrb.gmra.mxu0 %vm103_vm0, %v1296_v45  ;;  %v1389_v58 = vpop.permute.xlu1 %1388 }
 0xfb0   :  { %2256 = vmatpush.xpose.msk.msrb.mxu0 %vm124_vm1, %v1665_v20  ;;  %2244 = vmatpush.xpose.msk.msrb.mxu3 %vm124_vm1, %v1389_v58 }
 0xfb7   :  { %v1387_v22 = vpop.permute.xlu1 %1386 }
 0xfb8   :  { %2245 = vmatmul.msk.f32.vlgmr.msrb.gmra.mxu3 %vm124_vm1, %v1387_v22 }
 0xfbf   :  { %v2958_v23 = vpop.permute.xlu1 %1304 }
 0xfc7   :  { %v1456_v24 = vpop.permute.xlu1 %1455 }
 0xfcf   :  { %v1454_v25 = vpop.permute.xlu1 %1453 }
 0xfd2   :  { %v1360_v26 = vpop.xlane.xlu2 %1359 }
 0xfd3   :  { %2416 = vrcp.f32 %v1360_v26 }
 0xfd7   :  { %v1602_v53 = vpop.permute.xlu1 %1601 }
 0xfd9   :  { %v2417_v33 = vpop.eup %2416 }
 0xfda   :  { %v1520_v27 = vpop.permute.xlu2 %1519  ;;  %v1362_v35 = vmul.f32 %v2417_v33, %v2935_v47 }
 0xfdb   :  { %2251 = vmatmul.msk.f32.vlgmr.msra.gmra.mxu0 %vm124_vm1, %v1520_v27 }
 0xfdf   :  { %v1663_v28 = vpop.permute.xlu1 %1662 }
 0xfe2   :  { %v1730_v38 = vpop.permute.xlu2 %1729 }
 0xfe3   :  { %2257 = vmatmul.msk.f32.vlgmr.msrb.gmra.mxu0 %vm124_vm1, %v1663_v28 }
 0xfe7   :  { %v1798_v30 = vpop.permute.xlu1 %1797 }
 0xfe8   :  { %2262 = vmatpush.xpose.msk.msra.mxu0 %vm124_vm1, %v1798_v30 }
 0xfeb   :  { %2263 = vmatmul.msk.f32.vlgmr.msra.gmra.mxu0 %vm124_vm1, %v1796_v31 }
0x102c   :  { %v1319_v34 = vpop.f32.mrf.mxu0 }
0x102d   :  { %v2965_v32 = vadd.f32 %v1319_v34, %v2958_v23 }
0x102f   :  { %1381 = vmatpush.msra.mxu1 %v2965_v32 }
0x1030   :  { %2243 = vmatmul.msk.f32.vlgmr.msra.gmra.mxu1 %vm124_vm1, %v1362_v35 }
0x1031   :  { %2247 = vmatpush.xpose.msk.msrb.mxu1 %vm124_vm1, %v1456_v24 }
0x1034   :  { %v2978_v41 = vpop.f32.mrf.mxu0 }
0x1035   :  { %2253 = vmatpush.xpose.msk.msra.mxu1 %vm124_vm1, %v1602_v53 }
0x1038   :  { %2248 = vmatmul.msk.f32.vlgmr.msrb.gmra.mxu1 %vm124_vm1, %v1454_v25 }
0x1039   :  { %2259 = vmatpush.xpose.msk.msrb.mxu1 %vm124_vm1, %v1732_v61 }
0x103b   :  { %v1411_v36 = vpop.f32.mrf.mxu3 }
0x103c   :  { %v1414_v21 = vmul.f32 0.35355338, %v1411_v36 }
0x103e   :  { %v1415_v37 = vsel %vm124_vm1, %v1414_v21, -inf }
0x103f   :  { %1416 = vmax.xlane.f32.xlu1 %v1415_v37 }
0x1040   :  { %2254 = vmatmul.msk.f32.vlgmr.msra.gmra.mxu1 %vm124_vm1, %v2911_v60 }
0x1048   :  { %2260 = vmatmul.msk.f32.vlgmr.msrb.gmra.mxu1 %vm124_vm1, %v1730_v38 }
0x1058   :  { %v1544_v43 = vpop.f32.mrf.mxu0 }
0x1059   :  { %v1547_v44 = vmul.f32 0.35355338, %v1544_v43 }
0x105b   :  { %v1548_v46 = vsel %vm124_vm1, %v1547_v44, -inf }
0x105c   :  { %1549 = vmax.xlane.f32.xlu0 %v1548_v46 }
0x1060   :  { %v1687_v2 = vpop.f32.mrf.mxu0 }
0x1061   :  { %v1690_v47 = vmul.f32 0.35355338, %v1687_v2 }
0x1063   :  { %v1691_v3 = vsel %vm124_vm1, %v1690_v47, -inf }
0x1064   :  { %1692 = vmax.xlane.f32.xlu2 %v1691_v3 }
0x1068   :  { %v1820_v49 = vpop.f32.mrf.mxu0 }
0x1069   :  { %v1823_v5 = vmul.f32 0.35355338, %v1820_v49  ;;  %v1322_v49 = vadd.f32 %v2978_v41, %v2958_v23 }
0x106b   :  { %v1824_v52 = vsel %vm124_vm1, %v1823_v5, -inf }
0x106c   :  { %1825 = vmax.xlane.f32.xlu1 %v1824_v52 }
0x1070   :  { %1559 = vrot.lane.b32.xlu0 %v2965_v32, %s2491_s20 }
0x10ad   :  { %v2985_v60 = vpop.f32.mrf.mxu1 }
0x10b2   :  { %v1417_v54 = vpop.xlane.xlu1 %1416 }
0x10b3   :  { %v1418_v56 = vsub.f32 %v1414_v21, %v1417_v54 }
0x10b5   :  { %v1419_v8 = vmul.f32 1.442695, %v1418_v56  ;;  %v1478_v57 = vpop.f32.mrf.mxu1 }
0x10b6   :  { %v1481_v59 = vmul.f32 0.35355338, %v1478_v57 }
0x10b7   :  { %2418 = vpow2.f32 %v1419_v8 }
0x10b8   :  { %v1482_v62 = vsel %vm124_vm1, %v1481_v59, -inf }
0x10b9   :  { %1483 = vmax.xlane.f32.xlu2 %v1482_v62 }
0x10bd   :  { %v2419_v50 = vpop.eup %2418  ;;  %v1624_v11 = vpop.f32.mrf.mxu1 }
0x10be   :  { %v1421_v63 = vsel %vm124_vm1, %v2419_v50, 0.0  ;;  %v1627_v14 = vmul.f32 0.35355338, %v1624_v11 }
0x10c0   :  { %v1628_v16 = vsel %vm124_vm1, %v1627_v14, -inf }
0x10c1   :  { %1422 = vadd.xlane.f32.xlu2 %v1421_v63 }
0x10c5   :  { %v1754_v0 = vpop.f32.mrf.mxu1 }
0x10c6   :  { %v1757_v17 = vmul.f32 0.35355338, %v1754_v0 }
0x10c8   :  { %v1758_v18 = vsel %vm124_vm1, %v1757_v17, -inf }
0x10cf   :  { %v1550_v4 = vpop.xlane.xlu0 %1549 }
0x10d0   :  { %v1551_v42 = vsub.f32 %v1547_v44, %v1550_v4 }
0x10d2   :  { %v1552_v7 = vmul.f32 1.442695, %v1551_v42 }
0x10d4   :  { %2420 = vpow2.f32 %v1552_v7 }
0x10d7   :  { %v1693_v51 = vpop.xlane.xlu2 %1692 }
0x10d8   :  { %v1694_v10 = vsub.f32 %v1690_v47, %v1693_v51 }
0x10d9   :  { %1427 = vrot.lane.b32.xlu2 %v2965_v32, %s2486_s15 }
0x10da   :  { %v2421_v9 = vpop.eup %2420  ;;  %v1695_v12 = vmul.f32 1.442695, %v1694_v10 }
0x10db   :  { %v1554_v13 = vsel %vm124_vm1, %v2421_v9, 0.0 }
0x10dc   :  { %2422 = vpow2.f32 %v1695_v12  ;;  %1555 = vadd.xlane.f32.xlu1 %v1554_v13 }
0x10df   :  { %v1826_v55 = vpop.xlane.xlu1 %1825 }
0x10e0   :  { %v1827_v19 = vsub.f32 %v1823_v5, %v1826_v55 }
0x10e2   :  { %v2992_v15 = vpop.eup %2422  ;;  %v1828_v45 = vmul.f32 1.442695, %v1827_v19  ;;  %v1560_v31 = vpop.permute.xlu0 %1559 }
0x10e3   :  { %v1697_v1 = vsel %vm124_vm1, %v2992_v15, 0.0 }
0x10e4   :  { %1698 = vadd.xlane.f32.xlu0 %v1697_v1  ;;  %1629 = vmax.xlane.f32.xlu1 %v1628_v16  ;;  %2424 = vpow2.f32 %v1828_v45 }
0x10ea   :  { %v3000_v20 = vpop.eup %2424 }
0x10eb   :  { %v1830_v58 = vsel %vm124_vm1, %v3000_v20, 0.0 }
0x10ec   :  { %1759 = vmax.xlane.f32.xlu0 %v1758_v18 }
0x10fd   :  { %1493 = vrot.lane.b32.xlu1 %v2965_v32, %s2483_s12 }
0x1127   :  { %1831 = vadd.xlane.f32.xlu1 %v1830_v58 }
0x112c   :  { %v1484_v22 = vpop.xlane.xlu2 %1483 }
0x112d   :  { %v1485_v24 = vsub.f32 %v1481_v59, %v1484_v22 }
0x112f   :  { %v1486_v25 = vmul.f32 1.442695, %v1485_v24 }
0x1131   :  { %2426 = vpow2.f32 %v1486_v25 }
0x1134   :  { %v1423_v26 = vpop.xlane.xlu2 %1422 }
0x1135   :  { %2428 = vrcp.f32 %v1423_v26 }
0x1137   :  { %v2427_v53 = vpop.eup %2426 }
0x1138   :  { %v1488_v27 = vsel %vm124_vm1, %v2427_v53, 0.0 }
0x1139   :  { %1489 = vadd.xlane.f32.xlu0 %v1488_v27 }
0x113b   :  { %v2429_v28 = vpop.eup %2428 }
0x113c   :  { %v1425_v61 = vmul.f32 %v2429_v28, %v2419_v50  ;;  %v1428_v30 = vpop.permute.xlu2 %1427 }
0x113d   :  { %1448 = vmatpush.msra.mxu2 %v1428_v30 }
0x113e   :  { %2246 = vmatmul.msk.f32.vlgmr.msra.gmra.mxu2 %vm124_vm1, %v1425_v61 }
0x113f   :  { %1580 = vmatpush.msrb.mxu2 %v1560_v31 }
0x114f   :  { %v1556_v33 = vpop.xlane.xlu1 %1555 }
0x1150   :  { %2430 = vrcp.f32 %v1556_v33 }
0x1156   :  { %v2431_v34 = vpop.eup %2430 }
0x1157   :  { %v1558_v32 = vmul.f32 %v2431_v34, %v2421_v9  ;;  %v1630_v35 = vpop.xlane.xlu1 %1629  ;;  %v1699_v36 = vpop.xlane.xlu0 %1698 }
0x1158   :  { %v1631_v21 = vsub.f32 %v1627_v14, %v1630_v35 }
0x1159   :  { %2252 = vmatmul.msk.f32.vlgmr.msrb.gmra.mxu2 %vm124_vm1, %v1558_v32 }
0x115a   :  { %v1632_v37 = vmul.f32 1.442695, %v1631_v21 }
0x115c   :  { %2432 = vpow2.f32 %v1632_v37 }
0x115f   :  { %v1760_v38 = vpop.xlane.xlu0 %1759 }
0x1160   :  { %v1761_v43 = vsub.f32 %v1757_v17, %v1760_v38  ;;  %v2455_v38 = vld [vmem:[%s3093_s0 + $0x18] sm:$0xff] }
0x1162   :  { %v2433_v44 = vpop.eup %2432  ;;  %v1762_v46 = vmul.f32 1.442695, %v1761_v43 }
0x1163   :  { %v1634_v2 = vsel %vm124_vm1, %v2433_v44, 0.0 }
0x1164   :  { %2434 = vpow2.f32 %v1762_v46  ;;  %1635 = vadd.xlane.f32.xlu0 %v1634_v2 }
0x116a   :  { %v2435_v47 = vpop.eup %2434 }
0x116b   :  { %v1764_v3 = vsel %vm124_vm1, %v2435_v47, 0.0 }
0x116c   :  { %1765 = vadd.xlane.f32.xlu2 %v1764_v3 }
0x116f   :  { %v1494_v5 = vpop.permute.xlu1 %1493 }
0x1170   :  { %1514 = vmatpush.msra.mxu3 %v1494_v5 }
0x1172   :  { %1657 = vmatpush.msrb.mxu3 %v1322_v49 }
0x1178   :  { %1703 = vrot.lane.b32.xlu0 %v1322_v49, %s2486_s15 }
0x1180   :  { %1769 = vrot.lane.b32.xlu0 %v1322_v49, %s2483_s12 }
0x1188   :  { %1835 = vrot.lane.b32.xlu0 %v1322_v49, %s2491_s20 }
0x1190   :  { %1879 = vrot.lane.b32.xlu0 %v2847_v29, %s2493_s22 }
0x119a   :  { %v1832_v29 = vpop.xlane.xlu1 %1831 }
0x11ac   :  { %v1490_v52 = vpop.xlane.xlu0 %1489 }
0x11ad   :  { %2436 = vrcp.f32 %v1490_v52 }
0x11b3   :  { %v2437_v54 = vpop.eup %2436 }
0x11b4   :  { %v1492_v56 = vmul.f32 %v2437_v54, %v2427_v53 }
0x11b6   :  { %2249 = vmatmul.msk.f32.vlgmr.msra.gmra.mxu3 %vm124_vm1, %v1492_v56 }
0x11c1   :  { %v1450_v9 = vpop.f32.mrf.mxu2 }
0x11d7   :  { %v1636_v8 = vpop.xlane.xlu0 %1635 }
0x11d8   :  { %2438 = vrcp.f32 %v1636_v8 }
0x11d9   :  { %2440 = vrcp.f32 %v1699_v36 }
0x11dc   :  { %v1582_v11 = vpop.f32.mrf.mxu2 }
0x11de   :  { %v2439_v23 = vpop.eup %2438 }
0x11df   :  { %v1638_v41 = vmul.f32 %v2439_v23, %v2433_v44  ;;  %v1766_v57 = vpop.xlane.xlu2 %1765  ;;  %v2441_v59 = vpop.eup %2440  ;;  %v1949_v23 = vperm.slane %v2873_v39, 1  ;;  %v2131_v39 = vld [vmem:[%s3098_s5 + $0xa] sm:$0x3] }
0x11e0   :  { %2442 = vrcp.f32 %v1766_v57  ;;  %v1701_v62 = vmul.f32 %v2441_v59, %v2992_v15  ;;  %v2307_v57 = vld [vmem:[%s3096_s3 + $0x18] sm:$0xff] }
0x11e1   :  { %2255 = vmatmul.msk.f32.vlgmr.msrb.gmra.mxu3 %vm124_vm1, %v1638_v41  ;;  %2444 = vrcp.f32 %v1832_v29 }
0x11e6   :  { %v2443_v63 = vpop.eup %2442 }
0x11e7   :  { %v1768_v4 = vmul.f32 %v2443_v63, %v2435_v47  ;;  %v2445_v7 = vpop.eup %2444  ;;  %v1959_v63 = vperm.slane %v2131_v39, 0 }
0x11e8   :  { %v1834_v51 = vmul.f32 %v2445_v7, %v3000_v20 }
0x11ea   :  { %v1704_v50 = vpop.permute.xlu0 %1703 }
0x11eb   :  { %1724 = vmatpush.msra.mxu2 %v1704_v50  ;;  %v2306_v50 = vld [vmem:[%s3096_s3 + $0x10] sm:$0xff] }
0x11ec   :  { %2258 = vmatmul.msk.f32.vlgmr.msra.gmra.mxu2 %vm124_vm1, %v1701_v62 }
0x11f2   :  { %v1770_v42 = vpop.permute.xlu0 %1769 }
0x11f3   :  { %1790 = vmatpush.msra.mxu3 %v1770_v42 }
0x11f4   :  { %2261 = vmatmul.msk.f32.vlgmr.msra.gmra.mxu3 %vm124_vm1, %v1768_v4 }
0x11f5   :  { %1981 = vmatpush.bf16.msrb.mxu3 %v2307_v57 }
0x11f9   :  { %1982 = vmatpush.bf16.msrb.mxu3 %v2306_v50 }
0x11fa   :  { %v1836_v10 = vpop.permute.xlu0 %1835 }
0x11fb   :  { %1856 = vmatpush.msrb.mxu2 %v1836_v10 }
0x11fc   :  { %2264 = vmatmul.msk.f32.vlgmr.msrb.gmra.mxu2 %vm124_vm1, %v1834_v51 }
0x1202   :  { %v1880_v18 = vpop.permute.xlu0 %1879 }
0x1203   :  { %1895 = vmatpush.bf16.msra.mxu1 %v1880_v18 }
0x1239   :  { %v1516_v12 = vpop.f32.mrf.mxu3 }
0x1264   :  { %v1659_v13 = vpop.f32.mrf.mxu3 }
0x126f   :  { %v1726_v14 = vpop.f32.mrf.mxu2 }
0x1270   :  { %v2346_v15 = vpack.i.bf16 %v1726_v14, %v1450_v9 }
0x1272   :  { %2347 = vrot.lane.b32.xlu2 %v2346_v15, %s2494_s23 }
0x1277   :  { %v1792_v1 = vpop.f32.mrf.mxu3 }
0x1278   :  { %v2351_v16 = vpack.i.bf16 %v1792_v1, %v1516_v12 }
0x127a   :  { %2352 = vrot.lane.b32.xlu1 %v2351_v16, %s2496_s25 }
0x127f   :  { %v1858_v0 = vpop.f32.mrf.mxu2 }
0x1280   :  { %v2356_v17 = vpack.i.bf16 %v1858_v0, %v1582_v11 }
0x1282   :  { %2357 = vrot.lane.b32.xlu0 %v2356_v17, %s2495_s24 }
0x128a   :  { %1877 = vrot.lane.b32.xlu0 %v2853_v6, %s2493_s22 }
0x1292   :  { %1883 = vrot.lane.b32.xlu0 %v2876_v40, %s2493_s22 }
0x12cc   :  { %v2348_v55 = vpop.permute.xlu2 %2347 }
0x12cd   :  { %v2350_v20 = vunpack.i.h.bf16 %v2348_v55  ;;  %v2349_v58 = vunpack.i.l.bf16 %v2348_v55 }
0x12cf   :  { %v1873_v53 = vsel %vm124_vm1, %v1659_v13, %v2350_v20  ;;  %v1597_v27 = vsel %vm124_vm1, %v2985_v60, %v2349_v58  ;;  %v2454_v60 = vld [vmem:[%s3093_s0 + $0x10] sm:$0xff] }
0x12ec   :  { %v2353_v19 = vpop.permute.xlu1 %2352 }
0x12ed   :  { %v2355_v22 = vunpack.i.h.bf16 %v2353_v19  ;;  %v2354_v24 = vunpack.i.l.bf16 %v2353_v19 }
0x12ef   :  { %v1874_v6 = vsel %vm398_vm2, %v1873_v53, %v2355_v22  ;;  %v1598_v40 = vsel %vm398_vm2, %v1597_v27, %v2354_v24  ;;  %v2310_v53 = vld [vmem:[%s3097_s4 + $0x30] sm:$0xff]  ;;  %v2309_v27 = vld [vmem:[%s3097_s4 + $0x28] sm:$0xff] }
0x12f4   :  { %v2358_v45 = vpop.permute.xlu0 %2357 }
0x12f5   :  { %v2360_v25 = vunpack.i.h.bf16 %v2358_v45  ;;  %v2359_v26 = vunpack.i.l.bf16 %v2358_v45 }
0x12f7   :  { %v1875_v28 = vsel %vm400_vm3, %v1874_v6, %v2360_v25  ;;  %v1599_v61 = vsel %vm400_vm3, %v1598_v40, %v2359_v26  ;;  %v2311_v26 = vld [vmem:[%s3097_s4 + $0x38] sm:$0xff]  ;;  %v2308_v6 = vld [vmem:[%s3097_s4 + $0x20] sm:$0xff] }
0x12f8   :  { %v1876_v31 = vpack.c.bf16 %v1875_v28, %v1599_v61  ;;  %2027 = vmatpush.bf16.msrb.mxu0 %v2311_v26 }
0x12fc   :  { %v1878_v30 = vpop.permute.xlu0 %1877  ;;  %2028 = vmatpush.bf16.msrb.mxu0 %v2310_v53 }
0x12fd   :  { %1896 = vmatpush.bf16.msra.mxu1 %v1878_v30 }
0x1300   :  { %2265 = vmatmul.msk.bf16.vlgmr.msra.gmra.mxu1 %vm103_vm0, %v1876_v31  ;;  %2029 = vmatpush.bf16.msrb.mxu0 %v2309_v27 }
0x1304   :  { %v1884_v33 = vpop.permute.xlu0 %1883  ;;  %2030 = vmatpush.bf16.msrb.mxu0 %v2308_v6 }
0x137d   :  { %v1898_v34 = vpop.f32.mrf.mxu1 }
0x137e   :  { %v1899_v32 = vadd.f32 %v1898_v34, %v1884_v33 }
0x1380   :  { %v1903_v35 = vadd.f32 %v2454_v60, %v1899_v32 }
0x1382   :  { %v1905_v36 = vsel %vm103_vm0, %v1903_v35, 0.0 }
0x1383   :  { %1906 = vadd.xlane.f32.xlu2 %v1905_v36 }
0x1385   :  { %v1900_v21 = vpop.f32.mrf.mxu1 }
0x1386   :  { %v1901_v37 = vadd.f32 %v1900_v21, %v1884_v33 }
0x1388   :  { %v1904_v43 = vadd.f32 %v2455_v38, %v1901_v37 }
0x138a   :  { %v1908_v44 = vsel %vm103_vm0, %v1904_v43, 0.0 }
0x138b   :  { %1909 = vadd.xlane.f32.xlu0 %v1908_v44 }
0x139f   :  { %2017 = vrot.lane.b32.xlu0 %v1959_v63, %s2489_s18 }
0x13f6   :  { %v1907_v46 = vpop.xlane.xlu2 %1906 }
0x13f7   :  { %v1911_v2 = vmul.f32 %v1907_v46, %v2705_v48  ;;  %v2083_v46 = vperm.slane %v2131_v39, 1 }
0x13f9   :  { %v1913_v47 = vsub.f32 %v1903_v35, %v1911_v2 }
0x13fb   :  { %v1915_v3 = vmul.f32 %v1913_v47, %v1913_v47 }
0x13fd   :  { %v1917_v49 = vsel %vm103_vm0, %v1915_v3, 0.0 }
0x13fe   :  { %v1910_v5 = vpop.xlane.xlu0 %1909  ;;  %1918 = vadd.xlane.f32.xlu1 %v1917_v49 }
0x13ff   :  { %v1912_v52 = vmul.f32 %v1910_v5, %v2705_v48 }
0x1401   :  { %v1914_v54 = vsub.f32 %v1904_v43, %v1912_v52 }
0x1403   :  { %v1916_v56 = vmul.f32 %v1914_v54, %v1914_v54 }
0x1405   :  { %v1920_v8 = vsel %vm103_vm0, %v1916_v56, 0.0 }
0x1406   :  { %1921 = vadd.xlane.f32.xlu2 %v1920_v8 }
0x1411   :  { %v2018_v32 = vpop.permute.xlu0 %2017 }
0x141e   :  { %1953 = vrot.lane.b32.xlu2 %v1949_v23, %s2484_s13 }
0x1426   :  { %2087 = vrot.lane.b32.xlu2 %v2083_v46, %s2484_s13 }
0x1471   :  { %v1919_v41 = vpop.xlane.xlu1 %1918 }
0x1472   :  { %v1923_v59 = vmul.f32 %v1919_v41, %v2705_v48 }
0x1474   :  { %v1925_v62 = vadd.f32 1e-05, %v1923_v59 }
0x1476   :  { %2446 = vrsqrt.f32 %v1925_v62  ;;  %vm1933_vm2 = vweird.f32 %v1925_v62 }
0x1479   :  { %v1922_v29 = vpop.xlane.xlu2 %1921 }
0x147a   :  { %v1924_v4 = vmul.f32 %v1922_v29, %v2705_v48 }
0x147c   :  { %v2447_v42 = vpop.eup %2446  ;;  %v1926_v7 = vadd.f32 1e-05, %v1924_v4 }
0x147d   :  { %v1928_v51 = vmul.f32 %v2447_v42, %v1925_v62  ;;  %vm1934_vm1 = vweird.f32 %v2447_v42 }
0x147e   :  { %2448 = vrsqrt.f32 %v1926_v7  ;;  %vm1935_vm3 = vmor %vm1933_vm2, %vm1934_vm1  ;;  %vm1943_vm7 = vweird.f32 %v1926_v7 }
0x147f   :  { %v1929_v10 = vmul.f32 %v2447_v42, %v1928_v51 }
0x1481   :  { %v1930_v9 = vmul.f32 0.5, %v1929_v10  ;;  %v1954_v20 = vpop.permute.xlu2 %1953 }
0x1483   :  { %v1931_v11 = vsub.f32 1.5, %v1930_v9 }
0x1484   :  { %v2449_v12 = vpop.eup %2448 }
0x1485   :  { %v1932_v13 = vmul.f32 %v2447_v42, %v1931_v11  ;;  %v1938_v14 = vmul.f32 %v2449_v12, %v1926_v7  ;;  %vm1944_vm6 = vweird.f32 %v2449_v12 }
0x1486   :  { %vm1945_vm9 = vmor %vm1943_vm7, %vm1944_vm6 }
0x1487   :  { %v1939_v15 = vmul.f32 %v2449_v12, %v1938_v14  ;;  %v1936_v16 = vsel %vm1935_vm3, %v2447_v42, %v1932_v13 }
0x1488   :  { %v1947_v17 = vmul.f32 %v1936_v16, %v1913_v47 }
0x1489   :  { %v1940_v1 = vmul.f32 0.5, %v1939_v15  ;;  %v2088_v15 = vpop.permute.xlu2 %2087 }
0x148a   :  { %v1950_v45 = vmul.f32 %v1949_v23, %v1947_v17 }
0x148b   :  { %v1941_v0 = vsub.f32 1.5, %v1940_v1 }
0x148c   :  { %v1956_v22 = vadd.f32 %v1954_v20, %v1950_v45 }
0x148d   :  { %v1942_v18 = vmul.f32 %v2449_v12, %v1941_v0 }
0x148f   :  { %v1946_v55 = vsel %vm1945_vm9, %v2449_v12, %v1942_v18 }
0x1490   :  { %v1948_v19 = vmul.f32 %v1946_v55, %v1914_v54 }
0x1492   :  { %v1951_v58 = vmul.f32 %v1949_v23, %v1948_v19 }
0x1494   :  { %v1957_v24 = vadd.f32 %v1954_v20, %v1951_v58 }
0x1496   :  { %v1958_v25 = vpack.c.bf16 %v1957_v24, %v1956_v22 }
0x1498   :  { %2274 = vmatmul.msk.bf16.vlgmr.msrb.gmra.mxu3 %vm103_vm0, %v1958_v25 }
0x151b   :  { %v1984_v40 = vpop.f32.mrf.mxu3 }
0x151c   :  { %v1985_v28 = vadd.f32 %v1984_v40, %v1959_v63 }
0x151e   :  { %v1989_v31 = vmax.f32 %v1985_v28, 0.0 }
0x1523   :  { %v1986_v61 = vpop.f32.mrf.mxu3 }
0x1524   :  { %v1987_v30 = vadd.f32 %v1986_v61, %v1959_v63 }
0x1526   :  { %v1990_v33 = vmax.f32 %v1987_v30, 0.0 }
0x1528   :  { %v1991_v34 = vpack.c.bf16 %v1990_v33, %v1989_v31 }
0x152a   :  { %2291 = vmatmul.msk.bf16.vlgmr.msrb.gmra.mxu0 %vm1097_vm8, %v1991_v34 }
0x15a7   :  { %v2032_v60 = vpop.f32.mrf.mxu0 }
0x15a8   :  { %v2033_v35 = vadd.f32 %v2032_v60, %v2018_v32 }
0x15aa   :  { %v2037_v36 = vadd.f32 %v2033_v35, %v1956_v22 }
0x15ac   :  { %v2039_v21 = vsel %vm103_vm0, %v2037_v36, 0.0 }
0x15ad   :  { %2040 = vadd.xlane.f32.xlu1 %v2039_v21 }
0x15af   :  { %v2034_v37 = vpop.f32.mrf.mxu0 }
0x15b0   :  { %v2035_v38 = vadd.f32 %v2034_v37, %v2018_v32 }
0x15b2   :  { %v2038_v43 = vadd.f32 %v2035_v38, %v1957_v24 }
0x15b4   :  { %v2042_v44 = vsel %vm103_vm0, %v2038_v43, 0.0 }
0x15b5   :  { %2043 = vadd.xlane.f32.xlu1 %v2042_v44 }
0x1620   :  { %v2041_v2 = vpop.xlane.xlu1 %2040 }
0x1621   :  { %v2045_v47 = vmul.f32 %v2041_v2, %v2705_v48 }
0x1623   :  { %v2047_v3 = vsub.f32 %v2037_v36, %v2045_v47 }
0x1625   :  { %v2049_v49 = vmul.f32 %v2047_v3, %v2047_v3 }
0x1627   :  { %v2051_v5 = vsel %vm103_vm0, %v2049_v49, 0.0 }
0x1628   :  { %2052 = vadd.xlane.f32.xlu1 %v2051_v5  ;;  %v2044_v52 = vpop.xlane.xlu1 %2043 }
0x1629   :  { %v2046_v54 = vmul.f32 %v2044_v52, %v2705_v48 }
0x162b   :  { %v2048_v56 = vsub.f32 %v2038_v43, %v2046_v54 }
0x162d   :  { %v2050_v8 = vmul.f32 %v2048_v56, %v2048_v56 }
0x162f   :  { %v2054_v23 = vsel %vm103_vm0, %v2050_v8, 0.0 }
0x1630   :  { %2055 = vadd.xlane.f32.xlu0 %v2054_v23 }
0x169b   :  { %v2053_v41 = vpop.xlane.xlu1 %2052 }
0x169c   :  { %v2057_v57 = vmul.f32 %v2053_v41, %v2705_v48 }
0x169e   :  { %v2059_v59 = vadd.f32 1e-05, %v2057_v57 }
0x16a0   :  { %2450 = vrsqrt.f32 %v2059_v59  ;;  %vm2067_vm10 = vweird.f32 %v2059_v59 }
0x16a3   :  { %v2056_v62 = vpop.xlane.xlu0 %2055 }
0x16a4   :  { %v2058_v50 = vmul.f32 %v2056_v62, %v2705_v48 }
0x16a6   :  { %v2451_v39 = vpop.eup %2450  ;;  %v2060_v29 = vadd.f32 1e-05, %v2058_v50 }
0x16a7   :  { %v2062_v63 = vmul.f32 %v2451_v39, %v2059_v59  ;;  %vm2068_vm8 = vweird.f32 %v2451_v39 }
0x16a8   :  { %2452 = vrsqrt.f32 %v2060_v29  ;;  %vm2069_vm11 = vmor %vm2067_vm10, %vm2068_vm8  ;;  %vm2077_vm13 = vweird.f32 %v2060_v29 }
0x16a9   :  { %v2063_v4 = vmul.f32 %v2451_v39, %v2062_v63 }
0x16ab   :  { %v2064_v42 = vmul.f32 0.5, %v2063_v4 }
0x16ad   :  { %v2065_v7 = vsub.f32 1.5, %v2064_v42 }
0x16ae   :  { %v2453_v51 = vpop.eup %2452 }
0x16af   :  { %v2072_v10 = vmul.f32 %v2453_v51, %v2060_v29  ;;  %v2066_v9 = vmul.f32 %v2451_v39, %v2065_v7  ;;  %vm2078_vm12 = vweird.f32 %v2453_v51 }
0x16b0   :  { %vm2079_vm14 = vmor %vm2077_vm13, %vm2078_vm12 }
0x16b1   :  { %v2073_v11 = vmul.f32 %v2453_v51, %v2072_v10  ;;  %v2070_v12 = vsel %vm2069_vm11, %v2451_v39, %v2066_v9 }
0x16b2   :  { %v2081_v13 = vmul.f32 %v2070_v12, %v2047_v3 }
0x16b3   :  { %v2074_v14 = vmul.f32 0.5, %v2073_v11 }
0x16b4   :  { %v2084_v1 = vmul.f32 %v2083_v46, %v2081_v13 }
0x16b5   :  { %v2075_v48 = vsub.f32 1.5, %v2074_v14 }
0x16b6   :  { %v2090_v16 = vadd.f32 %v2088_v15, %v2084_v1 }
0x16b7   :  { %v2076_v0 = vmul.f32 %v2453_v51, %v2075_v48 }
0x16b8   :  { %2092 = vst.msk [vmem:[#allocation2] sm:$0xff] %vm103_vm0, %v2090_v16 }
0x16b9   :  { %v2080_v17 = vsel %vm2079_vm14, %v2453_v51, %v2076_v0 }
0x16ba   :  { %v2082_v18 = vmul.f32 %v2080_v17, %v2048_v56 }
0x16bc   :  { %v2085_v55 = vmul.f32 %v2083_v46, %v2082_v18 }
0x16be   :  { %v2091_v19 = vadd.f32 %v2088_v15, %v2085_v55 }
0x16c0   :  { %2094 = vst.msk [vmem:[#allocation2 + $0x8] sm:$0xff] %vm103_vm0, %v2091_v19 }
0x16c1   :  { %2107 = dma.vmem_to_hbm [thread:$0]  %s2100_s29, 256, %s2102_s27, [#allocation3], %s2500_s30, %s2500_s30, %s2494_s23  }
0x16c2   :  { %2480 = dma.done.wait [#allocation3], 256  }
0x16c3   :  { %2481 = vsyncadd [#allocation3], 4294967040 }
0x16c4   :  { %2112 = vsyncpa [#allocation3], 1 }

</bundles_post_ra>
